<compile_context>
chip_gen: v6e
topology: v6e:2x2x1
jax: 0.10.0
libtpu: 0.0.40
codegen_flags: <defaults>
</compile_context>

<pallas_src>
import math

import jax
import jax.numpy as jnp
from jax.experimental import pallas as pl
from jax.experimental.pallas import tpu as pltpu

B = 2
L_IN = 1056
C_IN, C1, C2 = 4, 16, 32
K1, K2 = 5, 6
T1 = 263                 # after pool4 (LayerNorm1 normalized shape (16, 263))
T2 = 129                 # after pool2 (LayerNorm2 normalized shape (32, 129))
NE, NO = 132, 131        # even / odd halves of the 263 LN1 positions
F_IN = C2 * T2           # 4128
H1, H2 = 1000, 500
H1P, H2P = 1024, 512     # lane-dense padded fc dims
TILE_N = 256             # fc1 output tile (grid axis)
EPS = 1e-5


# ----------------------------------------------------------------------------
# helpers usable inside kernels
# ----------------------------------------------------------------------------
def _sum_all(x):
  # full-slab sum, kept as (1, 1) so everything stays a 2-D vector op
  return jnp.sum(jnp.sum(x, axis=1, keepdims=True), axis=0, keepdims=True)


def _erf(x):
  # TODO(synk): lax.erf has no guaranteed Mosaic lowering; use the
  # Abramowitz-Stegun 7.1.26 rational approximation (|abs err| < 1.5e-7),
  # built only from mul/add/exp/where which definitely lower on TPU.
  p = 0.3275911
  a1, a2, a3, a4, a5 = 0.254829592, -0.284496736, 1.421413741, -1.453152027, 1.061405429
  ax = jnp.abs(x)
  t = 1.0 / (1.0 + p * ax)
  poly = ((((a5 * t + a4) * t + a3) * t + a2) * t + a1) * t
  y = 1.0 - poly * jnp.exp(-ax * ax)
  return jnp.where(x < 0, -y, y)


def _gelu_exact(x):
  # nn.GELU() default = exact erf-based GELU
  return 0.5 * x * (1.0 + _erf(x * (1.0 / math.sqrt(2.0))))


# ----------------------------------------------------------------------------
# Kernel A: conv1 -> pool4 -> LN1 -> conv2 -> pool2 -> LN2   (grid over batch)
# ----------------------------------------------------------------------------
def _conv_stage_kernel(x_ref, w1e_ref, w1oa_ref, w1ob_ref, b1_ref,
                       g1e_ref, g1o_ref, be1e_ref, be1o_ref,
                       w2he_ref, w2ho_ref, b2_ref, g2_ref, be2_ref,
                       out_ref):
  xf = x_ref[0]                                        # (32, 132): xf[q*4+c, u] = x[c, 8u+q]

  # ---- conv1 at the 4 even pool-phases (s = 2m): single tap-stacked push.
  # even_raw rows r*16:(r+1)*16 hold conv1_out[:, 8m + r], r = 0..3.
  even_raw = jnp.dot(w1e_ref[...], xf, preferred_element_type=jnp.float32)   # (64, 132)
  pooled_e = jnp.maximum(
      jnp.maximum(even_raw[0:C1], even_raw[C1:2 * C1]),
      jnp.maximum(even_raw[2 * C1:3 * C1], even_raw[3 * C1:4 * C1])) + b1_ref[...]  # (16,132)

  # ---- conv1 at the 4 odd pool-phases (s = 2m+1): taps split by column shift.
  odd_raw = (
      jnp.dot(w1oa_ref[...], xf[:, 0:NO], preferred_element_type=jnp.float32) +
      jnp.dot(w1ob_ref[...], xf[:, 1:NO + 1], preferred_element_type=jnp.float32))   # (64, 131)
  pooled_o = jnp.maximum(
      jnp.maximum(odd_raw[0:C1], odd_raw[C1:2 * C1]),
      jnp.maximum(odd_raw[2 * C1:3 * C1], odd_raw[3 * C1:4 * C1])) + b1_ref[...]     # (16,131)

  # ---- LayerNorm over the full (16, 263) slab (even+odd halves together)
  n1 = float(C1 * T1)
  mu1 = (_sum_all(pooled_e) + _sum_all(pooled_o)) / n1
  de = pooled_e - mu1
  do = pooled_o - mu1
  var1 = (_sum_all(de * de) + _sum_all(do * do)) / n1
  rstd1 = jax.lax.rsqrt(var1 + EPS)
  he = de * rstd1 * g1e_ref[...] + be1e_ref[...]       # h[:, even s]  (16, 132), in regs
  ho = do * rstd1 * g1o_ref[...] + be1o_ref[...]       # h[:, odd s]   (16, 131), in regs

  # ---- conv2 (both pool2 legs stacked on 64 rows) via per-shift tap-stacked dots
  acc = jnp.dot(w2he_ref[0], he[:, 0:T2], preferred_element_type=jnp.float32)   # (64, 129)
  for d in range(1, 4):
    acc = acc + jnp.dot(w2he_ref[d], he[:, d:d + T2], preferred_element_type=jnp.float32)
  for d in range(3):
    acc = acc + jnp.dot(w2ho_ref[d], ho[:, d:d + T2], preferred_element_type=jnp.float32)
  # MaxPool1d(2): max of even-output block (rows 0:32) and odd-output block (32:64)
  out2 = jnp.maximum(acc[0:C2], acc[C2:2 * C2]) + b2_ref[...]                   # (32, 129)

  # ---- LayerNorm over the full (32, 129) slab
  n2 = float(C2 * T2)
  mu2 = _sum_all(out2) / n2
  d2 = out2 - mu2
  var2 = _sum_all(d2 * d2) / n2
  rstd2 = jax.lax.rsqrt(var2 + EPS)
  out_ref[0] = d2 * rstd2 * g2_ref[...] + be2_ref[...]


def conv_stage(x, conv_params):
  (w1e, w1oa, w1ob, b1c, g1e, g1o, be1e, be1o, w2he, w2ho, b2c, g2, be2) = conv_params
  bsz = x.shape[0]
  # glue: phase-decompose the input, x32[b, q*C_IN + c, u] = x[b, c, 8u + q]
  x32 = jnp.transpose(x.reshape(bsz, C_IN, L_IN // 8, 8),
                      (0, 3, 1, 2)).reshape(bsz, 8 * C_IN, L_IN // 8)
  return pl.pallas_call(
      _conv_stage_kernel,
      out_shape=jax.ShapeDtypeStruct((bsz, C2, T2), jnp.float32),
      grid_spec=pltpu.PrefetchScalarGridSpec(
          num_scalar_prefetch=0,
          grid=(bsz,),
          in_specs=[
              pl.BlockSpec((1, 8 * C_IN, L_IN // 8), lambda b: (b, 0, 0)),
              pl.BlockSpec((4 * C1, 8 * C_IN), lambda b: (0, 0)),
              pl.BlockSpec((4 * C1, 8 * C_IN), lambda b: (0, 0)),
              pl.BlockSpec((4 * C1, 8 * C_IN), lambda b: (0, 0)),
              pl.BlockSpec((C1, 1), lambda b: (0, 0)),
              pl.BlockSpec((C1, NE), lambda b: (0, 0)),
              pl.BlockSpec((C1, NO), lambda b: (0, 0)),
              pl.BlockSpec((C1, NE), lambda b: (0, 0)),
              pl.BlockSpec((C1, NO), lambda b: (0, 0)),
              pl.BlockSpec((4, 2 * C2, C1), lambda b: (0, 0, 0)),
              pl.BlockSpec((3, 2 * C2, C1), lambda b: (0, 0, 0)),
              pl.BlockSpec((C2, 1), lambda b: (0, 0)),
              pl.BlockSpec((C2, T2), lambda b: (0, 0)),
              pl.BlockSpec((C2, T2), lambda b: (0, 0)),
          ],
          out_specs=pl.BlockSpec((1, C2, T2), lambda b: (b, 0, 0)),
      ),
      compiler_params=pltpu.CompilerParams(
          dimension_semantics=("parallel",)),
  )(x32, w1e, w1oa, w1ob, b1c, g1e, g1o, be1e, be1o, w2he, w2ho, b2c, g2, be2)


# ----------------------------------------------------------------------------
# Kernel B: flatten -> fc1 -> GELU -> fc2, fused + tiled over the fc1 output
# dim (reduction grid with resident accumulator). Weights streamed in bf16.
# ----------------------------------------------------------------------------
def _fc_kernel(feat_ref, w1_ref, b1_ref, w2_ref, b2_ref, out_ref):
  j = pl.program_id(0)

  @pl.when(j == 0)
  def _():
    out_ref[...] = jnp.broadcast_to(b2_ref[...], out_ref.shape)

  feat_bf = feat_ref[...].astype(jnp.bfloat16)                       # (B, F_IN)
  h = jnp.dot(feat_bf, w1_ref[...],
              preferred_element_type=jnp.float32) + b1_ref[...]      # (B, TILE_N) f32
  g = _gelu_exact(h)
  out_ref[...] += jnp.dot(g.astype(jnp.bfloat16), w2_ref[...],
                          preferred_element_type=jnp.float32)        # (B, H2P) f32


def fc_stage(feat, wf1p, bf1p, wf2p, bf2p):
  bsz = feat.shape[0]
  out = pl.pallas_call(
      _fc_kernel,
      out_shape=jax.ShapeDtypeStruct((bsz, H2P), jnp.float32),
      grid_spec=pltpu.PrefetchScalarGridSpec(
          num_scalar_prefetch=0,
          grid=(H1P // TILE_N,),
          in_specs=[
              pl.BlockSpec((bsz, F_IN), lambda j: (0, 0)),
              pl.BlockSpec((F_IN, TILE_N), lambda j: (0, j)),
              pl.BlockSpec((1, TILE_N), lambda j: (0, j)),
              pl.BlockSpec((TILE_N, H2P), lambda j: (j, 0)),
              pl.BlockSpec((1, H2P), lambda j: (0, 0)),
          ],
          out_specs=pl.BlockSpec((bsz, H2P), lambda j: (0, 0)),
      ),
      compiler_params=pltpu.CompilerParams(
          dimension_semantics=("arbitrary",)),   # reduction axis (resident out)
  )(feat, wf1p, bf1p, wf2p, bf2p)
  return out[:, :H2]


# ----------------------------------------------------------------------------
# Parameter setup (deterministic, synthetic) + one-time kernel-layout prep
# ----------------------------------------------------------------------------
def init_params(key):
  ks = jax.random.split(key, 12)
  return dict(
      W1=0.10 * jax.random.normal(ks[0], (C1, C_IN, K1), jnp.float32),
      b1=0.05 * jax.random.normal(ks[1], (C1,), jnp.float32),
      g1=1.0 + 0.10 * jax.random.normal(ks[2], (C1, T1), jnp.float32),
      be1=0.10 * jax.random.normal(ks[3], (C1, T1), jnp.float32),
      W2=0.05 * jax.random.normal(ks[4], (C2, C1, K2), jnp.float32),
      b2=0.05 * jax.random.normal(ks[5], (C2,), jnp.float32),
      g2=1.0 + 0.10 * jax.random.normal(ks[6], (C2, T2), jnp.float32),
      be2=0.10 * jax.random.normal(ks[7], (C2, T2), jnp.float32),
      Wf1=0.03 * jax.random.normal(ks[8], (H1, F_IN), jnp.float32),
      bf1=0.02 * jax.random.normal(ks[9], (H1,), jnp.float32),
      Wf2=0.05 * jax.random.normal(ks[10], (H2, H1), jnp.float32),
      bf2=0.02 * jax.random.normal(ks[11], (H2,), jnp.float32),
  )


def kernel_params(p):
  """One-time (outside jit) repacking: tap-stacked conv weights, even/odd LN1
  affine split, pre-transposed + zero-padded + bf16 fc weights."""
  W1, W2 = p["W1"], p["W2"]

  # conv1 tap-stacked weights over the 8 time phases of the pre-strided input.
  # even phases r=0..3 never wrap; odd phases r=4..7 split into A (same col)
  # and B (col+1) parts.
  w1e = jnp.zeros((4 * C1, 8 * C_IN), jnp.float32)
  w1oa = jnp.zeros((4 * C1, 8 * C_IN), jnp.float32)
  w1ob = jnp.zeros((4 * C1, 8 * C_IN), jnp.float32)
  for r in range(4):
    for k in range(K1):
      q = r + k
      w1e = w1e.at[r * C1:(r + 1) * C1, q * C_IN:(q + 1) * C_IN].set(W1[:, :, k])
  for r in range(4, 8):
    rb = r - 4
    for k in range(K1):
      q = r + k
      if q < 8:
        w1oa = w1oa.at[rb * C1:(rb + 1) * C1, q * C_IN:(q + 1) * C_IN].set(W1[:, :, k])
      else:
        w1ob = w1ob.at[rb * C1:(rb + 1) * C1, (q - 8) * C_IN:(q - 7) * C_IN].set(W1[:, :, k])

  # conv2 tap-stacked weights, grouped by he/ho column shift d.
  # Rows 0:32 produce the even conv2 outputs (pool2 left leg),
  # rows 32:64 the odd outputs (right leg).
  w2he = jnp.zeros((4, 2 * C2, C1), jnp.float32)
  w2ho = jnp.zeros((3, 2 * C2, C1), jnp.float32)
  for d in range(3):
    w2he = w2he.at[d, 0:C2].set(W2[:, :, 2 * d])          # even out, tap k=2d
    w2ho = w2ho.at[d, 0:C2].set(W2[:, :, 2 * d + 1])      # even out, tap k=2d+1
    w2ho = w2ho.at[d, C2:2 * C2].set(W2[:, :, 2 * d])     # odd out,  tap k=2d
  for d in range(1, 4):
    w2he = w2he.at[d, C2:2 * C2].set(W2[:, :, 2 * d - 1])  # odd out, tap k=2d-1

  conv_params = (
      w1e, w1oa, w1ob,
      p["b1"].reshape(C1, 1),
      p["g1"][:, 0::2], p["g1"][:, 1::2],        # LN1 affine, even/odd columns
      p["be1"][:, 0::2], p["be1"][:, 1::2],
      w2he, w2ho,
      p["b2"].reshape(C2, 1),
      p["g2"], p["be2"],
  )

  # fc weights: pre-transposed, zero-padded to lane-dense multiples of 128,
  # cast to bf16 once here (f32 accumulation happens in-kernel).
  wf1p = (jnp.zeros((F_IN, H1P), jnp.float32)
          .at[:, :H1].set(p["Wf1"].T).astype(jnp.bfloat16))
  bf1p = jnp.zeros((1, H1P), jnp.float32).at[0, :H1].set(p["bf1"])
  wf2p = (jnp.zeros((H1P, H2P), jnp.float32)
          .at[:H1, :H2].set(p["Wf2"].T).astype(jnp.bfloat16))
  bf2p = jnp.zeros((1, H2P), jnp.float32).at[0, :H2].set(p["bf2"])
  fc_params = (wf1p, bf1p, wf2p, bf2p)
  return conv_params, fc_params


def audio_backbone_forward(x, params):
  conv_params, fc_params = params
  convout = conv_stage(x, conv_params)                 # (B, 32, 129)
  feat = convout.reshape(convout.shape[0], F_IN)       # torch.flatten(out, 1)
  return fc_stage(feat, *fc_params)                    # (B, 500)


# ----------------------------------------------------------------------------
# Pure-JAX reference (mirrors the PyTorch forward) for a sanity check
# ----------------------------------------------------------------------------
def reference_forward(x, p):
  hp = jax.lax.Precision.HIGHEST
  c1 = sum(jnp.einsum("oc,bct->bot", p["W1"][:, :, k], x[:, :, k:k + 1052],
                      precision=hp) for k in range(K1)) + p["b1"][None, :, None]
  h = c1.reshape(x.shape[0], C1, T1, 4).max(axis=-1)
  mu = h.mean(axis=(1, 2), keepdims=True)
  var = ((h - mu) ** 2).mean(axis=(1, 2), keepdims=True)
  h = (h - mu) * jax.lax.rsqrt(var + EPS) * p["g1"][None] + p["be1"][None]
  c2 = sum(jnp.einsum("oc,bct->bot", p["W2"][:, :, k], h[:, :, k:k + 258],
                      precision=hp) for k in range(K2)) + p["b2"][None, :, None]
  h2 = c2.reshape(x.shape[0], C2, T2, 2).max(axis=-1)
  mu2 = h2.mean(axis=(1, 2), keepdims=True)
  var2 = ((h2 - mu2) ** 2).mean(axis=(1, 2), keepdims=True)
  h2 = (h2 - mu2) * jax.lax.rsqrt(var2 + EPS) * p["g2"][None] + p["be2"][None]
  flat = h2.reshape(x.shape[0], -1)
  z = jnp.dot(flat, p["Wf1"].T, precision=hp) + p["bf1"]
  z = 0.5 * z * (1.0 + jax.scipy.special.erf(z / jnp.sqrt(2.0)))
  return jnp.dot(z, p["Wf2"].T, precision=hp) + p["bf2"]


if __name__ == "__main__":
  key = jax.random.PRNGKey(0)
  pkey, xkey = jax.random.split(key)
  torch_style_params = init_params(pkey)
  x = jax.random.normal(xkey, (B, C_IN, L_IN), jnp.float32)   # NCW input

  params = kernel_params(torch_style_params)                  # one-time repack
  out = jax.jit(audio_backbone_forward)(x, params)
  out = jax.block_until_ready(out)

  assert out.shape == (B, H2)
  ref = reference_forward(x, torch_style_params)
  if not jnp.allclose(out, ref, atol=5e-2, rtol=5e-2):
    raise AssertionError("Pallas kernel output does not match reference")
  print("KERNEL_OK")
</pallas_src>

<mosaic_0001>
module attributes {stable_mosaic.version = 11 : i64} {
  func.func @_conv_stage_kernel(%arg0: i32, %arg1: memref<1x32x132xf32, #tpu.memory_space<vmem>>, %arg2: memref<64x32xf32, #tpu.memory_space<vmem>>, %arg3: memref<64x32xf32, #tpu.memory_space<vmem>>, %arg4: memref<64x32xf32, #tpu.memory_space<vmem>>, %arg5: memref<16x1xf32, #tpu.memory_space<vmem>>, %arg6: memref<16x132xf32, #tpu.memory_space<vmem>>, %arg7: memref<16x131xf32, #tpu.memory_space<vmem>>, %arg8: memref<16x132xf32, #tpu.memory_space<vmem>>, %arg9: memref<16x131xf32, #tpu.memory_space<vmem>>, %arg10: memref<4x64x16xf32, #tpu.memory_space<vmem>>, %arg11: memref<3x64x16xf32, #tpu.memory_space<vmem>>, %arg12: memref<32x1xf32, #tpu.memory_space<vmem>>, %arg13: memref<32x129xf32, #tpu.memory_space<vmem>>, %arg14: memref<32x129xf32, #tpu.memory_space<vmem>>, %arg15: memref<1x32x129xf32, #tpu.memory_space<vmem>>) attributes {dimension_semantics = [#tpu.dimension_semantics<parallel>], iteration_bounds = array<i64: 2>, scalar_prefetch = 0 : i64, scratch_operands = 0 : i64, tpu.core_type = #tpu.core_type<tc>, window_params = [{transform_indices = @transform_0, window_bounds = array<i64: 1, 32, 132>}, {pipeline_mode = #tpu.pipeline_mode<synchronous>, transform_indices = @transform_1, window_bounds = array<i64: 64, 32>}, {pipeline_mode = #tpu.pipeline_mode<synchronous>, transform_indices = @transform_2, window_bounds = array<i64: 64, 32>}, {pipeline_mode = #tpu.pipeline_mode<synchronous>, transform_indices = @transform_3, window_bounds = array<i64: 64, 32>}, {pipeline_mode = #tpu.pipeline_mode<synchronous>, transform_indices = @transform_4, window_bounds = array<i64: 16, 1>}, {pipeline_mode = #tpu.pipeline_mode<synchronous>, transform_indices = @transform_5, window_bounds = array<i64: 16, 132>}, {pipeline_mode = #tpu.pipeline_mode<synchronous>, transform_indices = @transform_6, window_bounds = array<i64: 16, 131>}, {pipeline_mode = #tpu.pipeline_mode<synchronous>, transform_indices = @transform_7, window_bounds = array<i64: 16, 132>}, {pipeline_mode = #tpu.pipeline_mode<synchronous>, transform_indices = @transform_8, window_bounds = array<i64: 16, 131>}, {pipeline_mode = #tpu.pipeline_mode<synchronous>, transform_indices = @transform_9, window_bounds = array<i64: 4, 64, 16>}, {pipeline_mode = #tpu.pipeline_mode<synchronous>, transform_indices = @transform_10, window_bounds = array<i64: 3, 64, 16>}, {pipeline_mode = #tpu.pipeline_mode<synchronous>, transform_indices = @transform_11, window_bounds = array<i64: 32, 1>}, {pipeline_mode = #tpu.pipeline_mode<synchronous>, transform_indices = @transform_12, window_bounds = array<i64: 32, 129>}, {pipeline_mode = #tpu.pipeline_mode<synchronous>, transform_indices = @transform_13, window_bounds = array<i64: 32, 129>}, {transform_indices = @transform_14, window_bounds = array<i64: 1, 32, 129>}]} {
    %c0 = arith.constant 0 : index
    %c0_0 = arith.constant 0 : index
    %c0_1 = arith.constant 0 : index
    %0 = vector.load %arg1[%c0, %c0_0, %c0_1] : memref<1x32x132xf32, #tpu.memory_space<vmem>>, vector<1x32x132xf32>
    %1 = vector.shape_cast %0 : vector<1x32x132xf32> to vector<32x132xf32>
    %c0_2 = arith.constant 0 : index
    %c0_3 = arith.constant 0 : index
    %2 = vector.load %arg2[%c0_2, %c0_3] : memref<64x32xf32, #tpu.memory_space<vmem>>, vector<64x32xf32>
    %cst = arith.constant dense<0.000000e+00> : vector<64x132xf32>
    %3 = tpu.matmul %2, %1, %cst {dimension_numbers = #tpu.dot_dimension_numbers<[1], [0], [0], [1], [0, 0, 1, 1], [], []>} : vector<64x32xf32>, vector<32x132xf32>, vector<64x132xf32> -> vector<64x132xf32>
    %4 = vector.extract_strided_slice %3 {offsets = [0, 0], sizes = [16, 132], strides = [1, 1]} : vector<64x132xf32> to vector<16x132xf32>
    %5 = vector.extract_strided_slice %3 {offsets = [16, 0], sizes = [16, 132], strides = [1, 1]} : vector<64x132xf32> to vector<16x132xf32>
    %6 = arith.maximumf %4, %5 : vector<16x132xf32>
    %7 = vector.extract_strided_slice %3 {offsets = [32, 0], sizes = [16, 132], strides = [1, 1]} : vector<64x132xf32> to vector<16x132xf32>
    %8 = vector.extract_strided_slice %3 {offsets = [48, 0], sizes = [16, 132], strides = [1, 1]} : vector<64x132xf32> to vector<16x132xf32>
    %9 = arith.maximumf %7, %8 : vector<16x132xf32>
    %10 = arith.maximumf %6, %9 : vector<16x132xf32>
    %c0_4 = arith.constant 0 : index
    %c0_5 = arith.constant 0 : index
    %11 = vector.load %arg5[%c0_4, %c0_5] : memref<16x1xf32, #tpu.memory_space<vmem>>, vector<16x1xf32>
    %12 = vector.broadcast %11 : vector<16x1xf32> to vector<16x132xf32>
    %13 = arith.addf %10, %12 : vector<16x132xf32>
    %c0_6 = arith.constant 0 : index
    %c0_7 = arith.constant 0 : index
    %14 = vector.load %arg3[%c0_6, %c0_7] : memref<64x32xf32, #tpu.memory_space<vmem>>, vector<64x32xf32>
    %15 = vector.extract_strided_slice %1 {offsets = [0, 0], sizes = [32, 131], strides = [1, 1]} : vector<32x132xf32> to vector<32x131xf32>
    %cst_8 = arith.constant dense<0.000000e+00> : vector<64x131xf32>
    %16 = tpu.matmul %14, %15, %cst_8 {dimension_numbers = #tpu.dot_dimension_numbers<[1], [0], [0], [1], [0, 0, 1, 1], [], []>} : vector<64x32xf32>, vector<32x131xf32>, vector<64x131xf32> -> vector<64x131xf32>
    %c0_9 = arith.constant 0 : index
    %c0_10 = arith.constant 0 : index
    %17 = vector.load %arg4[%c0_9, %c0_10] : memref<64x32xf32, #tpu.memory_space<vmem>>, vector<64x32xf32>
    %18 = vector.extract_strided_slice %1 {offsets = [0, 1], sizes = [32, 131], strides = [1, 1]} : vector<32x132xf32> to vector<32x131xf32>
    %cst_11 = arith.constant dense<0.000000e+00> : vector<64x131xf32>
    %19 = tpu.matmul %17, %18, %cst_11 {dimension_numbers = #tpu.dot_dimension_numbers<[1], [0], [0], [1], [0, 0, 1, 1], [], []>} : vector<64x32xf32>, vector<32x131xf32>, vector<64x131xf32> -> vector<64x131xf32>
    %20 = arith.addf %16, %19 : vector<64x131xf32>
    %21 = vector.extract_strided_slice %20 {offsets = [0, 0], sizes = [16, 131], strides = [1, 1]} : vector<64x131xf32> to vector<16x131xf32>
    %22 = vector.extract_strided_slice %20 {offsets = [16, 0], sizes = [16, 131], strides = [1, 1]} : vector<64x131xf32> to vector<16x131xf32>
    %23 = arith.maximumf %21, %22 : vector<16x131xf32>
    %24 = vector.extract_strided_slice %20 {offsets = [32, 0], sizes = [16, 131], strides = [1, 1]} : vector<64x131xf32> to vector<16x131xf32>
    %25 = vector.extract_strided_slice %20 {offsets = [48, 0], sizes = [16, 131], strides = [1, 1]} : vector<64x131xf32> to vector<16x131xf32>
    %26 = arith.maximumf %24, %25 : vector<16x131xf32>
    %27 = arith.maximumf %23, %26 : vector<16x131xf32>
    %c0_12 = arith.constant 0 : index
    %c0_13 = arith.constant 0 : index
    %28 = vector.load %arg5[%c0_12, %c0_13] : memref<16x1xf32, #tpu.memory_space<vmem>>, vector<16x1xf32>
    %29 = vector.broadcast %28 : vector<16x1xf32> to vector<16x131xf32>
    %30 = arith.addf %27, %29 : vector<16x131xf32>
    %cst_14 = arith.constant dense<0.000000e+00> : vector<16xf32>
    %31 = vector.multi_reduction <add>, %13, %cst_14 [1] : vector<16x132xf32> to vector<16xf32>
    %32 = vector.shape_cast %31 : vector<16xf32> to vector<16x1xf32>
    %cst_15 = arith.constant dense<0.000000e+00> : vector<1xf32>
    %33 = vector.multi_reduction <add>, %32, %cst_15 [0] : vector<16x1xf32> to vector<1xf32>
    %34 = vector.shape_cast %33 : vector<1xf32> to vector<1x1xf32>
    %cst_16 = arith.constant dense<0.000000e+00> : vector<16xf32>
    %35 = vector.multi_reduction <add>, %30, %cst_16 [1] : vector<16x131xf32> to vector<16xf32>
    %36 = vector.shape_cast %35 : vector<16xf32> to vector<16x1xf32>
    %cst_17 = arith.constant dense<0.000000e+00> : vector<1xf32>
    %37 = vector.multi_reduction <add>, %36, %cst_17 [0] : vector<16x1xf32> to vector<1xf32>
    %38 = vector.shape_cast %37 : vector<1xf32> to vector<1x1xf32>
    %39 = arith.addf %34, %38 : vector<1x1xf32>
    %cst_18 = arith.constant 4.208000e+03 : f32
    %40 = vector.broadcast %cst_18 : f32 to vector<1x1xf32>
    %41 = arith.divf %39, %40 : vector<1x1xf32>
    %42 = vector.broadcast %41 : vector<1x1xf32> to vector<16x132xf32>
    %43 = arith.subf %13, %42 : vector<16x132xf32>
    %44 = vector.broadcast %41 : vector<1x1xf32> to vector<16x131xf32>
    %45 = arith.subf %30, %44 : vector<16x131xf32>
    %46 = arith.mulf %43, %43 : vector<16x132xf32>
    %cst_19 = arith.constant dense<0.000000e+00> : vector<16xf32>
    %47 = vector.multi_reduction <add>, %46, %cst_19 [1] : vector<16x132xf32> to vector<16xf32>
    %48 = vector.shape_cast %47 : vector<16xf32> to vector<16x1xf32>
    %cst_20 = arith.constant dense<0.000000e+00> : vector<1xf32>
    %49 = vector.multi_reduction <add>, %48, %cst_20 [0] : vector<16x1xf32> to vector<1xf32>
    %50 = vector.shape_cast %49 : vector<1xf32> to vector<1x1xf32>
    %51 = arith.mulf %45, %45 : vector<16x131xf32>
    %cst_21 = arith.constant dense<0.000000e+00> : vector<16xf32>
    %52 = vector.multi_reduction <add>, %51, %cst_21 [1] : vector<16x131xf32> to vector<16xf32>
    %53 = vector.shape_cast %52 : vector<16xf32> to vector<16x1xf32>
    %cst_22 = arith.constant dense<0.000000e+00> : vector<1xf32>
    %54 = vector.multi_reduction <add>, %53, %cst_22 [0] : vector<16x1xf32> to vector<1xf32>
    %55 = vector.shape_cast %54 : vector<1xf32> to vector<1x1xf32>
    %56 = arith.addf %50, %55 : vector<1x1xf32>
    %cst_23 = arith.constant 4.208000e+03 : f32
    %57 = vector.broadcast %cst_23 : f32 to vector<1x1xf32>
    %58 = arith.divf %56, %57 : vector<1x1xf32>
    %cst_24 = arith.constant 9.99999974E-6 : f32
    %59 = vector.broadcast %cst_24 : f32 to vector<1x1xf32>
    %60 = arith.addf %58, %59 : vector<1x1xf32>
    %61 = math.rsqrt %60 : vector<1x1xf32>
    %62 = vector.broadcast %61 : vector<1x1xf32> to vector<16x132xf32>
    %63 = arith.mulf %43, %62 : vector<16x132xf32>
    %c0_25 = arith.constant 0 : index
    %c0_26 = arith.constant 0 : index
    %64 = vector.load %arg6[%c0_25, %c0_26] : memref<16x132xf32, #tpu.memory_space<vmem>>, vector<16x132xf32>
    %65 = arith.mulf %63, %64 : vector<16x132xf32>
    %c0_27 = arith.constant 0 : index
    %c0_28 = arith.constant 0 : index
    %66 = vector.load %arg8[%c0_27, %c0_28] : memref<16x132xf32, #tpu.memory_space<vmem>>, vector<16x132xf32>
    %67 = arith.addf %65, %66 : vector<16x132xf32>
    %68 = vector.broadcast %61 : vector<1x1xf32> to vector<16x131xf32>
    %69 = arith.mulf %45, %68 : vector<16x131xf32>
    %c0_29 = arith.constant 0 : index
    %c0_30 = arith.constant 0 : index
    %70 = vector.load %arg7[%c0_29, %c0_30] : memref<16x131xf32, #tpu.memory_space<vmem>>, vector<16x131xf32>
    %71 = arith.mulf %69, %70 : vector<16x131xf32>
    %c0_31 = arith.constant 0 : index
    %c0_32 = arith.constant 0 : index
    %72 = vector.load %arg9[%c0_31, %c0_32] : memref<16x131xf32, #tpu.memory_space<vmem>>, vector<16x131xf32>
    %73 = arith.addf %71, %72 : vector<16x131xf32>
    %c0_33 = arith.constant 0 : index
    %c0_34 = arith.constant 0 : index
    %c0_35 = arith.constant 0 : index
    %74 = vector.load %arg10[%c0_33, %c0_34, %c0_35] : memref<4x64x16xf32, #tpu.memory_space<vmem>>, vector<1x64x16xf32>
    %75 = vector.shape_cast %74 : vector<1x64x16xf32> to vector<64x16xf32>
    %76 = vector.extract_strided_slice %67 {offsets = [0, 0], sizes = [16, 129], strides = [1, 1]} : vector<16x132xf32> to vector<16x129xf32>
    %cst_36 = arith.constant dense<0.000000e+00> : vector<64x129xf32>
    %77 = tpu.matmul %75, %76, %cst_36 {dimension_numbers = #tpu.dot_dimension_numbers<[1], [0], [0], [1], [0, 0, 1, 1], [], []>} : vector<64x16xf32>, vector<16x129xf32>, vector<64x129xf32> -> vector<64x129xf32>
    %c1 = arith.constant 1 : index
    %c0_37 = arith.constant 0 : index
    %c0_38 = arith.constant 0 : index
    %78 = vector.load %arg10[%c1, %c0_37, %c0_38] : memref<4x64x16xf32, #tpu.memory_space<vmem>>, vector<1x64x16xf32>
    %79 = vector.shape_cast %78 : vector<1x64x16xf32> to vector<64x16xf32>
    %80 = vector.extract_strided_slice %67 {offsets = [0, 1], sizes = [16, 129], strides = [1, 1]} : vector<16x132xf32> to vector<16x129xf32>
    %cst_39 = arith.constant dense<0.000000e+00> : vector<64x129xf32>
    %81 = tpu.matmul %79, %80, %cst_39 {dimension_numbers = #tpu.dot_dimension_numbers<[1], [0], [0], [1], [0, 0, 1, 1], [], []>} : vector<64x16xf32>, vector<16x129xf32>, vector<64x129xf32> -> vector<64x129xf32>
    %82 = arith.addf %77, %81 : vector<64x129xf32>
    %c2 = arith.constant 2 : index
    %c0_40 = arith.constant 0 : index
    %c0_41 = arith.constant 0 : index
    %83 = vector.load %arg10[%c2, %c0_40, %c0_41] : memref<4x64x16xf32, #tpu.memory_space<vmem>>, vector<1x64x16xf32>
    %84 = vector.shape_cast %83 : vector<1x64x16xf32> to vector<64x16xf32>
    %85 = vector.extract_strided_slice %67 {offsets = [0, 2], sizes = [16, 129], strides = [1, 1]} : vector<16x132xf32> to vector<16x129xf32>
    %cst_42 = arith.constant dense<0.000000e+00> : vector<64x129xf32>
    %86 = tpu.matmul %84, %85, %cst_42 {dimension_numbers = #tpu.dot_dimension_numbers<[1], [0], [0], [1], [0, 0, 1, 1], [], []>} : vector<64x16xf32>, vector<16x129xf32>, vector<64x129xf32> -> vector<64x129xf32>
    %87 = arith.addf %82, %86 : vector<64x129xf32>
    %c3 = arith.constant 3 : index
    %c0_43 = arith.constant 0 : index
    %c0_44 = arith.constant 0 : index
    %88 = vector.load %arg10[%c3, %c0_43, %c0_44] : memref<4x64x16xf32, #tpu.memory_space<vmem>>, vector<1x64x16xf32>
    %89 = vector.shape_cast %88 : vector<1x64x16xf32> to vector<64x16xf32>
    %90 = vector.extract_strided_slice %67 {offsets = [0, 3], sizes = [16, 129], strides = [1, 1]} : vector<16x132xf32> to vector<16x129xf32>
    %cst_45 = arith.constant dense<0.000000e+00> : vector<64x129xf32>
    %91 = tpu.matmul %89, %90, %cst_45 {dimension_numbers = #tpu.dot_dimension_numbers<[1], [0], [0], [1], [0, 0, 1, 1], [], []>} : vector<64x16xf32>, vector<16x129xf32>, vector<64x129xf32> -> vector<64x129xf32>
    %92 = arith.addf %87, %91 : vector<64x129xf32>
    %c0_46 = arith.constant 0 : index
    %c0_47 = arith.constant 0 : index
    %c0_48 = arith.constant 0 : index
    %93 = vector.load %arg11[%c0_46, %c0_47, %c0_48] : memref<3x64x16xf32, #tpu.memory_space<vmem>>, vector<1x64x16xf32>
    %94 = vector.shape_cast %93 : vector<1x64x16xf32> to vector<64x16xf32>
    %95 = vector.extract_strided_slice %73 {offsets = [0, 0], sizes = [16, 129], strides = [1, 1]} : vector<16x131xf32> to vector<16x129xf32>
    %cst_49 = arith.constant dense<0.000000e+00> : vector<64x129xf32>
    %96 = tpu.matmul %94, %95, %cst_49 {dimension_numbers = #tpu.dot_dimension_numbers<[1], [0], [0], [1], [0, 0, 1, 1], [], []>} : vector<64x16xf32>, vector<16x129xf32>, vector<64x129xf32> -> vector<64x129xf32>
    %97 = arith.addf %92, %96 : vector<64x129xf32>
    %c1_50 = arith.constant 1 : index
    %c0_51 = arith.constant 0 : index
    %c0_52 = arith.constant 0 : index
    %98 = vector.load %arg11[%c1_50, %c0_51, %c0_52] : memref<3x64x16xf32, #tpu.memory_space<vmem>>, vector<1x64x16xf32>
    %99 = vector.shape_cast %98 : vector<1x64x16xf32> to vector<64x16xf32>
    %100 = vector.extract_strided_slice %73 {offsets = [0, 1], sizes = [16, 129], strides = [1, 1]} : vector<16x131xf32> to vector<16x129xf32>
    %cst_53 = arith.constant dense<0.000000e+00> : vector<64x129xf32>
    %101 = tpu.matmul %99, %100, %cst_53 {dimension_numbers = #tpu.dot_dimension_numbers<[1], [0], [0], [1], [0, 0, 1, 1], [], []>} : vector<64x16xf32>, vector<16x129xf32>, vector<64x129xf32> -> vector<64x129xf32>
    %102 = arith.addf %97, %101 : vector<64x129xf32>
    %c2_54 = arith.constant 2 : index
    %c0_55 = arith.constant 0 : index
    %c0_56 = arith.constant 0 : index
    %103 = vector.load %arg11[%c2_54, %c0_55, %c0_56] : memref<3x64x16xf32, #tpu.memory_space<vmem>>, vector<1x64x16xf32>
    %104 = vector.shape_cast %103 : vector<1x64x16xf32> to vector<64x16xf32>
    %105 = vector.extract_strided_slice %73 {offsets = [0, 2], sizes = [16, 129], strides = [1, 1]} : vector<16x131xf32> to vector<16x129xf32>
    %cst_57 = arith.constant dense<0.000000e+00> : vector<64x129xf32>
    %106 = tpu.matmul %104, %105, %cst_57 {dimension_numbers = #tpu.dot_dimension_numbers<[1], [0], [0], [1], [0, 0, 1, 1], [], []>} : vector<64x16xf32>, vector<16x129xf32>, vector<64x129xf32> -> vector<64x129xf32>
    %107 = arith.addf %102, %106 : vector<64x129xf32>
    %108 = vector.extract_strided_slice %107 {offsets = [0, 0], sizes = [32, 129], strides = [1, 1]} : vector<64x129xf32> to vector<32x129xf32>
    %109 = vector.extract_strided_slice %107 {offsets = [32, 0], sizes = [32, 129], strides = [1, 1]} : vector<64x129xf32> to vector<32x129xf32>
    %110 = arith.maximumf %108, %109 : vector<32x129xf32>
    %c0_58 = arith.constant 0 : index
    %c0_59 = arith.constant 0 : index
    %111 = vector.load %arg12[%c0_58, %c0_59] : memref<32x1xf32, #tpu.memory_space<vmem>>, vector<32x1xf32>
    %112 = vector.broadcast %111 : vector<32x1xf32> to vector<32x129xf32>
    %113 = arith.addf %110, %112 : vector<32x129xf32>
    %cst_60 = arith.constant dense<0.000000e+00> : vector<32xf32>
    %114 = vector.multi_reduction <add>, %113, %cst_60 [1] : vector<32x129xf32> to vector<32xf32>
    %115 = vector.shape_cast %114 : vector<32xf32> to vector<32x1xf32>
    %cst_61 = arith.constant dense<0.000000e+00> : vector<1xf32>
    %116 = vector.multi_reduction <add>, %115, %cst_61 [0] : vector<32x1xf32> to vector<1xf32>
    %117 = vector.shape_cast %116 : vector<1xf32> to vector<1x1xf32>
    %cst_62 = arith.constant 4.128000e+03 : f32
    %118 = vector.broadcast %cst_62 : f32 to vector<1x1xf32>
    %119 = arith.divf %117, %118 : vector<1x1xf32>
    %120 = vector.broadcast %119 : vector<1x1xf32> to vector<32x129xf32>
    %121 = arith.subf %113, %120 : vector<32x129xf32>
    %122 = arith.mulf %121, %121 : vector<32x129xf32>
    %cst_63 = arith.constant dense<0.000000e+00> : vector<32xf32>
    %123 = vector.multi_reduction <add>, %122, %cst_63 [1] : vector<32x129xf32> to vector<32xf32>
    %124 = vector.shape_cast %123 : vector<32xf32> to vector<32x1xf32>
    %cst_64 = arith.constant dense<0.000000e+00> : vector<1xf32>
    %125 = vector.multi_reduction <add>, %124, %cst_64 [0] : vector<32x1xf32> to vector<1xf32>
    %126 = vector.shape_cast %125 : vector<1xf32> to vector<1x1xf32>
    %cst_65 = arith.constant 4.128000e+03 : f32
    %127 = vector.broadcast %cst_65 : f32 to vector<1x1xf32>
    %128 = arith.divf %126, %127 : vector<1x1xf32>
    %cst_66 = arith.constant 9.99999974E-6 : f32
    %129 = vector.broadcast %cst_66 : f32 to vector<1x1xf32>
    %130 = arith.addf %128, %129 : vector<1x1xf32>
    %131 = math.rsqrt %130 : vector<1x1xf32>
    %132 = vector.broadcast %131 : vector<1x1xf32> to vector<32x129xf32>
    %133 = arith.mulf %121, %132 : vector<32x129xf32>
    %c0_67 = arith.constant 0 : index
    %c0_68 = arith.constant 0 : index
    %134 = vector.load %arg13[%c0_67, %c0_68] : memref<32x129xf32, #tpu.memory_space<vmem>>, vector<32x129xf32>
    %135 = arith.mulf %133, %134 : vector<32x129xf32>
    %c0_69 = arith.constant 0 : index
    %c0_70 = arith.constant 0 : index
    %136 = vector.load %arg14[%c0_69, %c0_70] : memref<32x129xf32, #tpu.memory_space<vmem>>, vector<32x129xf32>
    %137 = arith.addf %135, %136 : vector<32x129xf32>
    %c0_71 = arith.constant 0 : index
    %c0_72 = arith.constant 0 : index
    %c0_73 = arith.constant 0 : index
    %138 = vector.load %arg15[%c0_71, %c0_72, %c0_73] : memref<1x32x129xf32, #tpu.memory_space<vmem>>, vector<1x32x129xf32>
    %139 = vector.shape_cast %138 : vector<1x32x129xf32> to vector<32x129xf32>
    %140 = vector.shape_cast %137 : vector<32x129xf32> to vector<1x32x129xf32>
    tpu.vector_store %arg15[%c0_71, %c0_72, %c0_73], %140 {strides = array<i32>} : memref<1x32x129xf32, #tpu.memory_space<vmem>>, vector<1x32x129xf32>,
    return
  }
  func.func @transform_0(%arg0: i32) -> (i32, i32, i32) {
    %c0_i32 = arith.constant 0 : i32
    %c0_i32_0 = arith.constant 0 : i32
    %c0_i32_1 = arith.constant 0 : i32
    return %arg0, %c0_i32, %c0_i32_0 : i32, i32, i32
  }
  func.func @transform_1(%arg0: i32) -> (i32, i32) {
    %c0_i32 = arith.constant 0 : i32
    %c0_i32_0 = arith.constant 0 : i32
    %c0_i32_1 = arith.constant 0 : i32
    return %c0_i32, %c0_i32_0 : i32, i32
  }
  func.func @transform_2(%arg0: i32) -> (i32, i32) {
    %c0_i32 = arith.constant 0 : i32
    %c0_i32_0 = arith.constant 0 : i32
    %c0_i32_1 = arith.constant 0 : i32
    return %c0_i32, %c0_i32_0 : i32, i32
  }
  func.func @transform_3(%arg0: i32) -> (i32, i32) {
    %c0_i32 = arith.constant 0 : i32
    %c0_i32_0 = arith.constant 0 : i32
    %c0_i32_1 = arith.constant 0 : i32
    return %c0_i32, %c0_i32_0 : i32, i32
  }
  func.func @transform_4(%arg0: i32) -> (i32, i32) {
    %c0_i32 = arith.constant 0 : i32
    %c0_i32_0 = arith.constant 0 : i32
    %c0_i32_1 = arith.constant 0 : i32
    return %c0_i32, %c0_i32_0 : i32, i32
  }
  func.func @transform_5(%arg0: i32) -> (i32, i32) {
    %c0_i32 = arith.constant 0 : i32
    %c0_i32_0 = arith.constant 0 : i32
    %c0_i32_1 = arith.constant 0 : i32
    return %c0_i32, %c0_i32_0 : i32, i32
  }
  func.func @transform_6(%arg0: i32) -> (i32, i32) {
    %c0_i32 = arith.constant 0 : i32
    %c0_i32_0 = arith.constant 0 : i32
    %c0_i32_1 = arith.constant 0 : i32
    return %c0_i32, %c0_i32_0 : i32, i32
  }
  func.func @transform_7(%arg0: i32) -> (i32, i32) {
    %c0_i32 = arith.constant 0 : i32
    %c0_i32_0 = arith.constant 0 : i32
    %c0_i32_1 = arith.constant 0 : i32
    return %c0_i32, %c0_i32_0 : i32, i32
  }
  func.func @transform_8(%arg0: i32) -> (i32, i32) {
    %c0_i32 = arith.constant 0 : i32
    %c0_i32_0 = arith.constant 0 : i32
    %c0_i32_1 = arith.constant 0 : i32
    return %c0_i32, %c0_i32_0 : i32, i32
  }
  func.func @transform_9(%arg0: i32) -> (i32, i32, i32) {
    %c0_i32 = arith.constant 0 : i32
    %c0_i32_0 = arith.constant 0 : i32
    %c0_i32_1 = arith.constant 0 : i32
    %c0_i32_2 = arith.constant 0 : i32
    return %c0_i32, %c0_i32_0, %c0_i32_1 : i32, i32, i32
  }
  func.func @transform_10(%arg0: i32) -> (i32, i32, i32) {
    %c0_i32 = arith.constant 0 : i32
    %c0_i32_0 = arith.constant 0 : i32
    %c0_i32_1 = arith.constant 0 : i32
    %c0_i32_2 = arith.constant 0 : i32
    return %c0_i32, %c0_i32_0, %c0_i32_1 : i32, i32, i32
  }
  func.func @transform_11(%arg0: i32) -> (i32, i32) {
    %c0_i32 = arith.constant 0 : i32
    %c0_i32_0 = arith.constant 0 : i32
    %c0_i32_1 = arith.constant 0 : i32
    return %c0_i32, %c0_i32_0 : i32, i32
  }
  func.func @transform_12(%arg0: i32) -> (i32, i32) {
    %c0_i32 = arith.constant 0 : i32
    %c0_i32_0 = arith.constant 0 : i32
    %c0_i32_1 = arith.constant 0 : i32
    return %c0_i32, %c0_i32_0 : i32, i32
  }
  func.func @transform_13(%arg0: i32) -> (i32, i32) {
    %c0_i32 = arith.constant 0 : i32
    %c0_i32_0 = arith.constant 0 : i32
    %c0_i32_1 = arith.constant 0 : i32
    return %c0_i32, %c0_i32_0 : i32, i32
  }
  func.func @transform_14(%arg0: i32) -> (i32, i32, i32) {
    %c0_i32 = arith.constant 0 : i32
    %c0_i32_0 = arith.constant 0 : i32
    %c0_i32_1 = arith.constant 0 : i32
    return %arg0, %c0_i32, %c0_i32_0 : i32, i32, i32
  }
}

module attributes {stable_mosaic.version = 11 : i64} {
  func.func @_fc_kernel(%arg0: i32, %arg1: memref<2x4128xf32, #tpu.memory_space<vmem>>, %arg2: memref<4128x256xbf16, #tpu.memory_space<vmem>>, %arg3: memref<1x256xf32, #tpu.memory_space<vmem>>, %arg4: memref<256x512xbf16, #tpu.memory_space<vmem>>, %arg5: memref<1x512xf32, #tpu.memory_space<vmem>>, %arg6: memref<2x512xf32, #tpu.memory_space<vmem>>) attributes {dimension_semantics = [#tpu.dimension_semantics<arbitrary>], iteration_bounds = array<i64: 4>, scalar_prefetch = 0 : i64, scratch_operands = 0 : i64, tpu.core_type = #tpu.core_type<tc>, window_params = [{pipeline_mode = #tpu.pipeline_mode<synchronous>, transform_indices = @transform_0, window_bounds = array<i64: 2, 4128>}, {transform_indices = @transform_1, window_bounds = array<i64: 4128, 256>}, {transform_indices = @transform_2, window_bounds = array<i64: 1, 256>}, {transform_indices = @transform_3, window_bounds = array<i64: 256, 512>}, {pipeline_mode = #tpu.pipeline_mode<synchronous>, transform_indices = @transform_4, window_bounds = array<i64: 1, 512>}, {pipeline_mode = #tpu.pipeline_mode<synchronous>, transform_indices = @transform_5, window_bounds = array<i64: 2, 512>}]} {
    %c0_i32 = arith.constant 0 : i32
    %0 = arith.cmpi eq, %arg0, %c0_i32 : i32
    %1 = arith.extui %0 : i1 to i32
    %c0_i32_0 = arith.constant 0 : i32
    %2 = arith.cmpi ne, %1, %c0_i32_0 : i32
    scf.if %2 {
      %c0_28 = arith.constant 0 : index
      %c0_29 = arith.constant 0 : index
      %56 = vector.load %arg5[%c0_28, %c0_29] : memref<1x512xf32, #tpu.memory_space<vmem>>, vector<1x512xf32>
      %57 = vector.shape_cast %56 : vector<1x512xf32> to vector<1x512xf32>
      %58 = vector.broadcast %57 : vector<1x512xf32> to vector<2x512xf32>
      %c0_30 = arith.constant 0 : index
      %c0_31 = arith.constant 0 : index
      %59 = vector.load %arg6[%c0_30, %c0_31] : memref<2x512xf32, #tpu.memory_space<vmem>>, vector<2x512xf32>
      tpu.vector_store %arg6[%c0_30, %c0_31], %58 {strides = array<i32>} : memref<2x512xf32, #tpu.memory_space<vmem>>, vector<2x512xf32>,
    } else {
    }
    %c0 = arith.constant 0 : index
    %c0_1 = arith.constant 0 : index
    %3 = vector.load %arg1[%c0, %c0_1] : memref<2x4128xf32, #tpu.memory_space<vmem>>, vector<2x4128xf32>
    %4 = arith.truncf %3 : vector<2x4128xf32> to vector<2x4128xbf16>
    %c0_2 = arith.constant 0 : index
    %c0_3 = arith.constant 0 : index
    %5 = vector.load %arg2[%c0_2, %c0_3] : memref<4128x256xbf16, #tpu.memory_space<vmem>>, vector<4128x256xbf16>
    %cst = arith.constant dense<0.000000e+00> : vector<2x256xf32>
    %6 = tpu.matmul %4, %5, %cst {dimension_numbers = #tpu.dot_dimension_numbers<[1], [0], [0], [1], [0, 0, 1, 1], [], []>} : vector<2x4128xbf16>, vector<4128x256xbf16>, vector<2x256xf32> -> vector<2x256xf32>
    %c0_4 = arith.constant 0 : index
    %c0_5 = arith.constant 0 : index
    %7 = vector.load %arg3[%c0_4, %c0_5] : memref<1x256xf32, #tpu.memory_space<vmem>>, vector<1x256xf32>
    %8 = vector.broadcast %7 : vector<1x256xf32> to vector<2x256xf32>
    %9 = arith.addf %6, %8 : vector<2x256xf32>
    %cst_6 = arith.constant 5.000000e-01 : f32
    %10 = vector.broadcast %cst_6 : f32 to vector<2x256xf32>
    %11 = arith.mulf %10, %9 : vector<2x256xf32>
    %cst_7 = arith.constant 0.707106769 : f32
    %12 = vector.broadcast %cst_7 : f32 to vector<2x256xf32>
    %13 = arith.mulf %9, %12 : vector<2x256xf32>
    %14 = math.absf %13 : vector<2x256xf32>
    %cst_8 = arith.constant 0.327591091 : f32
    %15 = vector.broadcast %cst_8 : f32 to vector<2x256xf32>
    %16 = arith.mulf %15, %14 : vector<2x256xf32>
    %cst_9 = arith.constant 1.000000e+00 : f32
    %17 = vector.broadcast %cst_9 : f32 to vector<2x256xf32>
    %18 = arith.addf %17, %16 : vector<2x256xf32>
    %cst_10 = arith.constant 1.000000e+00 : f32
    %19 = vector.broadcast %cst_10 : f32 to vector<2x256xf32>
    %20 = arith.divf %19, %18 : vector<2x256xf32>
    %cst_11 = arith.constant 1.06140542 : f32
    %21 = vector.broadcast %cst_11 : f32 to vector<2x256xf32>
    %22 = arith.mulf %21, %20 : vector<2x256xf32>
    %cst_12 = arith.constant -1.45315206 : f32
    %23 = vector.broadcast %cst_12 : f32 to vector<2x256xf32>
    %24 = arith.addf %22, %23 : vector<2x256xf32>
    %25 = arith.mulf %24, %20 : vector<2x256xf32>
    %cst_13 = arith.constant 1.42141378 : f32
    %26 = vector.broadcast %cst_13 : f32 to vector<2x256xf32>
    %27 = arith.addf %25, %26 : vector<2x256xf32>
    %28 = arith.mulf %27, %20 : vector<2x256xf32>
    %cst_14 = arith.constant -0.284496725 : f32
    %29 = vector.broadcast %cst_14 : f32 to vector<2x256xf32>
    %30 = arith.addf %28, %29 : vector<2x256xf32>
    %31 = arith.mulf %30, %20 : vector<2x256xf32>
    %cst_15 = arith.constant 0.254829586 : f32
    %32 = vector.broadcast %cst_15 : f32 to vector<2x256xf32>
    %33 = arith.addf %31, %32 : vector<2x256xf32>
    %34 = arith.mulf %33, %20 : vector<2x256xf32>
    %cst_16 = arith.constant 0.000000e+00 : f32
    %35 = vector.broadcast %cst_16 : f32 to vector<2x256xf32>
    %36 = arith.subf %35, %14 : vector<2x256xf32>
    %37 = arith.mulf %36, %14 : vector<2x256xf32>
    %38 = math.exp %37 : vector<2x256xf32>
    %39 = arith.mulf %34, %38 : vector<2x256xf32>
    %cst_17 = arith.constant 1.000000e+00 : f32
    %40 = vector.broadcast %cst_17 : f32 to vector<2x256xf32>
    %41 = arith.subf %40, %39 : vector<2x256xf32>
    %cst_18 = arith.constant 0.000000e+00 : f32
    %42 = vector.broadcast %cst_18 : f32 to vector<2x256xf32>
    %43 = arith.cmpf olt, %13, %42 : vector<2x256xf32>
    %cst_19 = arith.constant 0.000000e+00 : f32
    %44 = vector.broadcast %cst_19 : f32 to vector<2x256xf32>
    %45 = arith.subf %44, %41 : vector<2x256xf32>
    %46 = arith.select %43, %45, %41 : vector<2x256xi1>, vector<2x256xf32>
    %cst_20 = arith.constant 1.000000e+00 : f32
    %47 = vector.broadcast %cst_20 : f32 to vector<2x256xf32>
    %48 = arith.addf %47, %46 : vector<2x256xf32>
    %49 = arith.mulf %11, %48 : vector<2x256xf32>
    %c0_21 = arith.constant 0 : index
    %c0_22 = arith.constant 0 : index
    %50 = vector.load %arg6[%c0_21, %c0_22] : memref<2x512xf32, #tpu.memory_space<vmem>>, vector<2x512xf32>
    %51 = arith.truncf %49 : vector<2x256xf32> to vector<2x256xbf16>
    %c0_23 = arith.constant 0 : index
    %c0_24 = arith.constant 0 : index
    %52 = vector.load %arg4[%c0_23, %c0_24] : memref<256x512xbf16, #tpu.memory_space<vmem>>, vector<256x512xbf16>
    %cst_25 = arith.constant dense<0.000000e+00> : vector<2x512xf32>
    %53 = tpu.matmul %51, %52, %cst_25 {dimension_numbers = #tpu.dot_dimension_numbers<[1], [0], [0], [1], [0, 0, 1, 1], [], []>} : vector<2x256xbf16>, vector<256x512xbf16>, vector<2x512xf32> -> vector<2x512xf32>
    %54 = arith.addf %50, %53 : vector<2x512xf32>
    %c0_26 = arith.constant 0 : index
    %c0_27 = arith.constant 0 : index
    %55 = vector.load %arg6[%c0_26, %c0_27] : memref<2x512xf32, #tpu.memory_space<vmem>>, vector<2x512xf32>
    tpu.vector_store %arg6[%c0_26, %c0_27], %54 {strides = array<i32>} : memref<2x512xf32, #tpu.memory_space<vmem>>, vector<2x512xf32>,
    return
  }
  func.func @transform_0(%arg0: i32) -> (i32, i32) {
    %c0_i32 = arith.constant 0 : i32
    %c0_i32_0 = arith.constant 0 : i32
    %c0_i32_1 = arith.constant 0 : i32
    return %c0_i32, %c0_i32_0 : i32, i32
  }
  func.func @transform_1(%arg0: i32) -> (i32, i32) {
    %c0_i32 = arith.constant 0 : i32
    %c0_i32_0 = arith.constant 0 : i32
    return %c0_i32, %arg0 : i32, i32
  }
  func.func @transform_2(%arg0: i32) -> (i32, i32) {
    %c0_i32 = arith.constant 0 : i32
    %c0_i32_0 = arith.constant 0 : i32
    return %c0_i32, %arg0 : i32, i32
  }
  func.func @transform_3(%arg0: i32) -> (i32, i32) {
    %c0_i32 = arith.constant 0 : i32
    %c0_i32_0 = arith.constant 0 : i32
    return %arg0, %c0_i32 : i32, i32
  }
  func.func @transform_4(%arg0: i32) -> (i32, i32) {
    %c0_i32 = arith.constant 0 : i32
    %c0_i32_0 = arith.constant 0 : i32
    %c0_i32_1 = arith.constant 0 : i32
    return %c0_i32, %c0_i32_0 : i32, i32
  }
  func.func @transform_5(%arg0: i32) -> (i32, i32) {
    %c0_i32 = arith.constant 0 : i32
    %c0_i32_0 = arith.constant 0 : i32
    %c0_i32_1 = arith.constant 0 : i32
    return %c0_i32, %c0_i32_0 : i32, i32
  }
}

</mosaic_0001>

<bundles_post_ra>
// kernel: audio_backbone_forward.2
= control target key start
LH: loop header
LB: loop body
LE: loop exit
PB: predicated region body
PF: predicated region fallthrough
CT: control target
= control target key end

     0   :  { %19 = vsyncpa [#allocation3], 0  ;;  %s4046_s0 = inlined_call_operand.vmem [shape: f32[2,32,132], index: 0, kind: input, shape index: {}]   ;;  %s4047_s1 = inlined_call_operand.vmem [shape: f32[64,32], index: 1, kind: input, shape index: {}]   ;;  %s4048_s2 = inlined_call_operand.vmem [shape: f32[64,32], index: 2, kind: input, shape index: {}]   ;;  %s4049_s3 = inlined_call_operand.vmem [shape: f32[64,32], index: 3, kind: input, shape index: {}]   ;;  %s4050_s4 = inlined_call_operand.vmem [shape: f32[16,1], index: 4, kind: input, shape index: {}]   ;;  %s4051_s5 = inlined_call_operand.hbm [shape: f32[16,132], index: 5, kind: input, shape index: {}]   ;;  %s4052_s6 = inlined_call_operand.hbm [shape: f32[16,131], index: 6, kind: input, shape index: {}]   ;;  %s4053_s7 = inlined_call_operand.hbm [shape: f32[16,132], index: 7, kind: input, shape index: {}]   ;;  %s4054_s8 = inlined_call_operand.hbm [shape: f32[16,131], index: 8, kind: input, shape index: {}]   ;;  %s4055_s9 = inlined_call_operand.vmem [shape: f32[4,64,16], index: 9, kind: input, shape index: {}]   ;;  %s4056_s10 = inlined_call_operand.vmem [shape: f32[3,64,16], index: 10, kind: input, shape index: {}]   ;;  %s4057_s11 = inlined_call_operand.vmem [shape: f32[32,1], index: 11, kind: input, shape index: {}]   ;;  %s4058_s12 = inlined_call_operand.hbm [shape: f32[32,129], index: 12, kind: input, shape index: {}]   ;;  %s4059_s13 = inlined_call_operand.hbm [shape: f32[32,129], index: 13, kind: input, shape index: {}]   ;;  %s4060_s14 = inlined_call_operand.vmem [shape: f32[2,32,129], index: 14, kind: output, shape index: {}]  }
   0x1   :  { %20 = vsyncpa [#allocation5], 0 }
   0x2   :  { %21 = vsyncpa [#allocation8], 0 }
   0x3   :  { %22 = vsyncpa [#allocation11], 0  ;;  %s3157_s29 = smov 0  }
   0x4 LB: > { %s3163_s30 = sadd.s32 4294967295, %s3067_s29   ;;  %p2664_p0 = scmp.ge.s32.totalorder %s3067_s29, 1  ;;  %s3067_s29 = sphi %s3157_s29, %s28_s29  }
   0x5   : > { %p358_p1 = scmp.lt.s32.totalorder %s3067_s29, 3  ;;  %p2850_p2 = scmp.eq.s32.totalorder %s3163_s30, 0 }
   0x6   : > { %s3069_s16 = smov [#allocation4]   ;;  %s3070_s18 = smov [#allocation7]  }
   0x7   : > { %p3168_p3 = pnand %p2664_p0, %p358_p1  ;;  %s395_s17 = sshll.u32 %s3069_s16, 4  ;;  %s396_s17 = int_to_ptr.vmem [resolvable:$true] %s395_s17 }
   0x8   : > { %s421_s19 = sshll.u32 %s3070_s18, 4  ;;  %s3071_s21 = smov [#allocation2]   ;;  %s3174_s19 = int_to_ptr.vmem [resolvable:$true] %s421_s19 }
   0x9   : > { %p2831_p4 = pneg %p3168_p3  ;;  %s382_s22 = sshll.u32 %s3071_s21, 4  ;;  %s3182_s22 = int_to_ptr.vmem [resolvable:$true] %s382_s22 }
   0xa   : > { %s3072_s23 = smov [#allocation6]   ;;  %s2900_s26 = scalar_lea.vmem %s396_s17, 512 }
   0xb   : > { %p3178_p5 = pnand %p2850_p2, %p2831_p4  ;;  %s3184_s24 = sshll.u32 %s3072_s23, 4  ;;  %s409_s24 = int_to_ptr.vmem [resolvable:$true] %s3184_s24 }
   0xc   : > { %p2901_p7 = scmp.ne.s32.totalorder %s396_s17, %s2900_s26  ;;  %p2908_p10 = scmp.lt.s32.totalorder %s396_s17, %s396_s17 }
   0xd   : > { %p3188_p6 = pneg %p3178_p5  ;;  %p2909_p11 = scmp.lt.s32.totalorder %s2900_s26, %s2900_s26 }
   0xf   : > { %p2903_p8 = pnand %p2901_p7, %p3188_p6  ;;  %p2910_p12 = por %p2909_p11, %p2908_p10 }
  0x11   : > { %p2904_p9 = pneg %p2903_p8 }
  0x13   : > { %p2911_p13 = pnand %p2910_p12, %p2904_p9 }
  0x15   : > { %2914 = shalt.err (!%p2911_p13)
}
  0x16   : > { %s3073_s27 = smov 256   ;;  %s3074_s28 = smov 16  }
  0x17   : > { %2837 = dma.hbm_to_vmem [thread:$0]  (!%p3178_p5), %s4052_s6, 512, %s396_s17, [#allocation5], %s3073_s27, %s3073_s27, %s3074_s28  }
  0x18   : > { %s2926_s21 = scalar_lea.vmem %s3174_s19, 512  ;;  %p2934_p7 = scmp.lt.s32.totalorder %s3174_s19, %s3174_s19 }
  0x19   : > { %p2927_p0 = scmp.ne.s32.totalorder %s3174_s19, %s2926_s21  ;;  %p2935_p8 = scmp.lt.s32.totalorder %s2926_s21, %s2926_s21 }
  0x1b   : > { %p2929_p1 = pnand %p2927_p0, %p3188_p6  ;;  %p2936_p9 = por %p2935_p8, %p2934_p7 }
  0x1d   : > { %p2930_p4 = pneg %p2929_p1 }
  0x1f   : > { %p2937_p10 = pnand %p2936_p9, %p2930_p4 }
  0x21   : > { %2940 = shalt.err (!%p2937_p10)
}
  0x22   : > { %2843 = dma.hbm_to_vmem [thread:$0]  (!%p3178_p5), %s4054_s8, 512, %s3174_s19, [#allocation8], %s3073_s27, %s3073_s27, %s3074_s28  }
  0x23   : > { %s2952_s17 = scalar_lea.vmem %s3182_s22, 512  ;;  %p2960_p0 = scmp.lt.s32.totalorder %s3182_s22, %s3182_s22 }
  0x24   : > { %p2953_p11 = scmp.ne.s32.totalorder %s3182_s22, %s2952_s17  ;;  %p2961_p1 = scmp.lt.s32.totalorder %s2952_s17, %s2952_s17 }
  0x26   : > { %p2955_p12 = pnand %p2953_p11, %p3188_p6  ;;  %p2962_p4 = por %p2961_p1, %p2960_p0 }
  0x28   : > { %p2956_p13 = pneg %p2955_p12 }
  0x2a   : > { %p2963_p7 = pnand %p2962_p4, %p2956_p13 }
  0x2c   : > { %2966 = shalt.err (!%p2963_p7)
}
  0x2d   : > { %2834 = dma.hbm_to_vmem [thread:$0]  (!%p3178_p5), %s4051_s5, 512, %s3182_s22, [#allocation3], %s3073_s27, %s3073_s27, %s3074_s28  }
  0x2e   : > { %s2978_s19 = scalar_lea.vmem %s409_s24, 512  ;;  %p2986_p11 = scmp.lt.s32.totalorder %s409_s24, %s409_s24 }
  0x2f   : > { %p2979_p8 = scmp.ne.s32.totalorder %s409_s24, %s2978_s19  ;;  %p2987_p12 = scmp.lt.s32.totalorder %s2978_s19, %s2978_s19 }
  0x31   : > { %p2981_p9 = pnand %p2979_p8, %p3188_p6  ;;  %p2988_p13 = por %p2987_p12, %p2986_p11 }
  0x33   : > { %p2982_p10 = pneg %p2981_p9 }
  0x35   : > { %p2989_p0 = pnand %p2988_p13, %p2982_p10 }
  0x37   : > { %2992 = shalt.err (!%p2989_p0)
}
  0x38   : > { %2840 = dma.hbm_to_vmem [thread:$0]  (!%p3178_p5), %s4053_s7, 512, %s409_s24, [#allocation5], %s3073_s27, %s3073_s27, %s3074_s28  }
  0x39   : > { %s3075_s22 = smov [#allocation9]   ;;  %s3076_s17 = smov [#allocation10]  }
  0x3a   : > { %s443_s26 = sshll.u32 %s3075_s22, 4  ;;  %s456_s16 = sshll.u32 %s3076_s17, 4  ;;  %s444_s26 = int_to_ptr.vmem [resolvable:$true] %s443_s26  ;;  %s457_s16 = int_to_ptr.vmem [resolvable:$true] %s456_s16 }
  0x3b   : > { %s3004_s18 = scalar_lea.vmem %s444_s26, 1024  ;;  %p3012_p8 = scmp.lt.s32.totalorder %s444_s26, %s444_s26 }
  0x3c   : > { %p3005_p1 = scmp.ne.s32.totalorder %s444_s26, %s3004_s18  ;;  %p3013_p9 = scmp.lt.s32.totalorder %s3004_s18, %s3004_s18 }
  0x3e   : > { %p3007_p4 = pnand %p3005_p1, %p3188_p6  ;;  %p3014_p10 = por %p3013_p9, %p3012_p8 }
  0x40   : > { %p3008_p7 = pneg %p3007_p4 }
  0x42   : > { %p3015_p11 = pnand %p3014_p10, %p3008_p7 }
  0x44   : > { %3018 = shalt.err (!%p3015_p11)
}
  0x45   : > { %2846 = dma.hbm_to_vmem [thread:$0]  (!%p3178_p5), %s4058_s12, 1024, %s444_s26, [#allocation8], %s3073_s27, %s3073_s27, %s3074_s28  }
  0x46   : > { %s3030_s21 = scalar_lea.vmem %s457_s16, 1024  ;;  %p3038_p1 = scmp.lt.s32.totalorder %s457_s16, %s457_s16 }
  0x47   : > { %p3031_p12 = scmp.ne.s32.totalorder %s457_s16, %s3030_s21  ;;  %p3039_p4 = scmp.lt.s32.totalorder %s3030_s21, %s3030_s21 }
  0x49   : > { %p3033_p13 = pnand %p3031_p12, %p3188_p6  ;;  %p3040_p7 = por %p3039_p4, %p3038_p1 }
  0x4b   : > { %p3034_p0 = pneg %p3033_p13 }
  0x4d   : > { %p3041_p8 = pnand %p3040_p7, %p3034_p0 }
  0x4f   : > { %3044 = shalt.err (!%p3041_p8)
}
  0x50   : > { %2849 = dma.hbm_to_vmem [thread:$0]  (!%p3178_p5), %s4059_s13, 1024, %s457_s16, [#allocation11], %s3073_s27, %s3073_s27, %s3074_s28  }
  0x51   : > { %480 = sbr.rel (%p3168_p3) target bundleno = 1604 (0x644), region = 76 }
  0x56   : > { %3050 = dma.done.wait (%p2850_p2), [#allocation3], 512  }
  0x57   : > { %3052 = vsyncadd (%p2850_p2), [#allocation3], 4294966784 }
  0x58   : > { %3054 = dma.done.wait (%p2850_p2), [#allocation5], 1024  }
  0x59   : > { %3056 = vsyncadd (%p2850_p2), [#allocation5], 4294966272 }
  0x5a   : > { %3058 = dma.done.wait (%p2850_p2), [#allocation8], 1536  }
  0x5b   : > { %3060 = vsyncadd (%p2850_p2), [#allocation8], 4294965760 }
  0x5c   : > { %3062 = dma.done.wait (%p2850_p2), [#allocation11], 1024  }
  0x5d   : > { %3064 = vsyncadd (%p2850_p2), [#allocation11], 4294966272  ;;  %p546_p3 = scmp.lt.s32.totalorder %s3163_s30, 1  ;;  %v3077_v0 = vmov 0.0   ;;  %s3078_s28 = smov 127   ;;  %v564_v8 = vld [vmem:[%s4047_s1] sm:$0xff] }
  0x5e   : > { %661 = vmatprep.mubr.f32.mxu0 %v3077_v0  ;;  %879 = vmatprep.mubr.f32.mxu1 %v3077_v0  ;;  %vm572_vm0 = vcmask 261120   ;;  %v565_v10 = vld [vmem:[%s4047_s1 + $0x8] sm:$0xff]  ;;  %v566_v11 = vld [vmem:[%s4047_s1 + $0x10] sm:$0xff]  ;;  %v567_v12 = vld [vmem:[%s4047_s1 + $0x18] sm:$0xff]  ;;  %v3079_v17 = vmov 0   ;;  %vm778_vm1 = vcmask 1039360  }
  0x5f   : > { %s4109_s30 = smov (!%p546_p3, %s3163_s30), 1  ;;  %v568_v13 = vld [vmem:[%s4047_s1 + $0x20] sm:$0xff]  ;;  %v569_v14 = vld [vmem:[%s4047_s1 + $0x28] sm:$0xff]  ;;  %2884 = vset.pattern.permute.xlu1 %v3079_v17  ;;  %2883 = vset.pattern.permute.xlu0 %v3079_v17  ;;  %v570_v18 = vld [vmem:[%s4047_s1 + $0x30] sm:$0xff]  ;;  %vm1081_vm2 = vcmask 31744   ;;  %vm1097_vm3 = vcmask 23552  }
  0x60   : > { %s2805_s15 = sshll.u32 %s4109_s30, 6  ;;  %v723_v15 = vld [vmem:[%s4050_s4 + $0x8] sm:$0xff]  ;;  %v722_v16 = vld [vmem:[%s4050_s4] sm:$0xff]  ;;  %v571_v19 = vld [vmem:[%s4047_s1 + $0x38] sm:$0xff]  ;;  %vm1241_vm4 = vcmask 130048   ;;  %s3080_s22 = smov 126  }
  0x61   : > { %s550_s27 = scalar_lea.vmem %s4046_s0, %s2805_s15  ;;  %v738_v20 = vld [vmem:[%s4048_s2] sm:$0xff]  ;;  %v739_v21 = vld [vmem:[%s4048_s2 + $0x8] sm:$0xff]  ;;  %v740_v22 = vld [vmem:[%s4048_s2 + $0x10] sm:$0xff]  ;;  %s3081_s17 = smov 125   ;;  %vm1533_vm5 = vcmask 1031168   ;;  %vm1710_vm6 = vcmask 1022976  }
  0x62   : > { %v562_v1 = vld [vmem:[%s550_s27 + $0x30] sm:$0xff]  ;;  %v560_v2 = vld [vmem:[%s550_s27 + $0x20] sm:$0xff]  ;;  %v563_v3 = vld [vmem:[%s550_s27 + $0x38] sm:$0xff]  ;;  %vm2427_vm7 = vcmask 7168   ;;  %s555_s26 = scalar_lea.vmem %s4060_s14, %s2805_s15 }
  0x63   : > { %774 = vrot.lane.b32.xlu0 %v562_v1, %s3078_s28  ;;  %770 = vrot.lane.b32.xlu1 %v560_v2, %s3078_s28  ;;  %v561_v4 = vld [vmem:[%s550_s27 + $0x28] sm:$0xff]  ;;  %v559_v5 = vld [vmem:[%s550_s27 + $0x18] sm:$0xff] }
  0x64   : > { %621 = vmatprep.subr.mxu0 %v563_v3  ;;  %v558_v6 = vld [vmem:[%s550_s27 + $0x10] sm:$0xff]  ;;  %v557_v7 = vld [vmem:[%s550_s27 + $0x8] sm:$0xff]  ;;  %v556_v9 = vld [vmem:[%s550_s27] sm:$0xff] }
  0x65   : > { %622 = vmatpush1.msra.mxu0 %v562_v1  ;;  %v741_v23 = vld [vmem:[%s4048_s2 + $0x18] sm:$0xff]  ;;  %v742_v24 = vld [vmem:[%s4048_s2 + $0x20] sm:$0xff]  ;;  %v743_v25 = vld [vmem:[%s4048_s2 + $0x28] sm:$0xff] }
  0x66   : > { %623 = vmatprep.subr.mxu0 %v561_v4  ;;  %v744_v26 = vld [vmem:[%s4048_s2 + $0x30] sm:$0xff]  ;;  %v745_v27 = vld [vmem:[%s4048_s2 + $0x38] sm:$0xff]  ;;  %v746_v39 = vld [vmem:[%s4049_s3] sm:$0xff] }
  0x67   : > { %776 = vrot.lane.b32.xlu0 %v563_v3, %s3078_s28  ;;  %772 = vrot.lane.b32.xlu1 %v561_v4, %s3078_s28  ;;  %v747_v41 = vld [vmem:[%s4049_s3 + $0x8] sm:$0xff]  ;;  %v748_v42 = vld [vmem:[%s4049_s3 + $0x10] sm:$0xff] }
  0x68   : > { %624 = vmatpush1.msra.mxu0 %v560_v2  ;;  %v749_v43 = vld [vmem:[%s4049_s3 + $0x18] sm:$0xff]  ;;  %v750_v44 = vld [vmem:[%s4049_s3 + $0x20] sm:$0xff]  ;;  %v751_v45 = vld [vmem:[%s4049_s3 + $0x28] sm:$0xff] }
  0x69   : > { %625 = vmatprep.subr.mxu0 %v559_v5  ;;  %v752_v46 = vld [vmem:[%s4049_s3 + $0x30] sm:$0xff]  ;;  %v753_v47 = vld [vmem:[%s4049_s3 + $0x38] sm:$0xff] }
  0x6a   : > { %626 = vmatpush1.msra.mxu0 %v558_v6 }
  0x6b   : > { %768 = vrot.lane.b32.xlu1 %v559_v5, %s3078_s28  ;;  %766 = vrot.lane.b32.xlu0 %v558_v6, %s3078_s28 }
  0x6c   : > { %627 = vmatprep.subr.mxu0 %v557_v7 }
  0x6d   : > { %628 = vmatpush1.msra.mxu0 %v556_v9 }
  0x6e   : > { %2683 = vmatmul.mubr.msk.f32.vlgmr.msra.gmra.mxu0 %vm572_vm0, %v564_v8  ;;  %976 = vmatprep.subr.mxu0 %v563_v3 }
  0x6f   : > { %764 = vrot.lane.b32.xlu1 %v557_v7, %s3078_s28  ;;  %762 = vrot.lane.b32.xlu0 %v556_v9, %s3078_s28 }
  0x70   : > { %667 = vmatprep.mubr.f32.mxu0 %v3077_v0  ;;  %977 = vmatpush1.msra.mxu0 %v562_v1 }
  0x71   : > { %978 = vmatprep.subr.mxu0 %v561_v4 }
  0x72   : > { %2684 = vmatmul.mubr.msk.f32.gmra.mxu0 %vm572_vm0, %v565_v10 }
  0x73   : > { %673 = vmatprep.mubr.f32.mxu0 %v3077_v0  ;;  %979 = vmatpush1.msra.mxu0 %v560_v2 }
  0x74   : > { %980 = vmatprep.subr.mxu0 %v559_v5  ;;  %731 = vperm.xlu1 %2884, %v723_v15  }
  0x75   : > { %981 = vmatpush1.msra.mxu0 %v558_v6  ;;  %726 = vperm.xlu0 %2883, %v722_v16  }
  0x76   : > { %2685 = vmatmul.mubr.msk.f32.gmra.mxu0 %vm572_vm0, %v566_v11  ;;  %982 = vmatprep.subr.mxu0 %v557_v7 }
  0x77   : > { %679 = vmatprep.mubr.f32.mxu0 %v3077_v0  ;;  %983 = vmatpush1.msra.mxu0 %v556_v9 }
  0x7a   : > { %2686 = vmatmul.mubr.msk.f32.gmra.mxu0 %vm572_vm0, %v567_v12 }
  0x7b   : > { %685 = vmatprep.mubr.f32.mxu0 %v3077_v0 }
  0x7e   : > { %2687 = vmatmul.mubr.msk.f32.gmra.mxu0 %vm572_vm0, %v568_v13 }
  0x7f   : > { %691 = vmatprep.mubr.f32.mxu0 %v3077_v0 }
  0x82   : > { %2688 = vmatmul.mubr.msk.f32.gmra.mxu0 %vm572_vm0, %v569_v14 }
  0x83   : > { %697 = vmatprep.mubr.f32.mxu0 %v3077_v0 }
  0x86   : > { %2689 = vmatmul.mubr.msk.f32.gmra.mxu0 %vm572_vm0, %v570_v18 }
  0x87   : > { %703 = vmatprep.mubr.f32.mxu0 %v3077_v0 }
  0x8a   : > { %2690 = vmatmul.mubr.msk.f32.gmra.mxu0 %vm572_vm0, %v571_v19 }
  0x8b   : > { %1016 = vmatprep.mubr.f32.mxu0 %v3077_v0 }
  0x8e   : > { %2699 = vmatmul.mubr.msk.f32.vlgmr.msra.gmra.mxu0 %vm572_vm0, %v738_v20 }
  0x8f   : > { %1022 = vmatprep.mubr.f32.mxu0 %v3077_v0 }
  0x92   : > { %2700 = vmatmul.mubr.msk.f32.gmra.mxu0 %vm572_vm0, %v739_v21 }
  0x93   : > { %1028 = vmatprep.mubr.f32.mxu0 %v3077_v0 }
  0x96   : > { %2701 = vmatmul.mubr.msk.f32.gmra.mxu0 %vm572_vm0, %v740_v22 }
  0x97   : > { %1034 = vmatprep.mubr.f32.mxu0 %v3077_v0 }
  0x9a   : > { %2702 = vmatmul.mubr.msk.f32.gmra.mxu0 %vm572_vm0, %v741_v23 }
  0x9b   : > { %1040 = vmatprep.mubr.f32.mxu0 %v3077_v0 }
  0x9e   : > { %2703 = vmatmul.mubr.msk.f32.gmra.mxu0 %vm572_vm0, %v742_v24 }
  0x9f   : > { %1046 = vmatprep.mubr.f32.mxu0 %v3077_v0 }
  0xa2   : > { %2704 = vmatmul.mubr.msk.f32.gmra.mxu0 %vm572_vm0, %v743_v25 }
  0xa3   : > { %1052 = vmatprep.mubr.f32.mxu0 %v3077_v0 }
  0xa6   : > { %2705 = vmatmul.mubr.msk.f32.gmra.mxu0 %vm572_vm0, %v744_v26 }
  0xa7   : > { %1058 = vmatprep.mubr.f32.mxu0 %v3077_v0 }
  0xaa   : > { %2706 = vmatmul.mubr.msk.f32.gmra.mxu0 %vm572_vm0, %v745_v27 }
  0xab   : > { %1467 = vmatprep.mubr.f32.mxu0 %v3077_v0 }
  0xd5   : > { %v775_v28 = vpop.permute.xlu0 %774  ;;  %v771_v29 = vpop.permute.xlu1 %770 }
  0xd9   : > { %v777_v30 = vpop.permute.xlu0 %776  ;;  %v773_v31 = vpop.permute.xlu1 %772 }
  0xda   : > { %839 = vmatprep.subr.mxu1 %v777_v30  ;;  %v782_v32 = vsel %vm778_vm1, %v775_v28, %v777_v30  ;;  %v781_v33 = vsel %vm778_vm1, %v771_v29, %v773_v31 }
  0xdb   : > { %840 = vmatpush1.msra.mxu1 %v782_v32 }
  0xdc   : > { %841 = vmatprep.subr.mxu1 %v773_v31 }
  0xdd   : > { %842 = vmatpush1.msra.mxu1 %v781_v33  ;;  %v769_v34 = vpop.permute.xlu1 %768  ;;  %v767_v35 = vpop.permute.xlu0 %766 }
  0xde   : > { %843 = vmatprep.subr.mxu1 %v769_v34  ;;  %v780_v36 = vsel %vm778_vm1, %v767_v35, %v769_v34 }
  0xdf   : > { %844 = vmatpush1.msra.mxu1 %v780_v36 }
  0xe1   : > { %v765_v37 = vpop.permute.xlu1 %764  ;;  %v763_v38 = vpop.permute.xlu0 %762 }
  0xe2   : > { %845 = vmatprep.subr.mxu1 %v765_v37  ;;  %v779_v40 = vsel %vm778_vm1, %v763_v38, %v765_v37 }
  0xe3   : > { %846 = vmatpush1.msra.mxu1 %v779_v40 }
  0xe4   : > { %2691 = vmatmul.mubr.msk.f32.vlgmr.msra.gmra.mxu1 %vm572_vm0, %v746_v39 }
  0xe5   : > { %885 = vmatprep.mubr.f32.mxu1 %v3077_v0 }
  0xe8   : > { %2692 = vmatmul.mubr.msk.f32.gmra.mxu1 %vm572_vm0, %v747_v41 }
  0xe9   : > { %891 = vmatprep.mubr.f32.mxu1 %v3077_v0 }
  0xec   : > { %2693 = vmatmul.mubr.msk.f32.gmra.mxu1 %vm572_vm0, %v748_v42 }
  0xed   : > { %897 = vmatprep.mubr.f32.mxu1 %v3077_v0 }
  0xef   : > { %v3436_v14 = vpop.permute.xlu1 %731 }
  0xf0   : > { %2694 = vmatmul.mubr.msk.f32.gmra.mxu1 %vm572_vm0, %v749_v43  ;;  %v3431_v5 = vpop.permute.xlu0 %726 }
  0xf1   : > { %903 = vmatprep.mubr.f32.mxu1 %v3077_v0 }
  0xf4   : > { %2695 = vmatmul.mubr.msk.f32.gmra.mxu1 %vm572_vm0, %v750_v44 }
  0xf5   : > { %909 = vmatprep.mubr.f32.mxu1 %v3077_v0 }
  0xf8   : > { %2696 = vmatmul.mubr.msk.f32.gmra.mxu1 %vm572_vm0, %v751_v45 }
  0xf9   : > { %915 = vmatprep.mubr.f32.mxu1 %v3077_v0 }
  0xfc   : > { %2697 = vmatmul.mubr.msk.f32.gmra.mxu1 %vm572_vm0, %v752_v46 }
  0xfd   : > { %921 = vmatprep.mubr.f32.mxu1 %v3077_v0 }
 0x100   : > { %2698 = vmatmul.mubr.msk.f32.gmra.mxu1 %vm572_vm0, %v753_v47 }
 0x101   : > { %1330 = vmatprep.mubr.f32.mxu1 %v3077_v0 }
 0x12e   : > { %v663_v48 = vpop.f32.mrf.mxu0 }
 0x130   : > { %v665_v49 = vpop.f32.mrf.mxu0 }
 0x132   : > { %v669_v50 = vpop.f32.mrf.mxu0 }
 0x134   : > { %v671_v51 = vpop.f32.mrf.mxu0 }
 0x136   : > { %v675_v52 = vpop.f32.mrf.mxu0 }
 0x137   : > { %v710_v60 = vmax.f32 %v663_v48, %v675_v52 }
 0x138   : > { %v677_v53 = vpop.f32.mrf.mxu0 }
 0x139   : > { %v711_v62 = vmax.f32 %v665_v49, %v677_v53 }
 0x13a   : > { %v681_v54 = vpop.f32.mrf.mxu0 }
 0x13b   : > { %v712_v2 = vmax.f32 %v669_v50, %v681_v54 }
 0x13c   : > { %v683_v55 = vpop.f32.mrf.mxu0 }
 0x13d   : > { %v713_v7 = vmax.f32 %v671_v51, %v683_v55 }
 0x13e   : > { %v687_v56 = vpop.f32.mrf.mxu0 }
 0x140   : > { %v689_v57 = vpop.f32.mrf.mxu0 }
 0x142   : > { %v693_v58 = vpop.f32.mrf.mxu0 }
 0x144   : > { %v695_v59 = vpop.f32.mrf.mxu0 }
 0x146   : > { %v699_v61 = vpop.f32.mrf.mxu0 }
 0x147   : > { %v714_v63 = vmax.f32 %v687_v56, %v699_v61 }
 0x148   : > { %v701_v1 = vpop.f32.mrf.mxu0 }
 0x149   : > { %v718_v3 = vmax.f32 %v710_v60, %v714_v63  ;;  %v715_v4 = vmax.f32 %v689_v57, %v701_v1 }
 0x14a   : > { %v705_v6 = vpop.f32.mrf.mxu0 }
 0x14b   : > { %v719_v8 = vmax.f32 %v711_v62, %v715_v4  ;;  %v716_v9 = vmax.f32 %v693_v58, %v705_v6  ;;  %v3434_v11 = vadd.f32 %v3431_v5, %v718_v3 }
 0x14c   : > { %v707_v10 = vpop.f32.mrf.mxu0 }
 0x14d   : > { %v720_v12 = vmax.f32 %v712_v2, %v716_v9  ;;  %v717_v13 = vmax.f32 %v695_v59, %v707_v10  ;;  %v3439_v15 = vadd.f32 %v3431_v5, %v719_v8 }
 0x14e   : > { %v1018_v23 = vpop.f32.mrf.mxu0 }
 0x14f   : > { %v721_v16 = vmax.f32 %v713_v7, %v717_v13  ;;  %v1082_v17 = vsel %vm1081_vm2, %v3439_v15, 0.0  ;;  %v3445_v19 = vadd.f32 %v3436_v14, %v720_v12 }
 0x150   : > { %v1083_v18 = vadd.f32 %v1082_v17, %v3434_v11  ;;  %v1020_v24 = vpop.f32.mrf.mxu0 }
 0x151   : > { %v3448_v20 = vadd.f32 %v3436_v14, %v721_v16 }
 0x152   : > { %1084 = vadd.xlane.f32.xlu1 %v1083_v18  ;;  %v1024_v25 = vpop.f32.mrf.mxu0 }
 0x153   : > { %v1086_v21 = vsel %vm1081_vm2, %v3448_v20, 0.0 }
 0x154   : > { %v1087_v22 = vadd.f32 %v1086_v21, %v3445_v19  ;;  %v1026_v26 = vpop.f32.mrf.mxu0 }
 0x156   : > { %1088 = vadd.xlane.f32.xlu0 %v1087_v22  ;;  %v1030_v27 = vpop.f32.mrf.mxu0 }
 0x158   : > { %v1032_v28 = vpop.f32.mrf.mxu0 }
 0x15a   : > { %v1036_v29 = vpop.f32.mrf.mxu0 }
 0x15c   : > { %v1038_v30 = vpop.f32.mrf.mxu0 }
 0x15e   : > { %v1042_v33 = vpop.f32.mrf.mxu0 }
 0x160   : > { %v1044_v36 = vpop.f32.mrf.mxu0 }
 0x162   : > { %v1048_v39 = vpop.f32.mrf.mxu0 }
 0x164   : > { %v1050_v42 = vpop.f32.mrf.mxu0 }
 0x166   : > { %v1054_v45 = vpop.f32.mrf.mxu0 }
 0x168   : > { %v1056_v48 = vpop.f32.mrf.mxu0 }
 0x16a   : > { %v1060_v57 = vpop.f32.mrf.mxu0 }
 0x16c   : > { %v1062_v10 = vpop.f32.mrf.mxu0 }
 0x1a4   : > { %v881_v31 = vpop.f32.mrf.mxu1 }
 0x1a5   : > { %v1019_v54 = vadd.f32 %v1018_v23, %v881_v31 }
 0x1a6   : > { %v883_v32 = vpop.f32.mrf.mxu1 }
 0x1a7   : > { %v1021_v55 = vadd.f32 %v1020_v24, %v883_v32 }
 0x1a8   : > { %v887_v34 = vpop.f32.mrf.mxu1 }
 0x1a9   : > { %v1025_v7 = vadd.f32 %v1024_v25, %v887_v34 }
 0x1aa   : > { %v889_v35 = vpop.f32.mrf.mxu1 }
 0x1ab   : > { %v1027_v8 = vadd.f32 %v1026_v26, %v889_v35 }
 0x1ac   : > { %v893_v37 = vpop.f32.mrf.mxu1 }
 0x1ad   : > { %v1031_v49 = vadd.f32 %v1030_v27, %v893_v37 }
 0x1ae   : > { %v895_v38 = vpop.f32.mrf.mxu1 }
 0x1af   : > { %v1033_v50 = vadd.f32 %v1032_v28, %v895_v38  ;;  %v1065_v61 = vmax.f32 %v1019_v54, %v1031_v49 }
 0x1b0   : > { %v899_v40 = vpop.f32.mrf.mxu1 }
 0x1b1   : > { %v1066_v62 = vmax.f32 %v1021_v55, %v1033_v50  ;;  %v1037_v63 = vadd.f32 %v1036_v29, %v899_v40 }
 0x1b2   : > { %v901_v41 = vpop.f32.mrf.mxu1 }
 0x1b3   : > { %v1039_v2 = vadd.f32 %v1038_v30, %v901_v41  ;;  %v1067_v21 = vmax.f32 %v1025_v7, %v1037_v63 }
 0x1b4   : > { %v905_v43 = vpop.f32.mrf.mxu1 }
 0x1b5   : > { %v1043_v52 = vadd.f32 %v1042_v33, %v905_v43  ;;  %v1068_v22 = vmax.f32 %v1027_v8, %v1039_v2 }
 0x1b6   : > { %v907_v44 = vpop.f32.mrf.mxu1 }
 0x1b7   : > { %v1045_v58 = vadd.f32 %v1044_v36, %v907_v44 }
 0x1b8   : > { %v911_v46 = vpop.f32.mrf.mxu1 }
 0x1b9   : > { %v1049_v3 = vadd.f32 %v1048_v39, %v911_v46 }
 0x1ba   : > { %v913_v47 = vpop.f32.mrf.mxu1 }
 0x1bb   : > { %v1051_v13 = vadd.f32 %v1050_v42, %v913_v47 }
 0x1bc   : > { %v917_v51 = vpop.f32.mrf.mxu1 }
 0x1bd   : > { %v1055_v53 = vadd.f32 %v1054_v45, %v917_v51 }
 0x1be   : > { %v919_v56 = vpop.f32.mrf.mxu1 }
 0x1bf   : > { %v1069_v59 = vmax.f32 %v1043_v52, %v1055_v53  ;;  %v1057_v60 = vadd.f32 %v1056_v48, %v919_v56 }
 0x1c0   : > { %v923_v1 = vpop.f32.mrf.mxu1 }
 0x1c1   : > { %v1070_v4 = vmax.f32 %v1045_v58, %v1057_v60  ;;  %v1061_v6 = vadd.f32 %v1060_v57, %v923_v1  ;;  %v1073_v9 = vmax.f32 %v1065_v61, %v1069_v59 }
 0x1c2   : > { %v925_v12 = vpop.f32.mrf.mxu1 }
 0x1c3   : > { %v1074_v16 = vmax.f32 %v1066_v62, %v1070_v4  ;;  %v1071_v17 = vmax.f32 %v1049_v3, %v1061_v6  ;;  %v1063_v18 = vadd.f32 %v1062_v10, %v925_v12  ;;  %v1077_v28 = vadd.f32 %v1073_v9, %v3431_v5 }
 0x1c5   : > { %v1072_v23 = vmax.f32 %v1051_v13, %v1063_v18  ;;  %v1078_v24 = vadd.f32 %v1074_v16, %v3431_v5  ;;  %v1075_v27 = vmax.f32 %v1067_v21, %v1071_v17 }
 0x1c7   : > { %v1076_v29 = vmax.f32 %v1068_v22, %v1072_v23  ;;  %v1098_v25 = vsel %vm1097_vm3, %v1078_v24, 0.0  ;;  %v1079_v31 = vadd.f32 %v1075_v27, %v3436_v14 }
 0x1c8   : > { %v1099_v26 = vadd.f32 %v1098_v25, %v1077_v28 }
 0x1c9   : > { %v1080_v30 = vadd.f32 %v1076_v29, %v3436_v14 }
 0x1ca   : > { %1100 = vadd.xlane.f32.xlu0 %v1099_v26 }
 0x1cb   : > { %v1102_v32 = vsel %vm1097_vm3, %v1080_v30, 0.0 }
 0x1cc   : > { %v1103_v33 = vadd.f32 %v1102_v32, %v1079_v31 }
 0x1ce   : > { %1104 = vadd.xlane.f32.xlu1 %v1103_v33 }
 0x1db   : > { %v1085_v34 = vpop.xlane.xlu1 %1084 }
 0x1df   : > { %v1089_v35 = vpop.xlane.xlu0 %1088 }
 0x1e0   : > { %v1090_v36 = vadd.f32 %v1089_v35, %v1085_v34 }
 0x1e2   : > { %v1091_v37 = vrot.slane %v1090_v36, 4 }
 0x1e4   : > { %v1092_v38 = vadd.f32 %v1091_v37, %v1090_v36  ;;  %v1173_v37 = vld [vmem:[#allocation2 + $0x18] sm:$0xff] }
 0x1e6   : > { %v1093_v40 = vrot.slane %v1092_v38, 2 }
 0x1e8   : > { %v1094_v43 = vadd.f32 %v1093_v40, %v1092_v38  ;;  %v1172_v38 = vld [vmem:[#allocation2 + $0x10] sm:$0xff] }
 0x1ea   : > { %v1095_v46 = vrot.slane %v1094_v43, 1 }
 0x1ec   : > { %v1096_v48 = vadd.f32 %v1095_v46, %v1094_v43  ;;  %v1170_v43 = vld [vmem:[#allocation2] sm:$0xff] }
 0x253   : > { %v1101_v39 = vpop.xlane.xlu0 %1100 }
 0x257   : > { %v1105_v5 = vpop.xlane.xlu1 %1104 }
 0x258   : > { %v1106_v41 = vadd.f32 %v1105_v5, %v1101_v39  ;;  %v1171_v39 = vld [vmem:[#allocation2 + $0x8] sm:$0xff] }
 0x25a   : > { %v1107_v42 = vrot.slane %v1106_v41, 4 }
 0x25c   : > { %v1108_v44 = vadd.f32 %v1107_v42, %v1106_v41 }
 0x25e   : > { %v1109_v45 = vrot.slane %v1108_v44, 2 }
 0x260   : > { %v1110_v47 = vadd.f32 %v1109_v45, %v1108_v44  ;;  %v1181_v44 = vld [vmem:[#allocation6 + $0x18] sm:$0xff]  ;;  %v1180_v45 = vld [vmem:[#allocation6 + $0x10] sm:$0xff] }
 0x262   : > { %v1111_v14 = vrot.slane %v1110_v47, 1 }
 0x264   : > { %v1112_v49 = vadd.f32 %v1111_v14, %v1110_v47 }
 0x266   : > { %v1113_v50 = vadd.f32 %v1112_v49, %v1096_v48  ;;  %v1179_v48 = vld [vmem:[#allocation6 + $0x8] sm:$0xff] }
 0x268   : > { %v1115_v51 = vmul.f32 0.00023764258, %v1113_v50 }
 0x26a   : > { %v1118_v52 = vsub.f32 %v3445_v19, %v1115_v51  ;;  %v1119_v53 = vsub.f32 %v3448_v20, %v1115_v51  ;;  %v1116_v54 = vsub.f32 %v3434_v11, %v1115_v51  ;;  %v1117_v55 = vsub.f32 %v3439_v15, %v1115_v51 }
 0x26b   : > { %v3463_v56 = vsub.f32 %v1079_v31, %v1115_v51  ;;  %v3465_v57 = vsub.f32 %v1080_v30, %v1115_v51  ;;  %v3467_v58 = vsub.f32 %v1077_v28, %v1115_v51  ;;  %v3469_v59 = vsub.f32 %v1078_v24, %v1115_v51 }
 0x26c   : > { %v1126_v60 = vmul.f32 %v1118_v52, %v1118_v52  ;;  %v1127_v61 = vmul.f32 %v1119_v53, %v1119_v53  ;;  %v1124_v62 = vmul.f32 %v1116_v54, %v1116_v54  ;;  %v1125_v63 = vmul.f32 %v1117_v55, %v1117_v55 }
 0x26d   : > { %v1146_v19 = vmul.f32 %v3465_v57, %v3465_v57  ;;  %v1144_v11 = vmul.f32 %v3469_v59, %v3469_v59  ;;  %v1145_v3 = vmul.f32 %v3463_v56, %v3463_v56  ;;  %v1143_v4 = vmul.f32 %v3467_v58, %v3467_v58 }
 0x26e   : > { %v1132_v15 = vsel %vm1081_vm2, %v1127_v61, 0.0  ;;  %v1128_v20 = vsel %vm1081_vm2, %v1125_v63, 0.0 }
 0x26f   : > { %v1133_v1 = vadd.f32 %v1132_v15, %v1126_v60  ;;  %v1129_v2 = vadd.f32 %v1128_v20, %v1124_v62  ;;  %v1151_v6 = vsel %vm1097_vm3, %v1146_v19, 0.0  ;;  %v1147_v7 = vsel %vm1097_vm3, %v1144_v11, 0.0  ;;  %v1178_v60 = vld [vmem:[#allocation6] sm:$0xff]  ;;  %v1209_v62 = vld [vmem:[%s4055_s9 + $0x18] sm:$0xff]  ;;  %v1192_v11 = vld [vmem:[#allocation4 + $0x10] sm:$0xff] }
 0x270   : > { %v1152_v8 = vadd.f32 %v1151_v6, %v1145_v3  ;;  %v1148_v9 = vadd.f32 %v1147_v7, %v1143_v4  ;;  %v1193_v15 = vld [vmem:[#allocation4 + $0x18] sm:$0xff]  ;;  %v1210_v20 = vld [vmem:[%s4055_s9 + $0x20] sm:$0xff]  ;;  %v1191_v7 = vld [vmem:[#allocation4 + $0x8] sm:$0xff] }
 0x271   : > { %1134 = vadd.xlane.f32.xlu1 %v1133_v1  ;;  %1130 = vadd.xlane.f32.xlu0 %v1129_v2  ;;  %v1190_v4 = vld [vmem:[#allocation4] sm:$0xff]  ;;  %v1201_v6 = vld [vmem:[#allocation7 + $0x18] sm:$0xff] }
 0x275   : > { %1153 = vadd.xlane.f32.xlu1 %v1152_v8  ;;  %1149 = vadd.xlane.f32.xlu0 %v1148_v9  ;;  %v1211_v8 = vld [vmem:[%s4055_s9 + $0x28] sm:$0xff] }
 0x2fa   : > { %v1135_v10 = vpop.xlane.xlu1 %1134  ;;  %v1131_v12 = vpop.xlane.xlu0 %1130 }
 0x2fb   : > { %v1136_v13 = vadd.f32 %v1135_v10, %v1131_v12 }
 0x2fd   : > { %v1137_v16 = vrot.slane %v1136_v13, 4 }
 0x2fe   : > { %v1154_v17 = vpop.xlane.xlu1 %1153  ;;  %v1150_v18 = vpop.xlane.xlu0 %1149 }
 0x2ff   : > { %v1138_v21 = vadd.f32 %v1137_v16, %v1136_v13  ;;  %v1155_v22 = vadd.f32 %v1154_v17, %v1150_v18  ;;  %v1198_v13 = vld [vmem:[#allocation7] sm:$0xff]  ;;  %v1212_v16 = vld [vmem:[%s4055_s9 + $0x30] sm:$0xff] }
 0x301   : > { %v1139_v23 = vrot.slane %v1138_v21, 2  ;;  %v1156_v24 = vrot.slane %v1155_v22, 4 }
 0x303   : > { %v1140_v27 = vadd.f32 %v1139_v23, %v1138_v21  ;;  %v1157_v28 = vadd.f32 %v1156_v24, %v1155_v22  ;;  %v1213_v21 = vld [vmem:[%s4055_s9 + $0x38] sm:$0xff]  ;;  %v2395_v22 = vld [vmem:[%s4057_s11] sm:$0xff]  ;;  %v2396_v23 = vld [vmem:[%s4057_s11 + $0x8] sm:$0xff] }
 0x304   : > { %v2397_v24 = vld [vmem:[%s4057_s11 + $0x10] sm:$0xff] }
 0x305   : > { %v1158_v29 = vrot.slane %v1157_v28, 2  ;;  %v1141_v25 = vrot.slane %v1140_v27, 1 }
 0x307   : > { %v1159_v26 = vadd.f32 %v1158_v29, %v1157_v28  ;;  %v1142_v31 = vadd.f32 %v1141_v25, %v1140_v27  ;;  %v2398_v27 = vld [vmem:[%s4057_s11 + $0x18] sm:$0xff] }
 0x309   : > { %v1160_v30 = vrot.slane %v1159_v26, 1 }
 0x30b   : > { %v1161_v32 = vadd.f32 %v1160_v30, %v1159_v26 }
 0x30d   : > { %v1162_v33 = vadd.f32 %v1161_v32, %v1142_v31  ;;  %v2707_v31 = vld [vmem:[%s4055_s9 + $0x40] sm:$0xff] }
 0x30f   : > { %v1163_v34 = vmul.f32 0.00023764258, %v1162_v33 }
 0x311   : > { %v1164_v35 = vadd.f32 1e-05, %v1163_v34 }
 0x313   : > { %2885 = vrsqrt.f32 %v1164_v35  ;;  %v2708_v35 = vld [vmem:[%s4055_s9 + $0x48] sm:$0xff] }
 0x320   : > { %v2886_v36 = vpop.eup %2885 }
 0x321   : > { %v1169_v5 = vmul.f32 %v2886_v36, %v1119_v53  ;;  %v1168_v40 = vmul.f32 %v2886_v36, %v1118_v52  ;;  %v1167_v41 = vmul.f32 %v2886_v36, %v1117_v55  ;;  %v1166_v42 = vmul.f32 %v2886_v36, %v1116_v54  ;;  %v1206_v53 = vld [vmem:[%s4055_s9] sm:$0xff]  ;;  %v1207_v54 = vld [vmem:[%s4055_s9 + $0x8] sm:$0xff]  ;;  %v1208_v55 = vld [vmem:[%s4055_s9 + $0x10] sm:$0xff] }
 0x322   : > { %v1188_v63 = vmul.f32 %v2886_v36, %v3463_v56  ;;  %v1189_v19 = vmul.f32 %v2886_v36, %v3465_v57  ;;  %v1186_v2 = vmul.f32 %v2886_v36, %v3467_v58  ;;  %v1200_v56 = vld [vmem:[#allocation7 + $0x10] sm:$0xff]  ;;  %v1187_v57 = vmul.f32 %v2886_v36, %v3469_v59  ;;  %v1199_v59 = vld [vmem:[#allocation7 + $0x8] sm:$0xff] }
 0x323   : > { %v1177_v46 = vmul.f32 %v1173_v37, %v1169_v5  ;;  %v1176_v47 = vmul.f32 %v1172_v38, %v1168_v40  ;;  %v1175_v14 = vmul.f32 %v1171_v39, %v1167_v41  ;;  %v1174_v49 = vmul.f32 %v1170_v43, %v1166_v42  ;;  %v2709_v39 = vld [vmem:[%s4055_s9 + $0x50] sm:$0xff]  ;;  %v2710_v42 = vld [vmem:[%s4055_s9 + $0x58] sm:$0xff] }
 0x324   : > { %v1196_v1 = vmul.f32 %v1192_v11, %v1188_v63  ;;  %v1197_v3 = vmul.f32 %v1193_v15, %v1189_v19  ;;  %v1194_v58 = vmul.f32 %v1190_v4, %v1186_v2  ;;  %v1195_v12 = vmul.f32 %v1191_v7, %v1187_v57  ;;  %v2750_v63 = vld [vmem:[%s4055_s9 + $0xd8] sm:$0xff]  ;;  %v2731_v19 = vld [vmem:[%s4055_s9 + $0x80] sm:$0xff]  ;;  %v2732_v15 = vld [vmem:[%s4055_s9 + $0x88] sm:$0xff] }
 0x325   : > { %v1185_v50 = vadd.f32 %v1181_v44, %v1177_v46  ;;  %v1184_v51 = vadd.f32 %v1180_v45, %v1176_v47  ;;  %v1183_v61 = vadd.f32 %v1179_v48, %v1175_v14  ;;  %v1182_v52 = vadd.f32 %v1178_v60, %v1174_v49  ;;  %v2711_v46 = vld [vmem:[%s4055_s9 + $0x60] sm:$0xff]  ;;  %v2733_v2 = vld [vmem:[%s4055_s9 + $0x90] sm:$0xff]  ;;  %v2754_v57 = vld [vmem:[%s4055_s9 + $0xf8] sm:$0xff] }
 0x326   : > { %v3523_v9 = vadd.f32 %v1200_v56, %v1196_v1  ;;  %v1205_v10 = vadd.f32 %v1201_v6, %v1197_v3  ;;  %v3533_v17 = vadd.f32 %v1198_v13, %v1194_v58  ;;  %v3535_v18 = vadd.f32 %v1199_v59, %v1195_v12  ;;  %v2747_v47 = vld [vmem:[%s4055_s9 + $0xc0] sm:$0xff]  ;;  %v2753_v3 = vld [vmem:[%s4055_s9 + $0xf0] sm:$0xff]  ;;  %v2734_v56 = vld [vmem:[%s4055_s9 + $0x98] sm:$0xff] }
 0x327   : > { %1233 = vrot.lane.b32.xlu1 %v1185_v50, %s3078_s28  ;;  %1431 = vmatprep.subr.mxu0 %v1185_v50  ;;  %v2751_v11 = vld [vmem:[%s4055_s9 + $0xe0] sm:$0xff]  ;;  %v2736_v7 = vld [vmem:[%s4055_s9 + $0xa8] sm:$0xff]  ;;  %v2773_v58 = vld [vmem:[%s4056_s10 + $0x50] sm:$0xff] }
 0x328   : > { %1231 = vrot.lane.b32.xlu0 %v1184_v51, %s3078_s28  ;;  %1432 = vmatpush1.msra.mxu0 %v1184_v51  ;;  %v2735_v4 = vld [vmem:[%s4055_s9 + $0xa0] sm:$0xff]  ;;  %v2738_v12 = vld [vmem:[%s4055_s9 + $0xb8] sm:$0xff] }
 0x329   : > { %1433 = vmatprep.subr.mxu0 %v1183_v61  ;;  %v2771_v6 = vld [vmem:[%s4056_s10 + $0x40] sm:$0xff]  ;;  %v2774_v13 = vld [vmem:[%s4056_s10 + $0x58] sm:$0xff] }
 0x32a   : > { %1434 = vmatpush1.msra.mxu0 %v1182_v52  ;;  %v1870_v59 = vld [vmem:[%s4056_s10] sm:$0xff] }
 0x32b   : > { %1227 = vrot.lane.b32.xlu1 %v1182_v52, %s3078_s28  ;;  %2723 = vmatmul.mubr.msk.f32.vlgmr.msra.gmra.mxu0 %vm1241_vm4, %v1206_v53  ;;  %v2713_v53 = vld [vmem:[%s4055_s9 + $0x70] sm:$0xff] }
 0x32c   : > { %1229 = vrot.lane.b32.xlu0 %v1183_v61, %s3078_s28  ;;  %1473 = vmatprep.mubr.f32.mxu0 %v3077_v0 }
 0x32f   : > { %1529 = vrot.lane.b32.xlu1 %v1184_v51, %s3080_s22  ;;  %2724 = vmatmul.mubr.msk.f32.gmra.mxu0 %vm1241_vm4, %v1207_v54  ;;  %v2749_v54 = vld [vmem:[%s4055_s9 + $0xd0] sm:$0xff] }
 0x330   : > { %1531 = vrot.lane.b32.xlu0 %v1185_v50, %s3080_s22  ;;  %1479 = vmatprep.mubr.f32.mxu0 %v3077_v0 }
 0x333   : > { %1525 = vrot.lane.b32.xlu1 %v1182_v52, %s3080_s22  ;;  %2725 = vmatmul.mubr.msk.f32.gmra.mxu0 %vm1241_vm4, %v1208_v55 }
 0x334   : > { %1527 = vrot.lane.b32.xlu0 %v1183_v61, %s3080_s22  ;;  %1485 = vmatprep.mubr.f32.mxu0 %v3077_v0 }
 0x337   : > { %1706 = vrot.lane.b32.xlu1 %v1184_v51, %s3081_s17  ;;  %2726 = vmatmul.mubr.msk.f32.gmra.mxu0 %vm1241_vm4, %v1209_v62  ;;  %v2748_v51 = vld [vmem:[%s4055_s9 + $0xc8] sm:$0xff]  ;;  %v2714_v62 = vld [vmem:[%s4055_s9 + $0x78] sm:$0xff] }
 0x338   : > { %1708 = vrot.lane.b32.xlu0 %v1185_v50, %s3081_s17  ;;  %1491 = vmatprep.mubr.f32.mxu0 %v3077_v0  ;;  %v2712_v50 = vld [vmem:[%s4055_s9 + $0x68] sm:$0xff] }
 0x33b   : > { %1702 = vrot.lane.b32.xlu1 %v1182_v52, %s3081_s17  ;;  %2727 = vmatmul.mubr.msk.f32.gmra.mxu0 %vm1241_vm4, %v1210_v20  ;;  %v2752_v20 = vld [vmem:[%s4055_s9 + $0xe8] sm:$0xff] }
 0x33c   : > { %1704 = vrot.lane.b32.xlu0 %v1183_v61, %s3081_s17  ;;  %1497 = vmatprep.mubr.f32.mxu0 %v3077_v0 }
 0x33f   : > { %2048 = vrot.lane.b32.xlu1 %v3523_v9, %s3078_s28  ;;  %2728 = vmatmul.mubr.msk.f32.gmra.mxu0 %vm1241_vm4, %v1211_v8  ;;  %v2772_v8 = vld [vmem:[%s4056_s10 + $0x48] sm:$0xff] }
 0x340   : > { %2050 = vrot.lane.b32.xlu0 %v1205_v10, %s3078_s28  ;;  %1503 = vmatprep.mubr.f32.mxu0 %v3077_v0 }
 0x343   : > { %2044 = vrot.lane.b32.xlu1 %v3533_v17, %s3078_s28  ;;  %2729 = vmatmul.mubr.msk.f32.gmra.mxu0 %vm1241_vm4, %v1212_v16 }
 0x344   : > { %2046 = vrot.lane.b32.xlu0 %v3535_v18, %s3078_s28  ;;  %1509 = vmatprep.mubr.f32.mxu0 %v3077_v0 }
 0x347   : > { %2224 = vrot.lane.b32.xlu1 %v3523_v9, %s3080_s22  ;;  %2730 = vmatmul.mubr.msk.f32.gmra.mxu0 %vm1241_vm4, %v1213_v21 }
 0x348   : > { %2226 = vrot.lane.b32.xlu0 %v1205_v10, %s3080_s22  ;;  %1805 = vmatprep.mubr.f32.mxu0 %v3077_v0 }
 0x34b   : > { %2220 = vrot.lane.b32.xlu1 %v3533_v17, %s3080_s22 }
 0x34c   : > { %2222 = vrot.lane.b32.xlu0 %v3535_v18, %s3080_s22 }
 0x34f   : > { %2401 = vperm.xlu1 %2884, %v2395_v22   ;;  %v1871_v22 = vld [vmem:[%s4056_s10 + $0x8] sm:$0xff] }
 0x350   : > { %2406 = vperm.xlu0 %2883, %v2396_v23  }
 0x353   : > { %2411 = vperm.xlu1 %2884, %v2397_v24   ;;  %v2776_v24 = vld [vmem:[%s4056_s10 + $0x68] sm:$0xff] }
 0x354   : > { %2416 = vperm.xlu0 %2883, %v2398_v27   ;;  %v1872_v27 = vld [vmem:[%s4056_s10 + $0x10] sm:$0xff] }
 0x399   : > { %v1234_v28 = vpop.permute.xlu1 %1233 }
 0x39a   : > { %v1232_v29 = vpop.permute.xlu0 %1231  ;;  %1294 = vmatprep.subr.mxu1 %v1234_v28 }
 0x39b   : > { %v1236_v25 = vsel %vm778_vm1, %v1232_v29, %v1234_v28  ;;  %v2777_v28 = vld [vmem:[%s4056_s10 + $0x70] sm:$0xff]  ;;  %v1873_v29 = vld [vmem:[%s4056_s10 + $0x18] sm:$0xff] }
 0x39c   : > { %1295 = vmatpush1.msra.mxu1 %v1236_v25  ;;  %v2778_v25 = vld [vmem:[%s4056_s10 + $0x78] sm:$0xff] }
 0x39d   : > { %v1228_v26 = vpop.permute.xlu1 %1227 }
 0x39e   : > { %v1230_v30 = vpop.permute.xlu0 %1229 }
 0x39f   : > { %v1235_v32 = vsel %vm778_vm1, %v1228_v26, %v1230_v30  ;;  %1296 = vmatprep.subr.mxu1 %v1230_v30  ;;  %v1874_v26 = vld [vmem:[%s4056_s10 + $0x20] sm:$0xff]  ;;  %v1875_v30 = vld [vmem:[%s4056_s10 + $0x28] sm:$0xff] }
 0x3a0   : > { %1297 = vmatpush1.msra.mxu1 %v1235_v32  ;;  %v1877_v32 = vld [vmem:[%s4056_s10 + $0x38] sm:$0xff] }
 0x3a1   : > { %2715 = vmatmul.mubr.msk.f32.vlgmr.msra.gmra.mxu1 %vm1241_vm4, %v2707_v31  ;;  %v1530_v33 = vpop.permute.xlu1 %1529  ;;  %v1876_v31 = vld [vmem:[%s4056_s10 + $0x30] sm:$0xff] }
 0x3a2   : > { %v1532_v34 = vpop.permute.xlu0 %1531  ;;  %1336 = vmatprep.mubr.f32.mxu1 %v3077_v0 }
 0x3a3   : > { %v1535_v36 = vsel %vm1533_vm5, %v1530_v33, %v1532_v34  ;;  %1592 = vmatprep.subr.mxu1 %v1532_v34  ;;  %v2787_v33 = vld [vmem:[%s4056_s10 + $0x80] sm:$0xff]  ;;  %v2788_v34 = vld [vmem:[%s4056_s10 + $0x88] sm:$0xff] }
 0x3a4   : > { %1593 = vmatpush1.msra.mxu1 %v1535_v36  ;;  %v2790_v36 = vld [vmem:[%s4056_s10 + $0x98] sm:$0xff] }
 0x3a5   : > { %2716 = vmatmul.mubr.msk.f32.gmra.mxu1 %vm1241_vm4, %v2708_v35  ;;  %v1526_v37 = vpop.permute.xlu1 %1525  ;;  %v2789_v35 = vld [vmem:[%s4056_s10 + $0x90] sm:$0xff] }
 0x3a6   : > { %v1528_v38 = vpop.permute.xlu0 %1527  ;;  %1342 = vmatprep.mubr.f32.mxu1 %v3077_v0 }
 0x3a7   : > { %v1534_v5 = vsel %vm1533_vm5, %v1526_v37, %v1528_v38  ;;  %1594 = vmatprep.subr.mxu1 %v1528_v38  ;;  %v2791_v37 = vld [vmem:[%s4056_s10 + $0xa0] sm:$0xff]  ;;  %v2792_v38 = vld [vmem:[%s4056_s10 + $0xa8] sm:$0xff] }
 0x3a8   : > { %1595 = vmatpush1.msra.mxu1 %v1534_v5  ;;  %v2794_v5 = vld [vmem:[%s4056_s10 + $0xb8] sm:$0xff] }
 0x3a9   : > { %2717 = vmatmul.mubr.msk.f32.gmra.mxu1 %vm1241_vm4, %v2709_v39  ;;  %1930 = vmatprep.subr.mxu1 %v1205_v10  ;;  %v1707_v40 = vpop.permute.xlu1 %1706  ;;  %v2793_v39 = vld [vmem:[%s4056_s10 + $0xb0] sm:$0xff] }
 0x3aa   : > { %v1709_v41 = vpop.permute.xlu0 %1708  ;;  %1348 = vmatprep.mubr.f32.mxu1 %v3077_v0 }
 0x3ab   : > { %v1712_v43 = vsel %vm1710_vm6, %v1707_v40, %v1709_v41  ;;  %1769 = vmatprep.subr.mxu0 %v1709_v41 }
 0x3ac   : > { %1770 = vmatpush1.msra.mxu0 %v1712_v43 }
 0x3ad   : > { %2718 = vmatmul.mubr.msk.f32.gmra.mxu1 %vm1241_vm4, %v2710_v42  ;;  %v1703_v44 = vpop.permute.xlu1 %1702 }
 0x3ae   : > { %v1705_v45 = vpop.permute.xlu0 %1704  ;;  %1354 = vmatprep.mubr.f32.mxu1 %v3077_v0 }
 0x3af   : > { %v1711_v14 = vsel %vm1710_vm6, %v1703_v44, %v1705_v45  ;;  %1771 = vmatprep.subr.mxu0 %v1705_v45 }
 0x3b0   : > { %1772 = vmatpush1.msra.mxu0 %v1711_v14 }
 0x3b1   : > { %2719 = vmatmul.mubr.msk.f32.gmra.mxu1 %vm1241_vm4, %v2711_v46  ;;  %v2049_v48 = vpop.permute.xlu1 %2048  ;;  %2755 = vmatmul.mubr.msk.f32.vlgmr.msra.gmra.mxu0 %vm1241_vm4, %v2747_v47 }
 0x3b2   : > { %v2051_v49 = vpop.permute.xlu0 %2050  ;;  %1360 = vmatprep.mubr.f32.mxu1 %v3077_v0  ;;  %1811 = vmatprep.mubr.f32.mxu0 %v3077_v0 }
 0x3b3   : > { %v2053_v60 = vsel %vm778_vm1, %v2049_v48, %v2051_v49  ;;  %2110 = vmatprep.subr.mxu0 %v2051_v49 }
 0x3b4   : > { %2111 = vmatpush1.msra.mxu0 %v2053_v60 }
 0x3b5   : > { %2720 = vmatmul.mubr.msk.f32.gmra.mxu1 %vm1241_vm4, %v2712_v50  ;;  %v2045_v61 = vpop.permute.xlu1 %2044  ;;  %2756 = vmatmul.mubr.msk.f32.gmra.mxu0 %vm1241_vm4, %v2748_v51 }
 0x3b6   : > { %v2047_v52 = vpop.permute.xlu0 %2046  ;;  %1366 = vmatprep.mubr.f32.mxu1 %v3077_v0  ;;  %1817 = vmatprep.mubr.f32.mxu0 %v3077_v0 }
 0x3b7   : > { %v2052_v55 = vsel %vm778_vm1, %v2045_v61, %v2047_v52  ;;  %2112 = vmatprep.subr.mxu0 %v2047_v52 }
 0x3b8   : > { %2113 = vmatpush1.msra.mxu0 %v2052_v55 }
 0x3b9   : > { %2721 = vmatmul.mubr.msk.f32.gmra.mxu1 %vm1241_vm4, %v2713_v53  ;;  %2757 = vmatmul.mubr.msk.f32.gmra.mxu0 %vm1241_vm4, %v2749_v54  ;;  %v2225_v10 = vpop.permute.xlu1 %2224 }
 0x3ba   : > { %1372 = vmatprep.mubr.f32.mxu1 %v3077_v0  ;;  %1823 = vmatprep.mubr.f32.mxu0 %v3077_v0  ;;  %v2227_v1 = vpop.permute.xlu0 %2226 }
 0x3bb   : > { %v2229_v21 = vsel %vm1533_vm5, %v2225_v10, %v2227_v1 }
 0x3bd   : > { %2722 = vmatmul.mubr.msk.f32.gmra.mxu1 %vm1241_vm4, %v2714_v62  ;;  %2758 = vmatmul.mubr.msk.f32.gmra.mxu0 %vm1241_vm4, %v2750_v63 }
 0x3be   : > { %1628 = vmatprep.mubr.f32.mxu1 %v3077_v0  ;;  %1829 = vmatprep.mubr.f32.mxu0 %v3077_v0  ;;  %v2223_v16 = vpop.permute.xlu0 %2222 }
 0x3c1   : > { %2739 = vmatmul.mubr.msk.f32.vlgmr.msra.gmra.mxu1 %vm1241_vm4, %v2731_v19  ;;  %2759 = vmatmul.mubr.msk.f32.gmra.mxu0 %vm1241_vm4, %v2751_v11 }
 0x3c2   : > { %1931 = vmatpush1.msra.mxu1 %v3523_v9  ;;  %1634 = vmatprep.mubr.f32.mxu1 %v3077_v0  ;;  %v2737_v9 = vld [vmem:[%s4055_s9 + $0xb0] sm:$0xff] }
 0x3c3   : > { %1932 = vmatprep.subr.mxu1 %v3535_v18  ;;  %1835 = vmatprep.mubr.f32.mxu0 %v3077_v0  ;;  %v2775_v18 = vld [vmem:[%s4056_s10 + $0x60] sm:$0xff] }
 0x3c4   : > { %1933 = vmatpush1.msra.mxu1 %v3533_v17  ;;  %v2221_v17 = vpop.permute.xlu1 %2220 }
 0x3c5   : > { %2286 = vmatprep.subr.mxu1 %v2227_v1  ;;  %2740 = vmatmul.mubr.msk.f32.gmra.mxu1 %vm1241_vm4, %v2732_v15  ;;  %v2228_v23 = vsel %vm1533_vm5, %v2221_v17, %v2223_v16 }
 0x3c6   : > { %1640 = vmatprep.mubr.f32.mxu1 %v3077_v0  ;;  %2760 = vmatmul.mubr.msk.f32.gmra.mxu0 %vm1241_vm4, %v2752_v20 }
 0x3c7   : > { %1841 = vmatprep.mubr.f32.mxu0 %v3077_v0 }
 0x3c9   : > { %2741 = vmatmul.mubr.msk.f32.gmra.mxu1 %vm1241_vm4, %v2733_v2 }
 0x3ca   : > { %1646 = vmatprep.mubr.f32.mxu1 %v3077_v0  ;;  %2761 = vmatmul.mubr.msk.f32.gmra.mxu0 %vm1241_vm4, %v2753_v3 }
 0x3cb   : > { %1847 = vmatprep.mubr.f32.mxu0 %v3077_v0 }
 0x3cd   : > { %2742 = vmatmul.mubr.msk.f32.gmra.mxu1 %vm1241_vm4, %v2734_v56 }
 0x3ce   : > { %1652 = vmatprep.mubr.f32.mxu1 %v3077_v0  ;;  %2762 = vmatmul.mubr.msk.f32.gmra.mxu0 %vm1241_vm4, %v2754_v57 }
 0x3cf   : > { %2146 = vmatprep.mubr.f32.mxu0 %v3077_v0 }
 0x3d1   : > { %2743 = vmatmul.mubr.msk.f32.gmra.mxu1 %vm1241_vm4, %v2735_v4 }
 0x3d2   : > { %1658 = vmatprep.mubr.f32.mxu1 %v3077_v0  ;;  %2779 = vmatmul.mubr.msk.f32.vlgmr.msra.gmra.mxu0 %vm1241_vm4, %v2771_v6 }
 0x3d3   : > { %2152 = vmatprep.mubr.f32.mxu0 %v3077_v0 }
 0x3d5   : > { %2744 = vmatmul.mubr.msk.f32.gmra.mxu1 %vm1241_vm4, %v2736_v7 }
 0x3d6   : > { %1664 = vmatprep.mubr.f32.mxu1 %v3077_v0  ;;  %2780 = vmatmul.mubr.msk.f32.gmra.mxu0 %vm1241_vm4, %v2772_v8 }
 0x3d7   : > { %2158 = vmatprep.mubr.f32.mxu0 %v3077_v0 }
 0x3d9   : > { %2745 = vmatmul.mubr.msk.f32.gmra.mxu1 %vm1241_vm4, %v2737_v9 }
 0x3da   : > { %1670 = vmatprep.mubr.f32.mxu1 %v3077_v0  ;;  %2781 = vmatmul.mubr.msk.f32.gmra.mxu0 %vm1241_vm4, %v2773_v58 }
 0x3db   : > { %2164 = vmatprep.mubr.f32.mxu0 %v3077_v0 }
 0x3dd   : > { %2746 = vmatmul.mubr.msk.f32.gmra.mxu1 %vm1241_vm4, %v2738_v12 }
 0x3de   : > { %1966 = vmatprep.mubr.f32.mxu1 %v3077_v0  ;;  %2782 = vmatmul.mubr.msk.f32.gmra.mxu0 %vm1241_vm4, %v2774_v13 }
 0x3df   : > { %2170 = vmatprep.mubr.f32.mxu0 %v3077_v0 }
 0x3e1   : > { %2763 = vmatmul.mubr.msk.f32.vlgmr.msra.gmra.mxu1 %vm1241_vm4, %v1870_v59 }
 0x3e2   : > { %2287 = vmatpush1.msra.mxu1 %v2229_v21  ;;  %1972 = vmatprep.mubr.f32.mxu1 %v3077_v0 }
 0x3e3   : > { %2288 = vmatprep.subr.mxu1 %v2223_v16  ;;  %2783 = vmatmul.mubr.msk.f32.gmra.mxu0 %vm1241_vm4, %v2775_v18 }
 0x3e4   : > { %2289 = vmatpush1.msra.mxu1 %v2228_v23  ;;  %2176 = vmatprep.mubr.f32.mxu0 %v3077_v0 }
 0x3e5   : > { %2764 = vmatmul.mubr.msk.f32.gmra.mxu1 %vm1241_vm4, %v1871_v22 }
 0x3e6   : > { %1978 = vmatprep.mubr.f32.mxu1 %v3077_v0 }
 0x3e7   : > { %2784 = vmatmul.mubr.msk.f32.gmra.mxu0 %vm1241_vm4, %v2776_v24 }
 0x3e8   : > { %2182 = vmatprep.mubr.f32.mxu0 %v3077_v0 }
 0x3e9   : > { %2765 = vmatmul.mubr.msk.f32.gmra.mxu1 %vm1241_vm4, %v1872_v27 }
 0x3ea   : > { %1984 = vmatprep.mubr.f32.mxu1 %v3077_v0 }
 0x3eb   : > { %2785 = vmatmul.mubr.msk.f32.gmra.mxu0 %vm1241_vm4, %v2777_v28  ;;  %v1469_v40 = vpop.f32.mrf.mxu0 }
 0x3ec   : > { %2188 = vmatprep.mubr.f32.mxu0 %v3077_v0 }
 0x3ed   : > { %2766 = vmatmul.mubr.msk.f32.gmra.mxu1 %vm1241_vm4, %v1873_v29  ;;  %v1471_v41 = vpop.f32.mrf.mxu0 }
 0x3ee   : > { %1990 = vmatprep.mubr.f32.mxu1 %v3077_v0 }
 0x3ef   : > { %2786 = vmatmul.mubr.msk.f32.gmra.mxu0 %vm1241_vm4, %v2778_v25  ;;  %v1475_v42 = vpop.f32.mrf.mxu0 }
 0x3f1   : > { %2767 = vmatmul.mubr.msk.f32.gmra.mxu1 %vm1241_vm4, %v1874_v26  ;;  %v1477_v43 = vpop.f32.mrf.mxu0 }
 0x3f2   : > { %1996 = vmatprep.mubr.f32.mxu1 %v3077_v0 }
 0x3f3   : > { %v1481_v44 = vpop.f32.mrf.mxu0 }
 0x3f5   : > { %2768 = vmatmul.mubr.msk.f32.gmra.mxu1 %vm1241_vm4, %v1875_v30  ;;  %v1483_v45 = vpop.f32.mrf.mxu0 }
 0x3f6   : > { %2002 = vmatprep.mubr.f32.mxu1 %v3077_v0 }
 0x3f7   : > { %v1487_v46 = vpop.f32.mrf.mxu0 }
 0x3f9   : > { %2769 = vmatmul.mubr.msk.f32.gmra.mxu1 %vm1241_vm4, %v1876_v31  ;;  %v1489_v47 = vpop.f32.mrf.mxu0 }
 0x3fa   : > { %2008 = vmatprep.mubr.f32.mxu1 %v3077_v0 }
 0x3fb   : > { %v3818_v14 = vpop.f32.mrf.mxu0 }
 0x3fd   : > { %2770 = vmatmul.mubr.msk.f32.gmra.mxu1 %vm1241_vm4, %v1877_v32  ;;  %v3820_v48 = vpop.f32.mrf.mxu0 }
 0x3fe   : > { %2322 = vmatprep.mubr.f32.mxu1 %v3077_v0 }
 0x3ff   : > { %v3822_v49 = vpop.f32.mrf.mxu0 }
 0x401   : > { %2795 = vmatmul.mubr.msk.f32.vlgmr.msra.gmra.mxu1 %vm1241_vm4, %v2787_v33 }
 0x402   : > { %2328 = vmatprep.mubr.f32.mxu1 %v3077_v0 }
 0x405   : > { %2796 = vmatmul.mubr.msk.f32.gmra.mxu1 %vm1241_vm4, %v2788_v34 }
 0x406   : > { %2334 = vmatprep.mubr.f32.mxu1 %v3077_v0 }
 0x409   : > { %2797 = vmatmul.mubr.msk.f32.gmra.mxu1 %vm1241_vm4, %v2789_v35 }
 0x40a   : > { %2340 = vmatprep.mubr.f32.mxu1 %v3077_v0 }
 0x40d   : > { %2798 = vmatmul.mubr.msk.f32.gmra.mxu1 %vm1241_vm4, %v2790_v36 }
 0x40e   : > { %2346 = vmatprep.mubr.f32.mxu1 %v3077_v0 }
 0x411   : > { %2799 = vmatmul.mubr.msk.f32.gmra.mxu1 %vm1241_vm4, %v2791_v37 }
 0x412   : > { %2352 = vmatprep.mubr.f32.mxu1 %v3077_v0 }
 0x415   : > { %2800 = vmatmul.mubr.msk.f32.gmra.mxu1 %vm1241_vm4, %v2792_v38 }
 0x416   : > { %2358 = vmatprep.mubr.f32.mxu1 %v3077_v0 }
 0x419   : > { %2801 = vmatmul.mubr.msk.f32.gmra.mxu1 %vm1241_vm4, %v2793_v39 }
 0x41a   : > { %2364 = vmatprep.mubr.f32.mxu1 %v3077_v0  ;;  %v3824_v0 = vpop.f32.mrf.mxu0 }
 0x41c   : > { %v3826_v60 = vpop.f32.mrf.mxu0 }
 0x41d   : > { %2802 = vmatmul.mubr.msk.f32.gmra.mxu1 %vm1241_vm4, %v2794_v5 }
 0x41e   : > { %v3828_v53 = vpop.f32.mrf.mxu0 }
 0x420   : > { %v3830_v62 = vpop.f32.mrf.mxu0 }
 0x422   : > { %v3832_v11 = vpop.f32.mrf.mxu0 }
 0x461   : > { %v1332_v50 = vpop.f32.mrf.mxu1 }
 0x462   : > { %v1470_v59 = vadd.f32 %v1469_v40, %v1332_v50 }
 0x463   : > { %v1334_v51 = vpop.f32.mrf.mxu1 }
 0x464   : > { %v1472_v18 = vadd.f32 %v1471_v41, %v1334_v51 }
 0x465   : > { %v1338_v61 = vpop.f32.mrf.mxu1 }
 0x466   : > { %v1476_v24 = vadd.f32 %v1475_v42, %v1338_v61 }
 0x467   : > { %v1340_v52 = vpop.f32.mrf.mxu1 }
 0x468   : > { %v1478_v29 = vadd.f32 %v1477_v43, %v1340_v52 }
 0x469   : > { %v1344_v54 = vpop.f32.mrf.mxu1 }
 0x46a   : > { %v1482_v31 = vadd.f32 %v1481_v44, %v1344_v54 }
 0x46b   : > { %v1346_v55 = vpop.f32.mrf.mxu1 }
 0x46c   : > { %v1484_v34 = vadd.f32 %v1483_v45, %v1346_v55 }
 0x46d   : > { %v1350_v63 = vpop.f32.mrf.mxu1 }
 0x46e   : > { %v1488_v38 = vadd.f32 %v1487_v46, %v1350_v63 }
 0x46f   : > { %v1352_v19 = vpop.f32.mrf.mxu1 }
 0x470   : > { %v1490_v40 = vadd.f32 %v1489_v47, %v1352_v19 }
 0x471   : > { %v3834_v15 = vpop.f32.mrf.mxu1  ;;  %v3836_v20 = vpop.f32.mrf.mxu0 }
 0x473   : > { %v3838_v1 = vpop.f32.mrf.mxu1  ;;  %v3840_v2 = vpop.f32.mrf.mxu0 }
 0x475   : > { %v3842_v3 = vpop.f32.mrf.mxu1  ;;  %v3844_v56 = vpop.f32.mrf.mxu0 }
 0x477   : > { %v3846_v57 = vpop.f32.mrf.mxu1  ;;  %v3848_v4 = vpop.f32.mrf.mxu0 }
 0x479   : > { %v3850_v6 = vpop.f32.mrf.mxu1  ;;  %v3852_v7 = vpop.f32.mrf.mxu0 }
 0x47b   : > { %v3854_v8 = vpop.f32.mrf.mxu1  ;;  %v3856_v9 = vpop.f32.mrf.mxu0 }
 0x47d   : > { %v3858_v58 = vpop.f32.mrf.mxu1  ;;  %v3860_v10 = vpop.f32.mrf.mxu0 }
 0x47f   : > { %v3862_v12 = vpop.f32.mrf.mxu1  ;;  %v3864_v13 = vpop.f32.mrf.mxu0 }
 0x481   : > { %v1630_v16 = vpop.f32.mrf.mxu1  ;;  %v3866_v17 = vpop.f32.mrf.mxu0 }
 0x482   : > { %v3868_v21 = vadd.f32 %v1630_v16, %v1470_v59 }
 0x483   : > { %v1632_v22 = vpop.f32.mrf.mxu1  ;;  %v3870_v23 = vpop.f32.mrf.mxu0 }
 0x484   : > { %v3872_v27 = vadd.f32 %v1632_v22, %v1472_v18 }
 0x485   : > { %v1636_v28 = vpop.f32.mrf.mxu1 }
 0x486   : > { %v3874_v25 = vadd.f32 %v1636_v28, %v1476_v24  ;;  %v3876_v26 = vpop.f32.mrf.mxu0 }
 0x487   : > { %v1638_v30 = vpop.f32.mrf.mxu1 }
 0x488   : > { %v3878_v32 = vadd.f32 %v1638_v30, %v1478_v29  ;;  %v3882_v36 = vpop.f32.mrf.mxu0 }
 0x489   : > { %v1642_v33 = vpop.f32.mrf.mxu1 }
 0x48a   : > { %v3880_v35 = vadd.f32 %v1642_v33, %v1482_v31  ;;  %v3888_v42 = vpop.f32.mrf.mxu0 }
 0x48b   : > { %v1644_v37 = vpop.f32.mrf.mxu1 }
 0x48c   : > { %v3884_v39 = vadd.f32 %v1644_v37, %v1484_v34  ;;  %v3892_v51 = vpop.f32.mrf.mxu0 }
 0x48d   : > { %v1648_v5 = vpop.f32.mrf.mxu1 }
 0x48e   : > { %v3886_v41 = vadd.f32 %v1648_v5, %v1488_v38  ;;  %v3894_v52 = vpop.f32.mrf.mxu0 }
 0x48f   : > { %v1650_v43 = vpop.f32.mrf.mxu1  ;;  %4064 = vst [vmem:[#allocation16_spill] sm:$0xff] %v3894_v52 }
 0x490   : > { %v3890_v44 = vadd.f32 %v1650_v43, %v1490_v40  ;;  %v3896_v55 = vpop.f32.mrf.mxu0 }
 0x491   : > { %v1654_v50 = vpop.f32.mrf.mxu1  ;;  %4065 = vst [vmem:[#allocation17_spill] sm:$0xff] %v3896_v55 }
 0x492   : > { %v3900_v19 = vpop.f32.mrf.mxu0 }
 0x493   : > { %v1656_v45 = vpop.f32.mrf.mxu1  ;;  %4066 = vst [vmem:[#allocation18_spill] sm:$0xff] %v3900_v19  ;;  %v1502_v19 = vadd.f32 %v3824_v0, %v3846_v57 }
 0x494   : > { %v3904_v18 = vpop.f32.mrf.mxu0 }
 0x495   : > { %v1660_v61 = vpop.f32.mrf.mxu1  ;;  %4068 = vst [vmem:[#allocation20_spill] sm:$0xff] %v3904_v18 }
 0x496   : > { %v3908_v28 = vpop.f32.mrf.mxu0 }
 0x497   : > { %v1662_v54 = vpop.f32.mrf.mxu1  ;;  %4069 = vst [vmem:[#allocation21_spill] sm:$0xff] %v3908_v28 }
 0x498   : > { %v3914_v31 = vpop.f32.mrf.mxu0 }
 0x499   : > { %v1666_v46 = vpop.f32.mrf.mxu1  ;;  %4072 = vst [vmem:[#allocation24_spill] sm:$0xff] %v3914_v31 }
 0x49a   : > { %v3920_v37 = vpop.f32.mrf.mxu0 }
 0x49b   : > { %v1668_v63 = vpop.f32.mrf.mxu1  ;;  %4075 = vst [vmem:[#allocation27_spill] sm:$0xff] %v3920_v37 }
 0x49c   : > { %v3924_v40 = vpop.f32.mrf.mxu0 }
 0x49d   : > { %v3898_v47 = vpop.f32.mrf.mxu1  ;;  %4077 = vst [vmem:[#allocation29_spill] sm:$0xff] %v3924_v40 }
 0x49e   : > { %v3926_v28 = vpop.f32.mrf.mxu0 }
 0x49f   : > { %v3902_v59 = vpop.f32.mrf.mxu1  ;;  %4078 = vst [vmem:[#allocation30_spill] sm:$0xff] %v3926_v28  ;;  %v1494_v28 = vadd.f32 %v3818_v14, %v3834_v15  ;;  %v1508_v14 = vadd.f32 %v3828_v53, %v3854_v8  ;;  %v1856_v53 = vadd.f32 %v3844_v56, %v3874_v25 }
 0x4a0   : > { %4067 = vst [vmem:[#allocation19_spill] sm:$0xff] %v3902_v59  ;;  %v3932_v31 = vpop.f32.mrf.mxu0 }
 0x4a1   : > { %v1968_v16 = vpop.f32.mrf.mxu1  ;;  %4081 = vst [vmem:[#allocation33_spill] sm:$0xff] %v3932_v31  ;;  %v1685_v31 = vadd.f32 %v1654_v50, %v1494_v28 }
 0x4a3   : > { %v1970_v22 = vpop.f32.mrf.mxu1  ;;  %v2172_v37 = vpop.f32.mrf.mxu0 }
 0x4a5   : > { %v3906_v24 = vpop.f32.mrf.mxu1  ;;  %v2174_v18 = vpop.f32.mrf.mxu0 }
 0x4a7   : > { %v3910_v29 = vpop.f32.mrf.mxu1 }
 0x4a8   : > { %4070 = vst [vmem:[#allocation22_spill] sm:$0xff] %v3910_v29 }
 0x4a9   : > { %v3912_v30 = vpop.f32.mrf.mxu1 }
 0x4aa   : > { %4071 = vst [vmem:[#allocation23_spill] sm:$0xff] %v3912_v30 }
 0x4ab   : > { %v3916_v33 = vpop.f32.mrf.mxu1 }
 0x4ac   : > { %4073 = vst [vmem:[#allocation25_spill] sm:$0xff] %v3916_v33 }
 0x4ad   : > { %v3918_v34 = vpop.f32.mrf.mxu1 }
 0x4ae   : > { %4074 = vst [vmem:[#allocation26_spill] sm:$0xff] %v3918_v34 }
 0x4af   : > { %v3922_v38 = vpop.f32.mrf.mxu1 }
 0x4b0   : > { %4076 = vst [vmem:[#allocation28_spill] sm:$0xff] %v3922_v38 }
 0x4b1   : > { %v1992_v5 = vpop.f32.mrf.mxu1 }
 0x4b3   : > { %v1994_v43 = vpop.f32.mrf.mxu1 }
 0x4b5   : > { %v1998_v55 = vpop.f32.mrf.mxu1 }
 0x4b7   : > { %v3928_v52 = vpop.f32.mrf.mxu1 }
 0x4b8   : > { %4079 = vst [vmem:[#allocation31_spill] sm:$0xff] %v3928_v52  ;;  %v2178_v52 = vpop.f32.mrf.mxu0 }
 0x4b9   : > { %v3930_v30 = vpop.f32.mrf.mxu1 }
 0x4ba   : > { %4080 = vst [vmem:[#allocation32_spill] sm:$0xff] %v3930_v30  ;;  %v1496_v30 = vadd.f32 %v3820_v48, %v3838_v1  ;;  %v1512_v48 = vadd.f32 %v3830_v62, %v3858_v58  ;;  %v1514_v1 = vadd.f32 %v3832_v11, %v3862_v12  ;;  %v2180_v57 = vpop.f32.mrf.mxu0  ;;  %v1690_v11 = vadd.f32 %v1668_v63, %v1508_v14 }
 0x4bb   : > { %v3934_v33 = vpop.f32.mrf.mxu1 }
 0x4bc   : > { %4082 = vst [vmem:[#allocation34_spill] sm:$0xff] %v3934_v33 }
 0x4bd   : > { %v3936_v34 = vpop.f32.mrf.mxu1 }
 0x4be   : > { %4083 = vst [vmem:[#allocation35_spill] sm:$0xff] %v3936_v34  ;;  %v1500_v34 = vadd.f32 %v3822_v49, %v3842_v3  ;;  %v1854_v49 = vadd.f32 %v3836_v20, %v3868_v21  ;;  %v1862_v3 = vadd.f32 %v3866_v17, %v1685_v31  ;;  %v1857_v20 = vadd.f32 %v3848_v4, %v3878_v32 }
 0x4bf   : > { %v3938_v29 = vpop.f32.mrf.mxu1  ;;  %v1858_v17 = vadd.f32 %v3852_v7, %v3880_v35  ;;  %v1691_v32 = vadd.f32 %v3898_v47, %v1512_v48 }
 0x4c0   : > { %4084 = vst [vmem:[#allocation36_spill] sm:$0xff] %v3938_v29  ;;  %v1686_v29 = vadd.f32 %v1656_v45, %v1496_v30  ;;  %v1687_v0 = vadd.f32 %v1660_v61, %v1500_v34  ;;  %v2015_v12 = vadd.f32 %v1968_v16, %v1854_v49  ;;  %v2023_v50 = vadd.f32 %v1992_v5, %v1862_v3  ;;  %v2184_v61 = vpop.f32.mrf.mxu0  ;;  %v4093_v5 = vld [vmem:[#allocation21_spill] sm:$0xff] }
 0x4c1   : > { %v2324_v38 = vpop.f32.mrf.mxu1 }
 0x4c2   : > { %v1863_v58 = vadd.f32 %v3870_v23, %v1686_v29  ;;  %v1861_v23 = vadd.f32 %v3864_v13, %v3890_v44  ;;  %v1864_v25 = vadd.f32 %v3876_v26, %v1687_v0  ;;  %v2203_v13 = vadd.f32 %v2172_v37, %v2023_v50  ;;  %v4087_v26 = vld [vmem:[#allocation19_spill] sm:$0xff]  ;;  %v2186_v29 = vpop.f32.mrf.mxu0 }
 0x4c3   : > { %v3940_v40 = vpop.f32.mrf.mxu1 }
 0x4c4   : > { %4085 = vst [vmem:[#allocation37_spill] sm:$0xff] %v3940_v40  ;;  %v1506_v40 = vadd.f32 %v3826_v60, %v3850_v6  ;;  %v1855_v60 = vadd.f32 %v3840_v2, %v3872_v27  ;;  %v1688_v6 = vadd.f32 %v1662_v54, %v1502_v19  ;;  %v1859_v2 = vadd.f32 %v3856_v9, %v3884_v39  ;;  %v4086_v39 = vld [vmem:[#allocation18_spill] sm:$0xff] }
 0x4c5   : > { %v3944_v59 = vpop.f32.mrf.mxu1  ;;  %v1860_v27 = vadd.f32 %v3860_v10, %v3886_v41  ;;  %v2024_v45 = vadd.f32 %v1994_v43, %v1863_v58  ;;  %v2017_v9 = vadd.f32 %v3906_v24, %v1856_v53  ;;  %v1867_v10 = vadd.f32 %v3892_v51, %v1690_v11  ;;  %v4091_v24 = vld [vmem:[#allocation31_spill] sm:$0xff]  ;;  %v4092_v51 = vld [vmem:[#allocation16_spill] sm:$0xff]  ;;  %v4100_v11 = vld [vmem:[#allocation34_spill] sm:$0xff] }
 0x4c6   : > { %v1689_v62 = vadd.f32 %v1666_v46, %v1506_v40  ;;  %v2016_v21 = vadd.f32 %v1970_v22, %v1855_v60  ;;  %v1865_v4 = vadd.f32 %v3882_v36, %v1688_v6  ;;  %v2195_v41 = vadd.f32 %v4086_v39, %v2015_v12  ;;  %v4088_v46 = vld [vmem:[#allocation20_spill] sm:$0xff]  ;;  %v4089_v36 = vld [vmem:[#allocation22_spill] sm:$0xff]  ;;  %v4103_v39 = vld [vmem:[#allocation35_spill] sm:$0xff] }
 0x4c7   : > { %v3948_v33 = vpop.f32.mrf.mxu1  ;;  %v2025_v44 = vadd.f32 %v1998_v55, %v1864_v25  ;;  %v1692_v54 = vadd.f32 %v4087_v26, %v1514_v1  ;;  %v2018_v19 = vadd.f32 %v4089_v36, %v1857_v20  ;;  %v2204_v22 = vadd.f32 %v2174_v18, %v2024_v45  ;;  %v4094_v55 = vld [vmem:[#allocation25_spill] sm:$0xff]  ;;  %v4095_v43 = vld [vmem:[#allocation32_spill] sm:$0xff]  ;;  %v4101_v45 = vld [vmem:[#allocation26_spill] sm:$0xff] }
 0x4c8   : > { %v1866_v7 = vadd.f32 %v3888_v42, %v1689_v62  ;;  %v2196_v63 = vadd.f32 %v4088_v46, %v2016_v21  ;;  %v4090_v42 = vld [vmem:[#allocation23_spill] sm:$0xff]  ;;  %v2026_v28 = vadd.f32 %v4091_v24, %v1865_v4  ;;  %v2371_v30 = vadd.f32 %v2324_v38, %v2195_v41  ;;  %v4097_v18 = vld [vmem:[#allocation17_spill] sm:$0xff]  ;;  %v4098_v6 = vld [vmem:[#allocation24_spill] sm:$0xff] }
 0x4c9   : > { %v3960_v15 = vpop.f32.mrf.mxu1  ;;  %v2019_v16 = vadd.f32 %v4090_v42, %v1858_v17  ;;  %v1868_v34 = vadd.f32 %v4092_v51, %v1691_v32  ;;  %v2197_v37 = vadd.f32 %v4093_v5, %v2017_v9  ;;  %v2020_v40 = vadd.f32 %v4094_v55, %v1859_v2  ;;  %v4099_v38 = vld [vmem:[#allocation27_spill] sm:$0xff]  ;;  %v2190_v17 = vpop.f32.mrf.mxu0  ;;  %v4106_v24 = vld [vmem:[#allocation30_spill] sm:$0xff] }
 0x4ca   : > { %v2027_v14 = vadd.f32 %v4095_v43, %v1866_v7  ;;  %v2205_v1 = vadd.f32 %v2178_v52, %v2025_v44  ;;  %v1869_v53 = vadd.f32 %v4097_v18, %v1692_v54  ;;  %v2198_v62 = vadd.f32 %v4098_v6, %v2018_v19  ;;  %v2402_v52 = vpop.permute.xlu1 %2401  ;;  %v4102_v7 = vld [vmem:[#allocation29_spill] sm:$0xff] }
 0x4cb   : > { %v3971_v8 = vpop.f32.mrf.mxu1  ;;  %v4096_v49 = vld [vmem:[#allocation37_spill] sm:$0xff]  ;;  %v2199_v58 = vadd.f32 %v4099_v38, %v2019_v16  ;;  %v2028_v12 = vadd.f32 %v4100_v11, %v1867_v10  ;;  %v2206_v20 = vadd.f32 %v2180_v57, %v2026_v28  ;;  %v2373_v2 = vadd.f32 %v3944_v59, %v2197_v37  ;;  %v4104_v57 = vld [vmem:[#allocation28_spill] sm:$0xff] }
 0x4cc   : > { %v2372_v3 = vadd.f32 %v4096_v49, %v2196_v63  ;;  %v2021_v4 = vadd.f32 %v4101_v45, %v1860_v27  ;;  %v2200_v32 = vadd.f32 %v4102_v7, %v2020_v40  ;;  %v2207_v9 = vadd.f32 %v2184_v61, %v2027_v14  ;;  %v4105_v63 = vld [vmem:[#allocation36_spill] sm:$0xff]  ;;  %v2192_v27 = vpop.f32.mrf.mxu0  ;;  %v4107_v37 = vld [vmem:[#allocation33_spill] sm:$0xff] }
 0x4cd   : > { %v3980_v56 = vpop.f32.mrf.mxu1  ;;  %v2029_v41 = vadd.f32 %v4103_v39, %v1868_v34  ;;  %v2374_v44 = vadd.f32 %v3948_v33, %v2198_v62  ;;  %v2022_v46 = vadd.f32 %v4104_v57, %v1861_v23  ;;  %v2208_v59 = vadd.f32 %v2186_v29, %v2028_v12  ;;  %v2407_v33 = vpop.permute.xlu0 %2406 }
 0x4ce   : > { %v2030_v36 = vadd.f32 %v4105_v63, %v1869_v53  ;;  %v2375_v16 = vadd.f32 %v3960_v15, %v2199_v58  ;;  %v2201_v28 = vadd.f32 %v4106_v24, %v2021_v4  ;;  %v2376_v23 = vadd.f32 %v3971_v8, %v2200_v32 }
 0x4cf   : > { %v3991_v35 = vpop.f32.mrf.mxu1  ;;  %v2202_v55 = vadd.f32 %v4107_v37, %v2022_v46 }
 0x4d0   : > { %v2210_v40 = vadd.f32 %v2192_v27, %v2030_v36  ;;  %v2377_v14 = vadd.f32 %v3980_v56, %v2201_v28 }
 0x4d1   : > { %v2348_v47 = vpop.f32.mrf.mxu1  ;;  %v2378_v8 = vadd.f32 %v3991_v35, %v2202_v55  ;;  %v2417_v11 = vpop.permute.xlu0 %2416 }
 0x4d2   : > { %v2379_v31 = vadd.f32 %v2348_v47, %v2203_v13 }
 0x4d3   : > { %v2350_v48 = vpop.f32.mrf.mxu1 }
 0x4d4   : > { %v2387_v0 = vmax.f32 %v2371_v30, %v2379_v31  ;;  %v2380_v60 = vadd.f32 %v2350_v48, %v2204_v22  ;;  %v2209_v30 = vadd.f32 %v2190_v17, %v2029_v41 }
 0x4d5   : > { %v2354_v50 = vpop.f32.mrf.mxu1 }
 0x4d6   : > { %v2388_v21 = vmax.f32 %v2372_v3, %v2380_v60  ;;  %v2381_v25 = vadd.f32 %v2354_v50, %v2205_v1  ;;  %v2419_v42 = vadd.f32 %v2402_v52, %v2387_v0  ;;  %v2412_v3 = vpop.permute.xlu1 %2411 }
 0x4d7   : > { %v2356_v13 = vpop.f32.mrf.mxu1 }
 0x4d8   : > { %v2389_v26 = vmax.f32 %v2373_v2, %v2381_v25  ;;  %v2382_v10 = vadd.f32 %v2356_v13, %v2206_v20  ;;  %v4014_v54 = vadd.f32 %v2402_v52, %v2388_v21 }
 0x4d9   : > { %v2360_v19 = vpop.f32.mrf.mxu1 }
 0x4da   : > { %v2390_v61 = vmax.f32 %v2374_v44, %v2382_v10  ;;  %v2383_v47 = vadd.f32 %v2360_v19, %v2207_v9  ;;  %v2428_v22 = vsel %vm2427_vm7, %v4014_v54, 0.0  ;;  %v2421_v43 = vadd.f32 %v2407_v33, %v2389_v26 }
 0x4db   : > { %v2362_v31 = vpop.f32.mrf.mxu1  ;;  %v2429_v51 = vadd.f32 %v2428_v22, %v2419_v42 }
 0x4dc   : > { %v2391_v29 = vmax.f32 %v2375_v16, %v2383_v47  ;;  %v2384_v34 = vadd.f32 %v2362_v31, %v2208_v59  ;;  %v2422_v5 = vadd.f32 %v2407_v33, %v2390_v61 }
 0x4dd   : > { %v2366_v15 = vpop.f32.mrf.mxu1  ;;  %2430 = vadd.xlane.f32.xlu1 %v2429_v51 }
 0x4de   : > { %v2392_v48 = vmax.f32 %v2376_v23, %v2384_v34  ;;  %v2385_v1 = vadd.f32 %v2366_v15, %v2209_v30  ;;  %v2432_v49 = vsel %vm2427_vm7, %v2422_v5, 0.0  ;;  %v2423_v62 = vadd.f32 %v2412_v3, %v2391_v29 }
 0x4df   : > { %v2368_v0 = vpop.f32.mrf.mxu1  ;;  %v2433_v60 = vadd.f32 %v2432_v49, %v2421_v43 }
 0x4e0   : > { %v2393_v18 = vmax.f32 %v2377_v14, %v2385_v1  ;;  %v2386_v53 = vadd.f32 %v2368_v0, %v2210_v40  ;;  %v2424_v6 = vadd.f32 %v2412_v3, %v2392_v48 }
 0x4e1   : > { %2434 = vadd.xlane.f32.xlu0 %v2433_v60 }
 0x4e2   : > { %v2394_v38 = vmax.f32 %v2378_v8, %v2386_v53  ;;  %v2436_v58 = vsel %vm2427_vm7, %v2424_v6, 0.0  ;;  %v2425_v50 = vadd.f32 %v2417_v11, %v2393_v18  ;;  %v2507_v53 = vld [vmem:[#allocation9] sm:$0xff] }
 0x4e3   : > { %v2437_v12 = vadd.f32 %v2436_v58, %v2423_v62 }
 0x4e4   : > { %v2426_v56 = vadd.f32 %v2417_v11, %v2394_v38  ;;  %v2510_v38 = vld [vmem:[#allocation9 + $0x18] sm:$0xff]  ;;  %v2511_v11 = vld [vmem:[#allocation9 + $0x20] sm:$0xff] }
 0x4e5   : > { %2438 = vadd.xlane.f32.xlu0 %v2437_v12  ;;  %v2512_v12 = vld [vmem:[#allocation9 + $0x28] sm:$0xff] }
 0x4e6   : > { %v2440_v20 = vsel %vm2427_vm7, %v2426_v56, 0.0 }
 0x4e7   : > { %v2441_v17 = vadd.f32 %v2440_v20, %v2425_v50  ;;  %v2523_v20 = vld [vmem:[#allocation10] sm:$0xff] }
 0x4e9   : > { %2442 = vadd.xlane.f32.xlu1 %v2441_v17  ;;  %v2524_v17 = vld [vmem:[#allocation10 + $0x8] sm:$0xff] }
 0x566   : > { %v2431_v21 = vpop.xlane.xlu1 %2430 }
 0x56a   : > { %v2435_v2 = vpop.xlane.xlu0 %2434 }
 0x56b   : > { %v2444_v25 = vadd.f32 %v2435_v2, %v2431_v21 }
 0x56e   : > { %v2439_v35 = vpop.xlane.xlu0 %2438 }
 0x56f   : > { %v2445_v52 = vadd.f32 %v2444_v25, %v2439_v35 }
 0x572   : > { %v2443_v45 = vpop.xlane.xlu1 %2442 }
 0x573   : > { %v2446_v4 = vadd.f32 %v2445_v52, %v2443_v45  ;;  %v2525_v52 = vld [vmem:[#allocation10 + $0x10] sm:$0xff]  ;;  %v2526_v45 = vld [vmem:[#allocation10 + $0x18] sm:$0xff] }
 0x575   : > { %v2447_v7 = vrot.slane %v2446_v4, 4 }
 0x577   : > { %v2448_v32 = vadd.f32 %v2447_v7, %v2446_v4  ;;  %v2527_v4 = vld [vmem:[#allocation10 + $0x20] sm:$0xff] }
 0x579   : > { %v2449_v9 = vrot.slane %v2448_v32, 2 }
 0x57b   : > { %v2450_v39 = vadd.f32 %v2449_v9, %v2448_v32 }
 0x57d   : > { %v2451_v41 = vrot.slane %v2450_v39, 1 }
 0x57f   : > { %v2452_v13 = vadd.f32 %v2451_v41, %v2450_v39  ;;  %v2528_v41 = vld [vmem:[#allocation10 + $0x28] sm:$0xff] }
 0x581   : > { %v2454_v44 = vmul.f32 0.00024224806, %v2452_v13  ;;  %v2529_v13 = vld [vmem:[#allocation10 + $0x30] sm:$0xff] }
 0x583   : > { %v2457_v26 = vsub.f32 %v2421_v43, %v2454_v44  ;;  %v2458_v10 = vsub.f32 %v2422_v5, %v2454_v44  ;;  %v2455_v57 = vsub.f32 %v2419_v42, %v2454_v44  ;;  %v2456_v46 = vsub.f32 %v4014_v54, %v2454_v44 }
 0x584   : > { %v2461_v59 = vsub.f32 %v2425_v50, %v2454_v44  ;;  %v2462_v63 = vsub.f32 %v2426_v56, %v2454_v44  ;;  %v2459_v36 = vsub.f32 %v2423_v62, %v2454_v44  ;;  %v2460_v19 = vsub.f32 %v2424_v6, %v2454_v44  ;;  %v2508_v6 = vld [vmem:[#allocation9 + $0x8] sm:$0xff]  ;;  %v2509_v62 = vld [vmem:[#allocation9 + $0x10] sm:$0xff]  ;;  %v2514_v50 = vld [vmem:[#allocation9 + $0x38] sm:$0xff] }
 0x585   : > { %v2465_v27 = vmul.f32 %v2457_v26, %v2457_v26  ;;  %v2466_v16 = vmul.f32 %v2458_v10, %v2458_v10  ;;  %v2463_v61 = vmul.f32 %v2455_v57, %v2455_v57  ;;  %v2464_v47 = vmul.f32 %v2456_v46, %v2456_v46  ;;  %v2513_v56 = vld [vmem:[#allocation9 + $0x30] sm:$0xff]  ;;  %v2530_v44 = vld [vmem:[#allocation10 + $0x38] sm:$0xff] }
 0x586   : > { %v2470_v22 = vmul.f32 %v2462_v63, %v2462_v63  ;;  %v2468_v33 = vmul.f32 %v2460_v19, %v2460_v19  ;;  %v2469_v51 = vmul.f32 %v2461_v59, %v2461_v59  ;;  %v2467_v42 = vmul.f32 %v2459_v36, %v2459_v36 }
 0x587   : > { %v2475_v24 = vsel %vm2427_vm7, %v2466_v16, 0.0  ;;  %v2471_v28 = vsel %vm2427_vm7, %v2464_v47, 0.0 }
 0x588   : > { %v2476_v30 = vadd.f32 %v2475_v24, %v2465_v27  ;;  %v2472_v31 = vadd.f32 %v2471_v28, %v2463_v61  ;;  %v2483_v54 = vsel %vm2427_vm7, %v2470_v22, 0.0  ;;  %v2479_v23 = vsel %vm2427_vm7, %v2468_v33, 0.0 }
 0x589   : > { %v2484_v29 = vadd.f32 %v2483_v54, %v2469_v51  ;;  %v2480_v34 = vadd.f32 %v2479_v23, %v2467_v42 }
 0x58a   : > { %2477 = vadd.xlane.f32.xlu1 %v2476_v30  ;;  %2473 = vadd.xlane.f32.xlu0 %v2472_v31 }
 0x58e   : > { %2485 = vadd.xlane.f32.xlu1 %v2484_v29  ;;  %2481 = vadd.xlane.f32.xlu0 %v2480_v34 }
 0x613   : > { %v2478_v5 = vpop.xlane.xlu1 %2477  ;;  %v2474_v37 = vpop.xlane.xlu0 %2473 }
 0x614   : > { %v2487_v55 = vadd.f32 %v2478_v5, %v2474_v37 }
 0x617   : > { %v2482_v40 = vpop.xlane.xlu0 %2481  ;;  %v2486_v43 = vpop.xlane.xlu1 %2485 }
 0x618   : > { %v2488_v15 = vadd.f32 %v2487_v55, %v2482_v40 }
 0x61a   : > { %v2489_v14 = vadd.f32 %v2488_v15, %v2486_v43 }
 0x61c   : > { %v2490_v48 = vrot.slane %v2489_v14, 4 }
 0x61e   : > { %v2491_v1 = vadd.f32 %v2490_v48, %v2489_v14 }
 0x620   : > { %v2492_v49 = vrot.slane %v2491_v1, 2 }
 0x622   : > { %v2493_v3 = vadd.f32 %v2492_v49, %v2491_v1 }
 0x624   : > { %v2494_v0 = vrot.slane %v2493_v3, 1 }
 0x626   : > { %v2495_v60 = vadd.f32 %v2494_v0, %v2493_v3 }
 0x628   : > { %v2496_v8 = vmul.f32 0.00024224806, %v2495_v60 }
 0x62a   : > { %v2497_v18 = vadd.f32 1e-05, %v2496_v8 }
 0x62c   : > { %2887 = vrsqrt.f32 %v2497_v18 }
 0x639   : > { %v2888_v58 = vpop.eup %2887 }
 0x63a   : > { %v2499_v2 = vmul.f32 %v2888_v58, %v2455_v57  ;;  %v2500_v21 = vmul.f32 %v2888_v58, %v2456_v46  ;;  %v2501_v35 = vmul.f32 %v2888_v58, %v2457_v26  ;;  %v2502_v25 = vmul.f32 %v2888_v58, %v2458_v10 }
 0x63b   : > { %v2503_v7 = vmul.f32 %v2888_v58, %v2459_v36  ;;  %v2504_v32 = vmul.f32 %v2888_v58, %v2460_v19  ;;  %v2505_v9 = vmul.f32 %v2888_v58, %v2461_v59  ;;  %v2506_v39 = vmul.f32 %v2888_v58, %v2462_v63 }
 0x63c   : > { %v2515_v27 = vmul.f32 %v2507_v53, %v2499_v2  ;;  %v2516_v16 = vmul.f32 %v2508_v6, %v2500_v21  ;;  %v2517_v61 = vmul.f32 %v2509_v62, %v2501_v35  ;;  %v2518_v47 = vmul.f32 %v2510_v38, %v2502_v25 }
 0x63d   : > { %v2519_v26 = vmul.f32 %v2511_v11, %v2503_v7  ;;  %v2520_v10 = vmul.f32 %v2512_v12, %v2504_v32  ;;  %v2521_v57 = vmul.f32 %v2513_v56, %v2505_v9  ;;  %v2522_v46 = vmul.f32 %v2514_v50, %v2506_v39 }
 0x63e   : > { %v2531_v36 = vadd.f32 %v2523_v20, %v2515_v27  ;;  %v2532_v19 = vadd.f32 %v2524_v17, %v2516_v16  ;;  %v2533_v59 = vadd.f32 %v2525_v52, %v2517_v61  ;;  %v2534_v63 = vadd.f32 %v2526_v45, %v2518_v47 }
 0x63f   : > { %v2535_v22 = vadd.f32 %v2527_v4, %v2519_v26  ;;  %v2536_v33 = vadd.f32 %v2528_v41, %v2520_v10  ;;  %v2537_v24 = vadd.f32 %v2529_v13, %v2521_v57  ;;  %v2538_v28 = vadd.f32 %v2530_v44, %v2522_v46 }
 0x640   : > { %2539 = vst [vmem:[%s555_s26] sm:$0xff] %v2531_v36  ;;  %2540 = vst.msk [vmem:[%s555_s26 + $0x8] sm:$0xff] %vm2427_vm7, %v2532_v19 }
 0x641   : > { %2541 = vst [vmem:[%s555_s26 + $0x10] sm:$0xff] %v2533_v59  ;;  %2542 = vst.msk [vmem:[%s555_s26 + $0x18] sm:$0xff] %vm2427_vm7, %v2534_v63 }
 0x642   : > { %2543 = vst [vmem:[%s555_s26 + $0x20] sm:$0xff] %v2535_v22  ;;  %2544 = vst.msk [vmem:[%s555_s26 + $0x28] sm:$0xff] %vm2427_vm7, %v2536_v33 }
 0x643   : > { %2545 = vst [vmem:[%s555_s26 + $0x30] sm:$0xff] %v2537_v24  ;;  %2546 = vst.msk [vmem:[%s555_s26 + $0x38] sm:$0xff] %vm2427_vm7, %v2538_v28 }
 0x644 PF: > { %s28_s29 = sadd.s32 1, %s3067_s29  }
 0x645   : > { %p25_p2 = scmp.ge.s32.totalorder %s28_s29, 4  }
 0x647   :  { %27 = sbr.rel (!%p25_p2) target bundleno = 4 (0x4), region = 136 }
 0x64c   :  { %2568 = vsyncpa [#allocation3], 1 }
 0x64d   :  { %2570 = vsyncpa [#allocation3 + $0x1], 1 }
 0x64e   :  { %2571 = vsyncpa [#allocation5], 1 }
 0x64f   :  { %2572 = vsyncpa [#allocation8], 1 }
 0x650   :  { %2573 = vsyncpa [#allocation11], 1 }

// kernel: audio_backbone_forward.3
= control target key start
LH: loop header
LB: loop body
LE: loop exit
PB: predicated region body
PF: predicated region fallthrough
CT: control target
= control target key end

     0   :  { %s7815_s0 = inlined_call_operand.vmem [shape: f32[2,4128], index: 0, kind: input, shape index: {}]   ;;  %s7816_s1 = inlined_call_operand.hbm [shape: bf16[4128,1024], index: 1, kind: input, shape index: {}]   ;;  %s7817_s2 = inlined_call_operand.hbm [shape: f32[1,1024], index: 2, kind: input, shape index: {}]   ;;  %s7818_s3 = inlined_call_operand.hbm [shape: bf16[1024,512], index: 3, kind: input, shape index: {}]   ;;  %s7819_s4 = inlined_call_operand.hbm [shape: f32[1,512], index: 4, kind: input, shape index: {}]   ;;  %s7820_s5 = inlined_call_operand.hbm [shape: f32[2,512], index: 5, kind: output, shape index: {}]  }
   0x1   :  { %7824 = sst [smem:[#allocation15_spill]] %s7816_s1 }
   0x2   :  { %10 = vsyncpa [#allocation3], 0 }
   0x3   :  { %12 = vsyncpa [#allocation3 + $0x1], 0 }
   0x4   :  { %13 = vsyncpa [#allocation6], 0 }
   0x5   :  { %15 = vsyncpa [#allocation6 + $0x1], 0 }
   0x6   :  { %16 = vsyncpa [#allocation9], 0 }
   0x7   :  { %17 = vsyncpa [#allocation4], 0  ;;  %s6854_s18 = smov 0   ;;  %s6856_s19 = smov 0  }
   0x8   :  { %s6858_s20 = smov 0   ;;  %s6860_s21 = smov 0  }
   0x9 LB: > { %s6875_s22 = sadd.s32 1, %s6809_s21   ;;  %s51_s23 = sadd.s32 1, %s6805_s20  ;;  %s6809_s21 = sphi %s6860_s21, %s7838_s21   ;;  %s6805_s20 = sphi %s6858_s20, %s7837_s20   ;;  %s6801_s19 = sphi %s6856_s19, %s7836_s19   ;;  %s6797_s18 = sphi %s6854_s18, %s7835_s18  }
   0xa   : > { %s48_s24 = ssub.s32 %s6809_s21, %s6875_s22  ;;  %p58_p0 = scmp.ne.s32.totalorder %s6805_s20, %s6801_s19 }
   0xb   : > { %p49_p1 = scmp.eq.s32.totalorder %s48_s24, 0  ;;  %p59_p2 = scmp.eq.s32.totalorder %s6809_s21, 0 }
   0xc   : > { %p5697_p3 = scmp.lt.s32.totalorder %s6809_s21, 4  ;;  %s6888_s26 = sand.u32 1, %s6805_s20  }
   0xd   : > { %s6885_s25 = scalar_select %p49_p1, %s6805_s20, %s51_s23  }
   0xe   : > { %p60_p4 = por %p59_p2, %p58_p0  ;;  %s5666_s27 = smul.u32 4128, %s6888_s26 }
   0xf   : > { %s217_s28 = sand.u32 1, %s6809_s21   ;;  %s5064_s30 = sshll.u32 %s6888_s26, 1 }
  0x10   : > { %p6892_p5 = pnand %p5697_p3, %p60_p4  ;;  %s5663_s6 = sshll.u32 %s6809_s21, 5 }
  0x11   : > { %s6901_s9 = scalar_lea.hbm %s7817_s2, %s5663_s6  ;;  %s221_s10 = scalar_lea.vmem [#allocation5], %s5064_s30 }
  0x12   : > { %s229_s11 = sshll.u32 %s221_s10, 4  ;;  %s5067_s12 = sshll.u32 %s6888_s26, 9  ;;  %s230_s11 = int_to_ptr.vmem [resolvable:$true] %s229_s11 }
  0x13   : > { %s6904_s13 = scalar_lea.sflag [#allocation6], %s217_s28  ;;  %s6629_s14 = scalar_lea.hbm %s6901_s9, 32 }
  0x14   : > { %p6630_p6 = scmp.ne.s32.totalorder %s6901_s9, %s6629_s14  ;;  %p6910_p7 = pneg %p6892_p5 }
  0x15   : > { %s6634_s23 = scalar_lea.hbm %s7817_s2, 128  ;;  %p6635_p10 = scmp.lt.s32.totalorder %s6901_s9, %s7817_s2 }
  0x16   : > { %p6632_p8 = pnand %p6910_p7, %p6630_p6  ;;  %p6636_p11 = scmp.lt.s32.totalorder %s6634_s23, %s6629_s14 }
  0x18   : > { %p6633_p9 = pneg %p6632_p8  ;;  %p6637_p12 = por %p6636_p11, %p6635_p10 }
  0x1a   : > { %p6638_p13 = pnand %p6637_p12, %p6633_p9 }
  0x1c   : > { %6641 = shalt.err (!%p6638_p13)
}
  0x1d   : > { %s6642_s28 = scalar_lea.vmem %s230_s11, 32  ;;  %s6811_s6 = smov [#allocation5]  }
  0x1e   : > { %p6643_p0 = scmp.ne.s32.totalorder %s230_s11, %s6642_s28  ;;  %s6647_s7 = sshll.u32 %s6811_s6, 4  ;;  %s6648_s7 = int_to_ptr.vmem [resolvable:$false] %s6647_s7 }
  0x1f   : > { %s6649_s8 = scalar_lea.vmem %s6648_s7, 64  ;;  %p6650_p3 = scmp.lt.s32.totalorder %s230_s11, %s6648_s7 }
  0x20   : > { %p6645_p1 = pnand %p6643_p0, %p6910_p7  ;;  %p6651_p4 = scmp.lt.s32.totalorder %s6649_s8, %s6642_s28 }
  0x22   : > { %p6646_p2 = pneg %p6645_p1  ;;  %p6652_p6 = por %p6651_p4, %p6650_p3 }
  0x24   : > { %p6653_p8 = pnand %p6652_p6, %p6646_p2 }
  0x26   : > { %6656 = shalt.err (!%p6653_p8)
}
  0x27   : > { %5692 = dma.hbm_to_vmem [thread:$0]  (!%p6892_p5), %s6901_s9, 32, %s230_s11, %s6904_s13  }
  0x28   : > { %s6930_s10 = sadd.s32 4294967295, %s6809_s21   ;;  %p64_p10 = scmp.ne.s32.totalorder %s6801_s19, %s6797_s18 }
  0x29   : > { %p7822_p9 = scmp.eq.s32.totalorder %s6930_s10, 0  ;;  %p5059_p11 = scmp.ge.s32.totalorder %s6809_s21, 1 }
  0x2a   : > { %p169_p12 = scmp.lt.s32.totalorder %s6809_s21, 5  ;;  %s6812_s9 = smov [#allocation8]  }
  0x2b   : > { %p6940_p0 = por %p7822_p9, %p64_p10  ;;  %s185_s11 = sshll.u32 %s6812_s9, 4  ;;  %s186_s11 = int_to_ptr.vmem [resolvable:$true] %s185_s11 }
  0x2c   : > { %p6944_p1 = pnand %p5059_p11, %p169_p12  ;;  %s5662_s17 = sshll.u32 %s6809_s21, 7 }
  0x2d   : > { %s7827_s14 = scalar_select %p6940_p0, 1, 0 }
  0x2e   : > { %s7828_s16 = scalar_select %p6944_p1, 1, 0 }
  0x2f   : > { %p5682_p2 = pneg %p6944_p1  ;;  %s200_s18 = scalar_lea.vmem [#allocation2], %s5666_s27 }
  0x30   : > { %s207_s23 = sshll.u32 %s200_s18, 4  ;;  %s7829_s1 = sld [smem:[#allocation15_spill]]  ;;  %s6960_s23 = int_to_ptr.vmem [resolvable:$true] %s207_s23 }
  0x31   : > { %p5683_p3 = pnand %p5682_p2, %p7822_p9  ;;  %s6668_s6 = scalar_lea.vmem %s186_s11, 64 }
  0x32   : > { %p6669_p6 = scmp.ne.s32.totalorder %s186_s11, %s6668_s6  ;;  %p6676_p11 = scmp.lt.s32.totalorder %s186_s11, %s186_s11 }
  0x33   : > { %p6659_p4 = pneg %p5683_p3  ;;  %p6677_p12 = scmp.lt.s32.totalorder %s6668_s6, %s6668_s6 }
  0x35   : > { %p6671_p8 = pnand %p6669_p6, %p6659_p4  ;;  %p6678_p13 = por %p6677_p12, %p6676_p11 }
  0x36   : > { %s6958_s28 = scalar_lea.hbm %s7829_s1, %s5662_s17 }
  0x37   : > { %p6672_p10 = pneg %p6671_p8 }
  0x39   : > { %p6679_p0 = pnand %p6678_p13, %p6672_p10 }
  0x3b   : > { %6682 = shalt.err (!%p6679_p0)
}
  0x3c   : > { %5685 = dma.hbm_to_vmem [thread:$0]  (!%p5683_p3), %s7819_s4, 64, %s186_s11, [#allocation9]  }
  0x3d   : > { %s197_s8 = scalar_lea.sflag [#allocation3], %s6888_s26  ;;  %s6683_s9 = scalar_lea.hbm %s6958_s28, 66048 }
  0x3e   : > { %p6684_p2 = scmp.ne.s32.totalorder %s6958_s28, %s6683_s9  ;;  %s6688_s24 = scalar_lea.hbm %s7829_s1, 264192 }
  0x3f   : > { %p6689_p13 = scmp.lt.s32.totalorder %s6958_s28, %s7829_s1  ;;  %p6690_p0 = scmp.lt.s32.totalorder %s6688_s24, %s6683_s9 }
  0x40   : > { %p6686_p4 = pnand %p6684_p2, %p6910_p7 }
  0x41   : > { %p6691_p8 = por %p6690_p0, %p6689_p13 }
  0x42   : > { %p6687_p6 = pneg %p6686_p4 }
  0x44   : > { %p6692_p10 = pnand %p6691_p8, %p6687_p6 }
  0x46   : > { %6695 = shalt.err (!%p6692_p10)
}
  0x47   : > { %s6696_s11 = scalar_lea.vmem %s6960_s23, 66048  ;;  %s6813_s27 = smov [#allocation2]  }
  0x48   : > { %p6697_p3 = scmp.ne.s32.totalorder %s6960_s23, %s6696_s11  ;;  %s6701_s7 = sshll.u32 %s6813_s27, 4  ;;  %s6702_s7 = int_to_ptr.vmem [resolvable:$false] %s6701_s7 }
  0x49   : > { %s6703_s17 = scalar_lea.vmem %s6702_s7, 132096  ;;  %p6704_p2 = scmp.lt.s32.totalorder %s6960_s23, %s6702_s7 }
  0x4a   : > { %p6699_p11 = pnand %p6697_p3, %p6910_p7  ;;  %p6705_p4 = scmp.lt.s32.totalorder %s6703_s17, %s6696_s11 }
  0x4c   : > { %p6700_p12 = pneg %p6699_p11  ;;  %p6706_p9 = por %p6705_p4, %p6704_p2 }
  0x4e   : > { %p6707_p1 = pnand %p6706_p9, %p6700_p12 }
  0x50   : > { %6710 = shalt.err (!%p6707_p1)
}
  0x51   : > { %s6814_s9 = smov 512   ;;  %s6815_s18 = smov 128  }
  0x52   : > { %s6816_s24 = smov 8   ;;  %s5665_s30 = sshll.u32 %s6809_s21, 13 }
  0x53   : > { %5689 = dma.hbm_to_vmem [thread:$0]  (!%p6892_p5), %s6958_s28, 66048, %s6960_s23, %s197_s8, %s6814_s9, %s6815_s18, %s6816_s24  }
  0x54   : > { %s240_s6 = scalar_lea.vmem [#allocation7], %s5067_s12  ;;  %s6994_s17 = scalar_lea.hbm %s7818_s3, %s5665_s30 }
  0x55   : > { %s248_s11 = sshll.u32 %s240_s6, 4  ;;  %s6711_s1 = scalar_lea.hbm %s6994_s17, 8192  ;;  %s6996_s11 = int_to_ptr.vmem [resolvable:$true] %s248_s11 }
  0x56   : > { %p6712_p9 = scmp.ne.s32.totalorder %s6994_s17, %s6711_s1  ;;  %s6716_s26 = scalar_lea.hbm %s7818_s3, 32768 }
  0x57   : > { %p6717_p13 = scmp.lt.s32.totalorder %s6994_s17, %s7818_s3  ;;  %p6718_p0 = scmp.lt.s32.totalorder %s6716_s26, %s6711_s1 }
  0x58   : > { %p6714_p1 = pnand %p6712_p9, %p6910_p7 }
  0x59   : > { %p6719_p8 = por %p6718_p0, %p6717_p13 }
  0x5a   : > { %p6715_p6 = pneg %p6714_p1 }
  0x5c   : > { %p6720_p10 = pnand %p6719_p8, %p6715_p6 }
  0x5e   : > { %6723 = shalt.err (!%p6720_p10)
}
  0x5f   : > { %s6724_s8 = scalar_lea.vmem %s6996_s11, 8192  ;;  %s6817_s9 = smov [#allocation7]  }
  0x60   : > { %p6725_p3 = scmp.ne.s32.totalorder %s6996_s11, %s6724_s8  ;;  %s6729_s18 = sshll.u32 %s6817_s9, 4  ;;  %s6730_s18 = int_to_ptr.vmem [resolvable:$false] %s6729_s18 }
  0x61   : > { %s6731_s24 = scalar_lea.vmem %s6730_s18, 16384  ;;  %p6732_p2 = scmp.lt.s32.totalorder %s6996_s11, %s6730_s18 }
  0x62   : > { %p6727_p11 = pnand %p6725_p3, %p6910_p7  ;;  %p6733_p4 = scmp.lt.s32.totalorder %s6731_s24, %s6724_s8 }
  0x64   : > { %p6728_p12 = pneg %p6727_p11  ;;  %p6734_p9 = por %p6733_p4, %p6732_p2 }
  0x66   : > { %p6735_p1 = pnand %p6734_p9, %p6728_p12 }
  0x68   : > { %6738 = shalt.err (!%p6735_p1)
}
  0x69   : > { %s6818_s1 = smov 256   ;;  %s6819_s30 = smov 16  }
  0x6a   : > { %5695 = dma.hbm_to_vmem [thread:$0]  (!%p6892_p5), %s6994_s17, 8192, %s6996_s11, %s6904_s13, %s6818_s1, %s6818_s1, %s6819_s30  }
  0x6b   : > { %p7830_p7 = scmp.ne.s32.totalorder %s7828_s16, 0 }
  0x6c   : > { %s262_s15 = sand.u32 (!%p7830_p7), 1, %s6801_s19   ;;  %p7831_p6 = scmp.ne.s32.totalorder (!%p7830_p7), %s7827_s14, 0 }
  0x6d   : > { %260 = sbr.rel (%p7830_p7) target bundleno = 1123 (0x463), region = 40  ;;  %s263_s27 = scalar_lea.sflag (!%p7830_p7), [#allocation3], %s262_s15 }
  0x6e   : > { %s5667_s6 = smul.u32 (!%p7830_p7), 4128, %s262_s15 }
  0x70   : > { %s7022_s7 = scalar_lea.vmem (!%p7830_p7), [#allocation2], %s5667_s6 }
  0x72   : > { %6780 = dma.done.wait (%p7831_p6), %s263_s27, 66048  }
  0x73   : > { %6782 = vsyncadd (%p7831_p6), %s263_s27, 4294901248  ;;  %s271_s23 = sand.u32 1, %s6930_s10   ;;  %s5072_s29 = sshll.u32 %s262_s15, 1 }
  0x74   : > { %s272_s13 = scalar_lea.sflag [#allocation6], %s271_s23  ;;  %s7029_s11 = scalar_lea.vmem [#allocation5], %s5072_s29 }
  0x75   : > { %6784 = dma.done.wait (%p7831_p6), %s272_s13, 8224  }
  0x76   : > { %6786 = vsyncadd (%p7831_p6), %s272_s13, 4294959072  ;;  %s5073_s16 = sshll.u32 %s262_s15, 9  ;;  %p7832_p5 = scmp.eq.s32.totalorder %s6930_s10, 0 }
  0x77   : > { %s7035_s17 = scalar_lea.vmem [#allocation7], %s5073_s16 }
  0x78   : > { %6788 = dma.done.wait (%p7832_p5), [#allocation9], 64   ;;  %p7833_p13 = pmov %p7832_p5 }
  0x79   : > { %p7834_p0 = scmp.ne.s32.totalorder %s6930_s10, 0 }
  0x7a   : > { %6790 = vsyncadd (%p7833_p13), [#allocation9], 4294967232 }
  0x7b   : > { %327 = sbr.rel (%p7834_p0) target bundleno = 143 (0x8f), region = 60 }
  0x80   : > { %v330_v0 = vlaneseq  ;;  %v6820_v1 = vmov 1983009808   ;;  %v328_v4 = vld [vmem:[#allocation8] sm:$0xf] }
  0x81   : > { %v349_v2 = vunpack.c.l.s4 %v6820_v1 }
  0x82   : > { %v331_v3 = vshrl.u32 %v330_v0, 7 }
  0x83   : > { %v350_v5 = vunpack.c.0.s8 %v349_v2 }
  0x84   : > { %v332_v6 = vsub.s32 0, %v331_v3  ;;  %v336_v7 = vsub.s32 1, %v331_v3  ;;  %v340_v8 = vsub.s32 2, %v331_v3  ;;  %v344_v9 = vsub.s32 3, %v331_v3 }
  0x85   : > { %v353_v10 = vsub.s32 %v350_v5, %v331_v3 }
  0x86   : > { %v333_v11 = vrot.slane %v328_v4, %v332_v6  ;;  %v337_v12 = vrot.slane %v328_v4, %v336_v7  ;;  %v341_v13 = vrot.slane %v328_v4, %v340_v8  ;;  %v345_v14 = vrot.slane %v328_v4, %v344_v9 }
  0x88   : > { %v346_v15 = vcombine.low %v333_v11, %v337_v12  ;;  %v347_v16 = vcombine.low %v341_v13, %v345_v14 }
  0x8a   : > { %v354_v17 = vrot.slane %v346_v15, %v353_v10  ;;  %v361_v18 = vrot.slane %v347_v16, %v353_v10 }
  0x8c   : > { %v362_v19 = vcombine.low %v354_v17, %v361_v18 }
  0x8e   : > { %364 = vst [vmem:[#allocation10] sm:$0xff] %v362_v19 }
  0x8f PF: > { %v5743_v20 = vld [vmem:[%s7022_s7 + $0x74] ss:$8 sps:$4 sm:$0xff]   ;;  %v5745_v21 = vld [vmem:[%s7022_s7 + $0x70] ss:$8 sps:$4 sm:$0xff]   ;;  %v5749_v24 = vld [vmem:[%s7022_s7 + $0x64] ss:$8 sps:$4 sm:$0xff]   ;;  %v387_v57 = vlaneseq }
  0x90   : > { %3704 = vmatprep.subr.bf16.mxu0 %v5743_v20  ;;  %v5746_v22 = vld [vmem:[%s7022_s7 + $0x174] ss:$8 sps:$4 sm:$0xff]   ;;  %v5748_v23 = vld [vmem:[%s7022_s7 + $0x170] ss:$8 sps:$4 sm:$0xff]   ;;  %v5751_v25 = vld [vmem:[%s7022_s7 + $0x60] ss:$8 sps:$4 sm:$0xff]  }
  0x91   : > { %3705 = vmatpush1.bf16.msra.mxu0 %v5745_v21  ;;  %3745 = vmatprep.subr.bf16.mxu1 %v5746_v22  ;;  %v5752_v26 = vld [vmem:[%s7022_s7 + $0x164] ss:$8 sps:$4 sm:$0xff]   ;;  %v5754_v27 = vld [vmem:[%s7022_s7 + $0x160] ss:$8 sps:$4 sm:$0xff]   ;;  %v5755_v28 = vld [vmem:[%s7022_s7 + $0x54] ss:$8 sps:$4 sm:$0xff]  }
  0x92   : > { %3746 = vmatpush1.bf16.msra.mxu1 %v5748_v23  ;;  %3706 = vmatprep.subr.bf16.mxu0 %v5749_v24  ;;  %v5757_v29 = vld [vmem:[%s7022_s7 + $0x50] ss:$8 sps:$4 sm:$0xff]   ;;  %v5758_v30 = vld [vmem:[%s7022_s7 + $0x154] ss:$8 sps:$4 sm:$0xff]   ;;  %v5761_v31 = vld [vmem:[%s7022_s7 + $0x44] ss:$8 sps:$4 sm:$0xff]  }
  0x93   : > { %3747 = vmatprep.subr.bf16.mxu1 %v5752_v26  ;;  %v5760_v32 = vld [vmem:[%s7022_s7 + $0x150] ss:$8 sps:$4 sm:$0xff]   ;;  %v5764_v33 = vld [vmem:[%s7022_s7 + $0x144] ss:$8 sps:$4 sm:$0xff]   ;;  %v5763_v34 = vld [vmem:[%s7022_s7 + $0x40] ss:$8 sps:$4 sm:$0xff]  }
  0x94   : > { %v5767_v35 = vld [vmem:[%s7022_s7 + $0x34] ss:$8 sps:$4 sm:$0xff]   ;;  %v5766_v36 = vld [vmem:[%s7022_s7 + $0x140] ss:$8 sps:$4 sm:$0xff]   ;;  %v5769_v38 = vld [vmem:[%s7022_s7 + $0x30] ss:$8 sps:$4 sm:$0xff]  }
  0x95   : > { %3707 = vmatpush1.bf16.msra.mxu0 %v5751_v25  ;;  %v5770_v37 = vld [vmem:[%s7022_s7 + $0x134] ss:$8 sps:$4 sm:$0xff]   ;;  %v5773_v39 = vld [vmem:[%s7022_s7 + $0x24] ss:$8 sps:$4 sm:$0xff]   ;;  %v5772_v40 = vld [vmem:[%s7022_s7 + $0x130] ss:$8 sps:$4 sm:$0xff]  }
  0x96   : > { %3708 = vmatprep.subr.bf16.mxu0 %v5755_v28  ;;  %3748 = vmatpush1.bf16.msra.mxu1 %v5754_v27  ;;  %v5776_v41 = vld [vmem:[%s7022_s7 + $0x124] ss:$8 sps:$4 sm:$0xff]   ;;  %v5775_v42 = vld [vmem:[%s7022_s7 + $0x20] ss:$8 sps:$4 sm:$0xff]   ;;  %v5779_v43 = vld [vmem:[%s7022_s7 + $0x14] ss:$8 sps:$4 sm:$0xff]  }
  0x97   : > { %3749 = vmatprep.subr.bf16.mxu1 %v5758_v30  ;;  %v5778_v44 = vld [vmem:[%s7022_s7 + $0x120] ss:$8 sps:$4 sm:$0xff]   ;;  %v5782_v45 = vld [vmem:[%s7022_s7 + $0x114] ss:$8 sps:$4 sm:$0xff]   ;;  %v5781_v46 = vld [vmem:[%s7022_s7 + $0x10] ss:$8 sps:$4 sm:$0xff]  }
  0x98   : > { %v5785_v47 = vld [vmem:[%s7022_s7 + $0x4] ss:$8 sps:$4 sm:$0xff]   ;;  %v5784_v48 = vld [vmem:[%s7022_s7 + $0x110] ss:$8 sps:$4 sm:$0xff]   ;;  %v5787_v50 = vld [vmem:[%s7022_s7] ss:$8 sps:$4 sm:$0xff]  }
  0x99   : > { %3709 = vmatpush1.bf16.msra.mxu0 %v5757_v29  ;;  %v5788_v49 = vld [vmem:[%s7022_s7 + $0x104] ss:$8 sps:$4 sm:$0xff]   ;;  %v5791_v51 = vld [vmem:[%s7022_s7 + $0xf4] ss:$8 sps:$4 sm:$0xff]   ;;  %v5790_v52 = vld [vmem:[%s7022_s7 + $0x100] ss:$8 sps:$4 sm:$0xff]  }
  0x9a   : > { %3710 = vmatprep.subr.bf16.mxu0 %v5761_v31  ;;  %3750 = vmatpush1.bf16.msra.mxu1 %v5760_v32  ;;  %v5794_v53 = vld [vmem:[%s7022_s7 + $0x1f4] ss:$8 sps:$4 sm:$0xff]   ;;  %v5793_v54 = vld [vmem:[%s7022_s7 + $0xf0] ss:$8 sps:$4 sm:$0xff]   ;;  %v6821_v55 = vmov 1983009808  }
  0x9b   : > { %3751 = vmatprep.subr.bf16.mxu1 %v5764_v33  ;;  %v385_v56 = vunpack.c.l.s4 %v6821_v55  ;;  %v5797_v58 = vld [vmem:[%s7022_s7 + $0xe4] ss:$8 sps:$4 sm:$0xff]   ;;  %v5796_v59 = vld [vmem:[%s7022_s7 + $0x1f0] ss:$8 sps:$4 sm:$0xff]   ;;  %v5799_v61 = vld [vmem:[%s7022_s7 + $0xe0] ss:$8 sps:$4 sm:$0xff]  }
  0x9c   : > { %v5800_v60 = vld [vmem:[%s7022_s7 + $0x1e4] ss:$8 sps:$4 sm:$0xff]   ;;  %v7082_v63 = vshrl.u32 %v387_v57, 7  ;;  %v5803_v0 = vld [vmem:[%s7022_s7 + $0xd4] ss:$8 sps:$4 sm:$0xff]   ;;  %vm3700_vm0 = vcmask 261120  }
  0x9d   : > { %3711 = vmatpush1.bf16.msra.mxu0 %v5763_v34  ;;  %v386_v62 = vunpack.c.0.s8 %v385_v56  ;;  %v5802_v1 = vld [vmem:[%s7022_s7 + $0x1e0] ss:$8 sps:$4 sm:$0xff]   ;;  %v5806_v2 = vld [vmem:[%s7022_s7 + $0x1d4] ss:$8 sps:$4 sm:$0xff]   ;;  %v5805_v3 = vld [vmem:[%s7022_s7 + $0xd0] ss:$8 sps:$4 sm:$0xff]  }
  0x9e   : > { %3712 = vmatprep.subr.bf16.mxu0 %v5767_v35  ;;  %3752 = vmatpush1.bf16.msra.mxu1 %v5766_v36  ;;  %v5809_v5 = vld [vmem:[%s7022_s7 + $0xc4] ss:$8 sps:$4 sm:$0xff]   ;;  %v5808_v6 = vld [vmem:[%s7022_s7 + $0x1d0] ss:$8 sps:$4 sm:$0xff]   ;;  %v5811_v9 = vld [vmem:[%s7022_s7 + $0xc0] ss:$8 sps:$4 sm:$0xff]  }
  0x9f   : > { %3753 = vmatprep.subr.bf16.mxu1 %v5770_v37  ;;  %v7089_v4 = vsub.s32 %v386_v62, %v7082_v63  ;;  %v5812_v7 = vld [vmem:[%s7022_s7 + $0x1c4] ss:$8 sps:$4 sm:$0xff]   ;;  %v5815_v12 = vld [vmem:[%s7022_s7 + $0xb4] ss:$8 sps:$4 sm:$0xff]   ;;  %v5814_v13 = vld [vmem:[%s7022_s7 + $0x1c0] ss:$8 sps:$4 sm:$0xff]  }
  0xa0   : > { %v365_v8 = vld [vmem:[%s7815_s0] sm:$0xff]  ;;  %v5818_v16 = vld [vmem:[%s7022_s7 + $0x1b4] ss:$8 sps:$4 sm:$0xff]   ;;  %v5817_v17 = vld [vmem:[%s7022_s7 + $0xb0] ss:$8 sps:$4 sm:$0xff]   ;;  %p5699_p8 = scmp.eq.s32.totalorder %s6930_s10, 3 }
  0xa1   : > { %3713 = vmatpush1.bf16.msra.mxu0 %v5769_v38  ;;  %v390_v10 = vrot.slane %v365_v8, %v7089_v4  ;;  %v383_v11 = vcombine.high %v365_v8, %v365_v8  ;;  %v5821_v20 = vld [vmem:[%s7022_s7 + $0xa4] ss:$8 sps:$4 sm:$0xff]   ;;  %v5820_v21 = vld [vmem:[%s7022_s7 + $0x1b0] ss:$8 sps:$4 sm:$0xff]   ;;  %v5823_v24 = vld [vmem:[%s7022_s7 + $0xa0] ss:$8 sps:$4 sm:$0xff]  }
  0xa2   : > { %3714 = vmatprep.subr.bf16.mxu0 %v5773_v39  ;;  %3754 = vmatpush1.bf16.msra.mxu1 %v5772_v40  ;;  %v5824_v23 = vld [vmem:[%s7022_s7 + $0x1a4] ss:$8 sps:$4 sm:$0xff]   ;;  %v5827_v25 = vld [vmem:[%s7022_s7 + $0x94] ss:$8 sps:$4 sm:$0xff]   ;;  %v5826_v26 = vld [vmem:[%s7022_s7 + $0x1a0] ss:$8 sps:$4 sm:$0xff]  }
  0xa3   : > { %3755 = vmatprep.subr.bf16.mxu1 %v5776_v41  ;;  %v398_v14 = vcombine.high %v390_v10, %v390_v10  ;;  %v397_v15 = vrot.slane %v383_v11, %v7089_v4  ;;  %v5830_v27 = vld [vmem:[%s7022_s7 + $0x194] ss:$8 sps:$4 sm:$0xff]   ;;  %v5829_v28 = vld [vmem:[%s7022_s7 + $0x90] ss:$8 sps:$4 sm:$0xff]   ;;  %v5833_v29 = vld [vmem:[%s7022_s7 + $0x84] ss:$8 sps:$4 sm:$0xff]   ;;  %v559_v35 = vpack.c.bf16 %v390_v10, %v390_v10 }
  0xa4   : > { %v5832_v30 = vld [vmem:[%s7022_s7 + $0x190] ss:$8 sps:$4 sm:$0xff]   ;;  %v5836_v31 = vld [vmem:[%s7022_s7 + $0x184] ss:$8 sps:$4 sm:$0xff]   ;;  %v5835_v32 = vld [vmem:[%s7022_s7 + $0x80] ss:$8 sps:$4 sm:$0xff]  }
  0xa5   : > { %3715 = vmatpush1.bf16.msra.mxu0 %v5775_v42  ;;  %v560_v18 = vpack.c.bf16 %v398_v14, %v398_v14  ;;  %v399_v19 = vcombine.high %v397_v15, %v397_v15  ;;  %v5841_v33 = vld [vmem:[%s7022_s7 + $0x274] ss:$8 sps:$4 sm:$0xff]   ;;  %v5838_v34 = vld [vmem:[%s7022_s7 + $0x180] ss:$8 sps:$4 sm:$0xff]   ;;  %v5839_v37 = vld [vmem:[%s7022_s7 + $0x270] ss:$8 sps:$4 sm:$0xff]   ;;  %v561_v38 = vpack.c.bf16 %v397_v15, %v397_v15 }
  0xa6   : > { %3716 = vmatprep.subr.bf16.mxu0 %v5779_v43  ;;  %3756 = vmatpush1.bf16.msra.mxu1 %v5778_v44  ;;  %v5845_v36 = vld [vmem:[%s7022_s7 + $0x374] ss:$8 sps:$4 sm:$0xff]   ;;  %v5848_v39 = vld [vmem:[%s7022_s7 + $0x264] ss:$8 sps:$4 sm:$0xff]   ;;  %v5843_v40 = vld [vmem:[%s7022_s7 + $0x370] ss:$8 sps:$4 sm:$0xff]  }
  0xa7   : > { %3757 = vmatprep.subr.bf16.mxu1 %v5782_v45  ;;  %3736 = vmatprep.mubr.bf16.mxu0 %v560_v18  ;;  %v562_v22 = vpack.c.bf16 %v399_v19, %v399_v19  ;;  %v5851_v41 = vld [vmem:[%s7022_s7 + $0x364] ss:$8 sps:$4 sm:$0xff]   ;;  %v5846_v42 = vld [vmem:[%s7022_s7 + $0x260] ss:$8 sps:$4 sm:$0xff]   ;;  %v5854_v43 = vld [vmem:[%s7022_s7 + $0x254] ss:$8 sps:$4 sm:$0xff]  }
  0xa8   : > { %v5849_v44 = vld [vmem:[%s7022_s7 + $0x360] ss:$8 sps:$4 sm:$0xff]   ;;  %v5857_v45 = vld [vmem:[%s7022_s7 + $0x354] ss:$8 sps:$4 sm:$0xff]   ;;  %v5872_v55 = vld [vmem:[%s7022_s7 + $0x224] ss:$8 sps:$4 sm:$0xff]  }
  0xa9   : > { %3717 = vmatpush1.bf16.msra.mxu0 %v5781_v46  ;;  %3777 = vmatprep.mubr.bf16.mxu1 %v562_v22  ;;  %v5852_v46 = vld [vmem:[%s7022_s7 + $0x250] ss:$8 sps:$4 sm:$0xff]   ;;  %v5875_v57 = vld [vmem:[%s7022_s7 + $0x324] ss:$8 sps:$4 sm:$0xff]   ;;  %v5881_v62 = vld [vmem:[%s7022_s7 + $0x314] ss:$8 sps:$4 sm:$0xff]  }
  0xaa   : > { %3718 = vmatprep.subr.bf16.mxu0 %v5785_v47  ;;  %3758 = vmatpush1.bf16.msra.mxu1 %v5784_v48  ;;  %v5860_v47 = vld [vmem:[%s7022_s7 + $0x244] ss:$8 sps:$4 sm:$0xff]   ;;  %v5855_v48 = vld [vmem:[%s7022_s7 + $0x350] ss:$8 sps:$4 sm:$0xff]   ;;  %v5882_v11 = vld [vmem:[%s7022_s7 + $0x200] ss:$8 sps:$4 sm:$0xff]  }
  0xab   : > { %3759 = vmatprep.subr.bf16.mxu1 %v5788_v49  ;;  %v5863_v49 = vld [vmem:[%s7022_s7 + $0x344] ss:$8 sps:$4 sm:$0xff]   ;;  %v5867_v56 = vld [vmem:[%s7022_s7 + $0x330] ss:$8 sps:$4 sm:$0xff]   ;;  %v5885_v14 = vld [vmem:[%s7022_s7 + $0x300] ss:$8 sps:$4 sm:$0xff]  }
  0xac   : > { %v5887_v8 = vld [vmem:[%s7022_s7 + $0x304] ss:$8 sps:$4 sm:$0xff]   ;;  %v5893_v15 = vld [vmem:[%s7022_s7 + $0x3f4] ss:$8 sps:$4 sm:$0xff]   ;;  %v5891_v18 = vld [vmem:[%s7022_s7 + $0x3f0] ss:$8 sps:$4 sm:$0xff]  }
  0xad   : > { %3719 = vmatpush1.bf16.msra.mxu0 %v5787_v50  ;;  %v5858_v50 = vld [vmem:[%s7022_s7 + $0x240] ss:$8 sps:$4 sm:$0xff]   ;;  %v5899_v19 = vld [vmem:[%s7022_s7 + $0x3e4] ss:$8 sps:$4 sm:$0xff]  }
  0xae   : > { %3720 = vmatprep.subr.bf16.mxu0 %v5791_v51  ;;  %3760 = vmatpush1.bf16.msra.mxu1 %v5790_v52  ;;  %v5866_v51 = vld [vmem:[%s7022_s7 + $0x234] ss:$8 sps:$4 sm:$0xff]   ;;  %v5861_v52 = vld [vmem:[%s7022_s7 + $0x340] ss:$8 sps:$4 sm:$0xff]  }
  0xaf   : > { %3761 = vmatprep.subr.bf16.mxu1 %v5794_v53  ;;  %v5869_v53 = vld [vmem:[%s7022_s7 + $0x334] ss:$8 sps:$4 sm:$0xff]   ;;  %v5897_v22 = vld [vmem:[%s7022_s7 + $0x3e0] ss:$8 sps:$4 sm:$0xff]  }
  0xb1   : > { %3721 = vmatpush2.bf16.msra.mxu0 %v5793_v54  ;;  %v5864_v54 = vld [vmem:[%s7022_s7 + $0x230] ss:$8 sps:$4 sm:$0xff]  }
  0xb2   : > { %3722 = vmatprep.subr.bf16.mxu0 %v5797_v58  ;;  %3762 = vmatpush2.bf16.msra.mxu1 %v5796_v59  ;;  %v5870_v58 = vld [vmem:[%s7022_s7 + $0x220] ss:$8 sps:$4 sm:$0xff]   ;;  %v5878_v59 = vld [vmem:[%s7022_s7 + $0x214] ss:$8 sps:$4 sm:$0xff]  }
  0xb3   : > { %3763 = vmatprep.subr.bf16.mxu1 %v5800_v60  ;;  %v5873_v60 = vld [vmem:[%s7022_s7 + $0x320] ss:$8 sps:$4 sm:$0xff]  }
  0xb5   : > { %3723 = vmatpush2.bf16.msra.mxu0 %v5799_v61  ;;  %v366_v61 = vld [vmem:[%s7815_s0 + $0x8] sm:$0xff] }
  0xb6   : > { %3724 = vmatprep.subr.bf16.mxu0 %v5803_v0  ;;  %3764 = vmatpush2.bf16.msra.mxu1 %v5802_v1  ;;  %v7147_v0 = vrot.slane %v366_v61, %v7089_v4  ;;  %v400_v1 = vcombine.high %v366_v61, %v366_v61  ;;  %v5946_v61 = vld [vmem:[%s7022_s7 + $0x560] ss:$8 sps:$4 sm:$0xff]  }
  0xb7   : > { %3765 = vmatprep.subr.bf16.mxu1 %v5806_v2  ;;  %v5876_v2 = vld [vmem:[%s7022_s7 + $0x210] ss:$8 sps:$4 sm:$0xff]  }
  0xb9   : > { %3725 = vmatpush2.bf16.msra.mxu0 %v5805_v3  ;;  %v5884_v3 = vld [vmem:[%s7022_s7 + $0x204] ss:$8 sps:$4 sm:$0xff]  }
  0xba   : > { %3726 = vmatprep.subr.bf16.mxu0 %v5809_v5  ;;  %3766 = vmatpush2.bf16.msra.mxu1 %v5808_v6  ;;  %v415_v5 = vcombine.high %v7147_v0, %v7147_v0  ;;  %v7154_v6 = vrot.slane %v400_v1, %v7089_v4  ;;  %v5954_v1 = vld [vmem:[%s7022_s7 + $0x554] ss:$8 sps:$4 sm:$0xff]  }
  0xbb   : > { %3767 = vmatprep.subr.bf16.mxu1 %v5812_v7  ;;  %v5879_v7 = vld [vmem:[%s7022_s7 + $0x310] ss:$8 sps:$4 sm:$0xff]  }
  0xbc   : > { %v416_v10 = vcombine.high %v7154_v6, %v7154_v6 }
  0xbd   : > { %3727 = vmatpush2.bf16.msra.mxu0 %v5811_v9  ;;  %v564_v9 = vpack.c.bf16 %v415_v5, %v415_v5  ;;  %v5957_v5 = vld [vmem:[%s7022_s7 + $0x444] ss:$8 sps:$4 sm:$0xff]  }
  0xbe   : > { %3728 = vmatprep.subr.bf16.mxu0 %v5815_v12  ;;  %3768 = vmatpush2.bf16.msra.mxu1 %v5814_v13  ;;  %v5890_v12 = vld [vmem:[%s7022_s7 + $0x2f4] ss:$8 sps:$4 sm:$0xff]   ;;  %v566_v13 = vpack.c.bf16 %v416_v10, %v416_v10  ;;  %v5958_v10 = vld [vmem:[%s7022_s7 + $0x540] ss:$8 sps:$4 sm:$0xff]  }
  0xbf   : > { %3769 = vmatprep.subr.bf16.mxu1 %v5818_v16  ;;  %v5888_v16 = vld [vmem:[%s7022_s7 + $0x2f0] ss:$8 sps:$4 sm:$0xff]  }
  0xc1   : > { %3729 = vmatpush2.bf16.msra.mxu0 %v5817_v17  ;;  %v5896_v17 = vld [vmem:[%s7022_s7 + $0x2e4] ss:$8 sps:$4 sm:$0xff]  }
  0xc2   : > { %3730 = vmatprep.subr.bf16.mxu0 %v5821_v20  ;;  %3770 = vmatpush2.bf16.msra.mxu1 %v5820_v21  ;;  %v5894_v20 = vld [vmem:[%s7022_s7 + $0x2e0] ss:$8 sps:$4 sm:$0xff]   ;;  %v5902_v21 = vld [vmem:[%s7022_s7 + $0x2d4] ss:$8 sps:$4 sm:$0xff]  }
  0xc3   : > { %3771 = vmatprep.subr.bf16.mxu1 %v5824_v23  ;;  %v5905_v23 = vld [vmem:[%s7022_s7 + $0x3d4] ss:$8 sps:$4 sm:$0xff]  }
  0xc5   : > { %3731 = vmatpush2.bf16.msra.mxu0 %v5823_v24  ;;  %v5900_v24 = vld [vmem:[%s7022_s7 + $0x2d0] ss:$8 sps:$4 sm:$0xff]  }
  0xc6   : > { %3732 = vmatprep.subr.bf16.mxu0 %v5827_v25  ;;  %3772 = vmatpush2.bf16.msra.mxu1 %v5826_v26  ;;  %v5908_v25 = vld [vmem:[%s7022_s7 + $0x2c4] ss:$8 sps:$4 sm:$0xff]   ;;  %v5903_v26 = vld [vmem:[%s7022_s7 + $0x3d0] ss:$8 sps:$4 sm:$0xff]  }
  0xc7   : > { %3773 = vmatprep.subr.bf16.mxu1 %v5830_v27  ;;  %v5911_v27 = vld [vmem:[%s7022_s7 + $0x3c4] ss:$8 sps:$4 sm:$0xff]  }
  0xc9   : > { %3733 = vmatpush2.bf16.msra.mxu0 %v5829_v28  ;;  %v5906_v28 = vld [vmem:[%s7022_s7 + $0x2c0] ss:$8 sps:$4 sm:$0xff]  }
  0xca   : > { %3734 = vmatprep.subr.bf16.mxu0 %v5833_v29  ;;  %3774 = vmatpush2.bf16.msra.mxu1 %v5832_v30  ;;  %v5914_v29 = vld [vmem:[%s7022_s7 + $0x2b4] ss:$8 sps:$4 sm:$0xff]   ;;  %v5909_v30 = vld [vmem:[%s7022_s7 + $0x3c0] ss:$8 sps:$4 sm:$0xff]  }
  0xcb   : > { %3775 = vmatprep.subr.bf16.mxu1 %v5836_v31  ;;  %v5917_v31 = vld [vmem:[%s7022_s7 + $0x3b4] ss:$8 sps:$4 sm:$0xff]  }
  0xcd   : > { %3735 = vmatpush2.bf16.msra.mxu0 %v5835_v32  ;;  %v5912_v32 = vld [vmem:[%s7022_s7 + $0x2b0] ss:$8 sps:$4 sm:$0xff]  }
  0xce   : > { %3786 = vmatprep.subr.bf16.mxu0 %v5841_v33  ;;  %3776 = vmatpush2.bf16.msra.mxu1 %v5838_v34  ;;  %v5920_v33 = vld [vmem:[%s7022_s7 + $0x2a4] ss:$8 sps:$4 sm:$0xff]   ;;  %v5915_v34 = vld [vmem:[%s7022_s7 + $0x3b0] ss:$8 sps:$4 sm:$0xff]  }
  0xcf   : > { %3827 = vmatprep.subr.bf16.mxu1 %v5845_v36  ;;  %v5918_v36 = vld [vmem:[%s7022_s7 + $0x2a0] ss:$8 sps:$4 sm:$0xff]  }
  0xd0   : > { %3737 = vmatmul.mubr.bf16.vlgmr.msra.gmra.mxu0 %v559_v35  ;;  %v5923_v35 = vld [vmem:[%s7022_s7 + $0x3a4] ss:$8 sps:$4 sm:$0xff]  }
  0xd1   : > { %3787 = vmatpush1.bf16.msra.mxu0 %v5839_v37  ;;  %3778 = vmatmul.mubr.bf16.vlgmr.msra.gmra.mxu1 %v561_v38  ;;  %v5926_v37 = vld [vmem:[%s7022_s7 + $0x294] ss:$8 sps:$4 sm:$0xff]   ;;  %v5921_v38 = vld [vmem:[%s7022_s7 + $0x3a0] ss:$8 sps:$4 sm:$0xff]  }
  0xd2   : > { %3788 = vmatprep.subr.bf16.mxu0 %v5848_v39  ;;  %3828 = vmatpush1.bf16.msra.mxu1 %v5843_v40  ;;  %v5929_v39 = vld [vmem:[%s7022_s7 + $0x394] ss:$8 sps:$4 sm:$0xff]   ;;  %v5924_v40 = vld [vmem:[%s7022_s7 + $0x290] ss:$8 sps:$4 sm:$0xff]  }
  0xd3   : > { %3829 = vmatprep.subr.bf16.mxu1 %v5851_v41  ;;  %3818 = vmatprep.mubr.bf16.mxu0 %v564_v9  ;;  %v5932_v41 = vld [vmem:[%s7022_s7 + $0x284] ss:$8 sps:$4 sm:$0xff]   ;;  %v5963_v9 = vld [vmem:[%s7022_s7 + $0x434] ss:$8 sps:$4 sm:$0xff]  }
  0xd4   : > { %3859 = vmatprep.mubr.bf16.mxu1 %v566_v13  ;;  %v5969_v13 = vld [vmem:[%s7022_s7 + $0x424] ss:$8 sps:$4 sm:$0xff]  }
  0xd5   : > { %3789 = vmatpush1.bf16.msra.mxu0 %v5846_v42  ;;  %v5927_v42 = vld [vmem:[%s7022_s7 + $0x390] ss:$8 sps:$4 sm:$0xff]  }
  0xd6   : > { %3790 = vmatprep.subr.bf16.mxu0 %v5854_v43  ;;  %3830 = vmatpush1.bf16.msra.mxu1 %v5849_v44  ;;  %v5935_v43 = vld [vmem:[%s7022_s7 + $0x384] ss:$8 sps:$4 sm:$0xff]   ;;  %v5930_v44 = vld [vmem:[%s7022_s7 + $0x280] ss:$8 sps:$4 sm:$0xff]  }
  0xd7   : > { %3831 = vmatprep.subr.bf16.mxu1 %v5857_v45  ;;  %v5938_v45 = vld [vmem:[%s7022_s7 + $0x474] ss:$8 sps:$4 sm:$0xff]  }
  0xd9   : > { %3791 = vmatpush1.bf16.msra.mxu0 %v5852_v46  ;;  %v5933_v46 = vld [vmem:[%s7022_s7 + $0x380] ss:$8 sps:$4 sm:$0xff]  }
  0xda   : > { %3792 = vmatprep.subr.bf16.mxu0 %v5860_v47  ;;  %3832 = vmatpush1.bf16.msra.mxu1 %v5855_v48  ;;  %v563_v47 = vpack.c.bf16 %v7147_v0, %v7147_v0  ;;  %v5942_v48 = vld [vmem:[%s7022_s7 + $0x574] ss:$8 sps:$4 sm:$0xff]  }
  0xdb   : > { %3833 = vmatprep.subr.bf16.mxu1 %v5863_v49  ;;  %v5936_v49 = vld [vmem:[%s7022_s7 + $0x470] ss:$8 sps:$4 sm:$0xff]  }
  0xdd   : > { %3793 = vmatpush1.bf16.msra.mxu0 %v5858_v50  ;;  %v565_v50 = vpack.c.bf16 %v7154_v6, %v7154_v6  ;;  %v5952_v6 = vld [vmem:[%s7022_s7 + $0x550] ss:$8 sps:$4 sm:$0xff]  }
  0xde   : > { %3794 = vmatprep.subr.bf16.mxu0 %v5866_v51  ;;  %3834 = vmatpush1.bf16.msra.mxu1 %v5861_v52  ;;  %v5945_v51 = vld [vmem:[%s7022_s7 + $0x464] ss:$8 sps:$4 sm:$0xff]   ;;  %v367_v52 = vld [vmem:[%s7815_s0 + $0x10] sm:$0xff] }
  0xdf   : > { %3835 = vmatprep.subr.bf16.mxu1 %v5869_v53  ;;  %v5940_v53 = vld [vmem:[%s7022_s7 + $0x570] ss:$8 sps:$4 sm:$0xff]  }
  0xe1   : > { %3795 = vmatpush1.bf16.msra.mxu0 %v5864_v54  ;;  %v7207_v54 = vrot.slane %v367_v52, %v7089_v4 }
  0xe2   : > { %3796 = vmatprep.subr.bf16.mxu0 %v5872_v55  ;;  %3836 = vmatpush1.bf16.msra.mxu1 %v5867_v56  ;;  %v417_v55 = vcombine.high %v367_v52, %v367_v52  ;;  %v5948_v56 = vld [vmem:[%s7022_s7 + $0x564] ss:$8 sps:$4 sm:$0xff]  }
  0xe3   : > { %3837 = vmatprep.subr.bf16.mxu1 %v5875_v57  ;;  %v5943_v57 = vld [vmem:[%s7022_s7 + $0x460] ss:$8 sps:$4 sm:$0xff]  }
  0xe5   : > { %3797 = vmatpush1.bf16.msra.mxu0 %v5870_v58  ;;  %v432_v58 = vcombine.high %v7207_v54, %v7207_v54 }
  0xe6   : > { %3798 = vmatprep.subr.bf16.mxu0 %v5878_v59  ;;  %3838 = vmatpush1.bf16.msra.mxu1 %v5873_v60  ;;  %v7214_v59 = vrot.slane %v417_v55, %v7089_v4  ;;  %v5951_v60 = vld [vmem:[%s7022_s7 + $0x454] ss:$8 sps:$4 sm:$0xff]   ;;  %v6021_v55 = vld [vmem:[%s7022_s7 + $0x490] ss:$8 sps:$4 sm:$0xff]  }
  0xe7   : > { %3839 = vmatprep.subr.bf16.mxu1 %v5881_v62  ;;  %v568_v62 = vpack.c.bf16 %v432_v58, %v432_v58  ;;  %v6024_v58 = vld [vmem:[%s7022_s7 + $0x590] ss:$8 sps:$4 sm:$0xff]  }
  0xe8   : > { %v433_v0 = vcombine.high %v7214_v59, %v7214_v59 }
  0xe9   : > { %3799 = vmatpush1.bf16.msra.mxu0 %v5876_v2  ;;  %v5949_v2 = vld [vmem:[%s7022_s7 + $0x450] ss:$8 sps:$4 sm:$0xff]  }
  0xea   : > { %3800 = vmatprep.subr.bf16.mxu0 %v5884_v3  ;;  %3840 = vmatpush1.bf16.msra.mxu1 %v5879_v7  ;;  %v570_v3 = vpack.c.bf16 %v433_v0, %v433_v0  ;;  %v5960_v7 = vld [vmem:[%s7022_s7 + $0x544] ss:$8 sps:$4 sm:$0xff]  }
  0xeb   : > { %3841 = vmatprep.subr.bf16.mxu1 %v5887_v8  ;;  %v5955_v8 = vld [vmem:[%s7022_s7 + $0x440] ss:$8 sps:$4 sm:$0xff]  }
  0xed   : > { %3801 = vmatpush1.bf16.msra.mxu0 %v5882_v11  ;;  %v5966_v11 = vld [vmem:[%s7022_s7 + $0x534] ss:$8 sps:$4 sm:$0xff]  }
  0xee   : > { %3802 = vmatprep.subr.bf16.mxu0 %v5890_v12  ;;  %3842 = vmatpush1.bf16.msra.mxu1 %v5885_v14  ;;  %v5961_v12 = vld [vmem:[%s7022_s7 + $0x430] ss:$8 sps:$4 sm:$0xff]  }
  0xef   : > { %3843 = vmatprep.subr.bf16.mxu1 %v5893_v15  ;;  %v5964_v14 = vld [vmem:[%s7022_s7 + $0x530] ss:$8 sps:$4 sm:$0xff]   ;;  %v5972_v15 = vld [vmem:[%s7022_s7 + $0x524] ss:$8 sps:$4 sm:$0xff]  }
  0xf1   : > { %3803 = vmatpush2.bf16.msra.mxu0 %v5888_v16  ;;  %v5967_v16 = vld [vmem:[%s7022_s7 + $0x420] ss:$8 sps:$4 sm:$0xff]  }
  0xf2   : > { %3804 = vmatprep.subr.bf16.mxu0 %v5896_v17  ;;  %3844 = vmatpush2.bf16.msra.mxu1 %v5891_v18  ;;  %v5975_v17 = vld [vmem:[%s7022_s7 + $0x414] ss:$8 sps:$4 sm:$0xff]   ;;  %v5970_v18 = vld [vmem:[%s7022_s7 + $0x520] ss:$8 sps:$4 sm:$0xff]  }
  0xf3   : > { %3845 = vmatprep.subr.bf16.mxu1 %v5899_v19  ;;  %v5978_v19 = vld [vmem:[%s7022_s7 + $0x514] ss:$8 sps:$4 sm:$0xff]  }
  0xf5   : > { %3805 = vmatpush2.bf16.msra.mxu0 %v5894_v20  ;;  %v5973_v20 = vld [vmem:[%s7022_s7 + $0x410] ss:$8 sps:$4 sm:$0xff]  }
  0xf6   : > { %3806 = vmatprep.subr.bf16.mxu0 %v5902_v21  ;;  %3846 = vmatpush2.bf16.msra.mxu1 %v5897_v22  ;;  %v5981_v21 = vld [vmem:[%s7022_s7 + $0x404] ss:$8 sps:$4 sm:$0xff]   ;;  %v5976_v22 = vld [vmem:[%s7022_s7 + $0x510] ss:$8 sps:$4 sm:$0xff]  }
  0xf7   : > { %3847 = vmatprep.subr.bf16.mxu1 %v5905_v23  ;;  %v5984_v23 = vld [vmem:[%s7022_s7 + $0x504] ss:$8 sps:$4 sm:$0xff]  }
  0xf9   : > { %3807 = vmatpush2.bf16.msra.mxu0 %v5900_v24  ;;  %v5979_v24 = vld [vmem:[%s7022_s7 + $0x400] ss:$8 sps:$4 sm:$0xff]  }
  0xfa   : > { %3808 = vmatprep.subr.bf16.mxu0 %v5908_v25  ;;  %3848 = vmatpush2.bf16.msra.mxu1 %v5903_v26  ;;  %v5987_v25 = vld [vmem:[%s7022_s7 + $0x4f4] ss:$8 sps:$4 sm:$0xff]   ;;  %v5982_v26 = vld [vmem:[%s7022_s7 + $0x500] ss:$8 sps:$4 sm:$0xff]  }
  0xfb   : > { %3849 = vmatprep.subr.bf16.mxu1 %v5911_v27  ;;  %v5990_v27 = vld [vmem:[%s7022_s7 + $0x5f4] ss:$8 sps:$4 sm:$0xff]  }
  0xfd   : > { %3809 = vmatpush2.bf16.msra.mxu0 %v5906_v28  ;;  %v5985_v28 = vld [vmem:[%s7022_s7 + $0x4f0] ss:$8 sps:$4 sm:$0xff]  }
  0xfe   : > { %3810 = vmatprep.subr.bf16.mxu0 %v5914_v29  ;;  %3850 = vmatpush2.bf16.msra.mxu1 %v5909_v30  ;;  %v5993_v29 = vld [vmem:[%s7022_s7 + $0x4e4] ss:$8 sps:$4 sm:$0xff]   ;;  %v5988_v30 = vld [vmem:[%s7022_s7 + $0x5f0] ss:$8 sps:$4 sm:$0xff]  }
  0xff   : > { %3851 = vmatprep.subr.bf16.mxu1 %v5917_v31  ;;  %v5996_v31 = vld [vmem:[%s7022_s7 + $0x5e4] ss:$8 sps:$4 sm:$0xff]  }
 0x101   : > { %3811 = vmatpush2.bf16.msra.mxu0 %v5912_v32  ;;  %v5991_v32 = vld [vmem:[%s7022_s7 + $0x4e0] ss:$8 sps:$4 sm:$0xff]  }
 0x102   : > { %3812 = vmatprep.subr.bf16.mxu0 %v5920_v33  ;;  %3852 = vmatpush2.bf16.msra.mxu1 %v5915_v34  ;;  %v5999_v33 = vld [vmem:[%s7022_s7 + $0x4d4] ss:$8 sps:$4 sm:$0xff]   ;;  %v5994_v34 = vld [vmem:[%s7022_s7 + $0x5e0] ss:$8 sps:$4 sm:$0xff]  }
 0x103   : > { %3853 = vmatprep.subr.bf16.mxu1 %v5923_v35  ;;  %v6002_v35 = vld [vmem:[%s7022_s7 + $0x5d4] ss:$8 sps:$4 sm:$0xff]  }
 0x105   : > { %3813 = vmatpush2.bf16.msra.mxu0 %v5918_v36  ;;  %v5997_v36 = vld [vmem:[%s7022_s7 + $0x4d0] ss:$8 sps:$4 sm:$0xff]  }
 0x106   : > { %3814 = vmatprep.subr.bf16.mxu0 %v5926_v37  ;;  %3854 = vmatpush2.bf16.msra.mxu1 %v5921_v38  ;;  %v6005_v37 = vld [vmem:[%s7022_s7 + $0x4c4] ss:$8 sps:$4 sm:$0xff]   ;;  %v6000_v38 = vld [vmem:[%s7022_s7 + $0x5d0] ss:$8 sps:$4 sm:$0xff]  }
 0x107   : > { %3855 = vmatprep.subr.bf16.mxu1 %v5929_v39  ;;  %v6008_v39 = vld [vmem:[%s7022_s7 + $0x5c4] ss:$8 sps:$4 sm:$0xff]  }
 0x109   : > { %3815 = vmatpush2.bf16.msra.mxu0 %v5924_v40  ;;  %v6003_v40 = vld [vmem:[%s7022_s7 + $0x4c0] ss:$8 sps:$4 sm:$0xff]  }
 0x10a   : > { %3816 = vmatprep.subr.bf16.mxu0 %v5932_v41  ;;  %3856 = vmatpush2.bf16.msra.mxu1 %v5927_v42  ;;  %v6011_v41 = vld [vmem:[%s7022_s7 + $0x4b4] ss:$8 sps:$4 sm:$0xff]   ;;  %v6006_v42 = vld [vmem:[%s7022_s7 + $0x5c0] ss:$8 sps:$4 sm:$0xff]  }
 0x10b   : > { %3857 = vmatprep.subr.bf16.mxu1 %v5935_v43  ;;  %v6014_v43 = vld [vmem:[%s7022_s7 + $0x5b4] ss:$8 sps:$4 sm:$0xff]  }
 0x10d   : > { %3817 = vmatpush2.bf16.msra.mxu0 %v5930_v44  ;;  %v6009_v44 = vld [vmem:[%s7022_s7 + $0x4b0] ss:$8 sps:$4 sm:$0xff]  }
 0x10e   : > { %3868 = vmatprep.subr.bf16.mxu0 %v5938_v45  ;;  %3858 = vmatpush2.bf16.msra.mxu1 %v5933_v46  ;;  %v6017_v45 = vld [vmem:[%s7022_s7 + $0x4a4] ss:$8 sps:$4 sm:$0xff]   ;;  %v6012_v46 = vld [vmem:[%s7022_s7 + $0x5b0] ss:$8 sps:$4 sm:$0xff]  }
 0x10f   : > { %3909 = vmatprep.subr.bf16.mxu1 %v5942_v48  ;;  %v368_v48 = vld [vmem:[%s7815_s0 + $0x18] sm:$0xff] }
 0x110   : > { %3819 = vmatmul.mubr.bf16.vlgmr.msra.gmra.mxu0 %v563_v47  ;;  %v6020_v47 = vld [vmem:[%s7022_s7 + $0x5a4] ss:$8 sps:$4 sm:$0xff]   ;;  %v434_v52 = vcombine.high %v368_v48, %v368_v48 }
 0x111   : > { %3869 = vmatpush1.bf16.msra.mxu0 %v5936_v49  ;;  %3860 = vmatmul.mubr.bf16.vlgmr.msra.gmra.mxu1 %v565_v50  ;;  %v6015_v49 = vld [vmem:[%s7022_s7 + $0x4a0] ss:$8 sps:$4 sm:$0xff]   ;;  %v6023_v50 = vld [vmem:[%s7022_s7 + $0x494] ss:$8 sps:$4 sm:$0xff]  }
 0x112   : > { %3870 = vmatprep.subr.bf16.mxu0 %v5945_v51  ;;  %3910 = vmatpush1.bf16.msra.mxu1 %v5940_v53  ;;  %v6018_v51 = vld [vmem:[%s7022_s7 + $0x5a0] ss:$8 sps:$4 sm:$0xff]   ;;  %v6026_v53 = vld [vmem:[%s7022_s7 + $0x594] ss:$8 sps:$4 sm:$0xff]  }
 0x113   : > { %3911 = vmatprep.subr.bf16.mxu1 %v5948_v56  ;;  %3900 = vmatprep.mubr.bf16.mxu0 %v568_v62  ;;  %v7274_v56 = vrot.slane %v368_v48, %v7089_v4  ;;  %v6027_v62 = vld [vmem:[%s7022_s7 + $0x480] ss:$8 sps:$4 sm:$0xff]   ;;  %v6094_v48 = vld [vmem:[%s7022_s7 + $0x6d0] ss:$8 sps:$4 sm:$0xff]  }
 0x114   : > { %3941 = vmatprep.mubr.bf16.mxu1 %v570_v3 }
 0x115   : > { %3871 = vmatpush1.bf16.msra.mxu0 %v5943_v57  ;;  %v6029_v57 = vld [vmem:[%s7022_s7 + $0x484] ss:$8 sps:$4 sm:$0xff]   ;;  %v449_v0 = vcombine.high %v7274_v56, %v7274_v56 }
 0x116   : > { %3872 = vmatprep.subr.bf16.mxu0 %v5951_v60  ;;  %3912 = vmatpush1.bf16.msra.mxu1 %v5946_v61  ;;  %v7279_v60 = vrot.slane %v434_v52, %v7089_v4  ;;  %v6032_v61 = vld [vmem:[%s7022_s7 + $0x584] ss:$8 sps:$4 sm:$0xff]   ;;  %v6100_v52 = vld [vmem:[%s7022_s7 + $0x6c0] ss:$8 sps:$4 sm:$0xff]  }
 0x117   : > { %3913 = vmatprep.subr.bf16.mxu1 %v5954_v1  ;;  %v6035_v1 = vld [vmem:[%s7022_s7 + $0x674] ss:$8 sps:$4 sm:$0xff]  }
 0x118   : > { %v450_v3 = vcombine.high %v7279_v60, %v7279_v60 }
 0x119   : > { %3873 = vmatpush1.bf16.msra.mxu0 %v5949_v2  ;;  %v6030_v2 = vld [vmem:[%s7022_s7 + $0x580] ss:$8 sps:$4 sm:$0xff]  }
 0x11a   : > { %3874 = vmatprep.subr.bf16.mxu0 %v5957_v5  ;;  %3914 = vmatpush1.bf16.msra.mxu1 %v5952_v6  ;;  %v567_v5 = vpack.c.bf16 %v7207_v54, %v7207_v54  ;;  %v6039_v6 = vld [vmem:[%s7022_s7 + $0x774] ss:$8 sps:$4 sm:$0xff]   ;;  %v6045_v54 = vld [vmem:[%s7022_s7 + $0x764] ss:$8 sps:$4 sm:$0xff]  }
 0x11b   : > { %3915 = vmatprep.subr.bf16.mxu1 %v5960_v7  ;;  %v6033_v7 = vld [vmem:[%s7022_s7 + $0x670] ss:$8 sps:$4 sm:$0xff]  }
 0x11d   : > { %3875 = vmatpush1.bf16.msra.mxu0 %v5955_v8  ;;  %v572_v8 = vpack.c.bf16 %v449_v0, %v449_v0  ;;  %v6117_v0 = vld [vmem:[%s7022_s7 + $0x7a4] ss:$8 sps:$4 sm:$0xff]  }
 0x11e   : > { %3876 = vmatprep.subr.bf16.mxu0 %v5963_v9  ;;  %3916 = vmatpush1.bf16.msra.mxu1 %v5958_v10  ;;  %v569_v9 = vpack.c.bf16 %v7214_v59, %v7214_v59  ;;  %v6042_v10 = vld [vmem:[%s7022_s7 + $0x664] ss:$8 sps:$4 sm:$0xff]   ;;  %v6043_v59 = vld [vmem:[%s7022_s7 + $0x760] ss:$8 sps:$4 sm:$0xff]  }
 0x11f   : > { %3917 = vmatprep.subr.bf16.mxu1 %v5966_v11  ;;  %v6037_v11 = vld [vmem:[%s7022_s7 + $0x770] ss:$8 sps:$4 sm:$0xff]  }
 0x121   : > { %3877 = vmatpush1.bf16.msra.mxu0 %v5961_v12  ;;  %v574_v12 = vpack.c.bf16 %v450_v3, %v450_v3  ;;  %v6120_v3 = vld [vmem:[%s7022_s7 + $0x694] ss:$8 sps:$4 sm:$0xff]  }
 0x122   : > { %3878 = vmatprep.subr.bf16.mxu0 %v5969_v13  ;;  %3918 = vmatpush1.bf16.msra.mxu1 %v5964_v14  ;;  %v6040_v13 = vld [vmem:[%s7022_s7 + $0x660] ss:$8 sps:$4 sm:$0xff]   ;;  %v6048_v14 = vld [vmem:[%s7022_s7 + $0x654] ss:$8 sps:$4 sm:$0xff]  }
 0x123   : > { %3919 = vmatprep.subr.bf16.mxu1 %v5972_v15  ;;  %v6051_v15 = vld [vmem:[%s7022_s7 + $0x754] ss:$8 sps:$4 sm:$0xff]  }
 0x125   : > { %3879 = vmatpush1.bf16.msra.mxu0 %v5967_v16  ;;  %v6046_v16 = vld [vmem:[%s7022_s7 + $0x650] ss:$8 sps:$4 sm:$0xff]  }
 0x126   : > { %3880 = vmatprep.subr.bf16.mxu0 %v5975_v17  ;;  %3920 = vmatpush1.bf16.msra.mxu1 %v5970_v18  ;;  %v6054_v17 = vld [vmem:[%s7022_s7 + $0x644] ss:$8 sps:$4 sm:$0xff]   ;;  %v6049_v18 = vld [vmem:[%s7022_s7 + $0x750] ss:$8 sps:$4 sm:$0xff]  }
 0x127   : > { %3921 = vmatprep.subr.bf16.mxu1 %v5978_v19  ;;  %v6057_v19 = vld [vmem:[%s7022_s7 + $0x744] ss:$8 sps:$4 sm:$0xff]  }
 0x129   : > { %3881 = vmatpush1.bf16.msra.mxu0 %v5973_v20  ;;  %v6052_v20 = vld [vmem:[%s7022_s7 + $0x640] ss:$8 sps:$4 sm:$0xff]  }
 0x12a   : > { %3882 = vmatprep.subr.bf16.mxu0 %v5981_v21  ;;  %3922 = vmatpush1.bf16.msra.mxu1 %v5976_v22  ;;  %v6060_v21 = vld [vmem:[%s7022_s7 + $0x634] ss:$8 sps:$4 sm:$0xff]   ;;  %v6055_v22 = vld [vmem:[%s7022_s7 + $0x740] ss:$8 sps:$4 sm:$0xff]  }
 0x12b   : > { %3923 = vmatprep.subr.bf16.mxu1 %v5984_v23  ;;  %v6063_v23 = vld [vmem:[%s7022_s7 + $0x734] ss:$8 sps:$4 sm:$0xff]  }
 0x12d   : > { %3883 = vmatpush1.bf16.msra.mxu0 %v5979_v24  ;;  %v6058_v24 = vld [vmem:[%s7022_s7 + $0x630] ss:$8 sps:$4 sm:$0xff]  }
 0x12e   : > { %3884 = vmatprep.subr.bf16.mxu0 %v5987_v25  ;;  %3924 = vmatpush1.bf16.msra.mxu1 %v5982_v26  ;;  %v6066_v25 = vld [vmem:[%s7022_s7 + $0x624] ss:$8 sps:$4 sm:$0xff]   ;;  %v6061_v26 = vld [vmem:[%s7022_s7 + $0x730] ss:$8 sps:$4 sm:$0xff]  }
 0x12f   : > { %3925 = vmatprep.subr.bf16.mxu1 %v5990_v27  ;;  %v6069_v27 = vld [vmem:[%s7022_s7 + $0x724] ss:$8 sps:$4 sm:$0xff]  }
 0x131   : > { %3885 = vmatpush2.bf16.msra.mxu0 %v5985_v28  ;;  %v6064_v28 = vld [vmem:[%s7022_s7 + $0x620] ss:$8 sps:$4 sm:$0xff]  }
 0x132   : > { %3886 = vmatprep.subr.bf16.mxu0 %v5993_v29  ;;  %3926 = vmatpush2.bf16.msra.mxu1 %v5988_v30  ;;  %v6072_v29 = vld [vmem:[%s7022_s7 + $0x614] ss:$8 sps:$4 sm:$0xff]   ;;  %v6067_v30 = vld [vmem:[%s7022_s7 + $0x720] ss:$8 sps:$4 sm:$0xff]  }
 0x133   : > { %3927 = vmatprep.subr.bf16.mxu1 %v5996_v31  ;;  %v6075_v31 = vld [vmem:[%s7022_s7 + $0x714] ss:$8 sps:$4 sm:$0xff]  }
 0x135   : > { %3887 = vmatpush2.bf16.msra.mxu0 %v5991_v32  ;;  %v6070_v32 = vld [vmem:[%s7022_s7 + $0x610] ss:$8 sps:$4 sm:$0xff]  }
 0x136   : > { %3888 = vmatprep.subr.bf16.mxu0 %v5999_v33  ;;  %3928 = vmatpush2.bf16.msra.mxu1 %v5994_v34  ;;  %v6078_v33 = vld [vmem:[%s7022_s7 + $0x604] ss:$8 sps:$4 sm:$0xff]   ;;  %v6073_v34 = vld [vmem:[%s7022_s7 + $0x710] ss:$8 sps:$4 sm:$0xff]  }
 0x137   : > { %3929 = vmatprep.subr.bf16.mxu1 %v6002_v35  ;;  %v6081_v35 = vld [vmem:[%s7022_s7 + $0x704] ss:$8 sps:$4 sm:$0xff]  }
 0x139   : > { %3889 = vmatpush2.bf16.msra.mxu0 %v5997_v36  ;;  %v6076_v36 = vld [vmem:[%s7022_s7 + $0x600] ss:$8 sps:$4 sm:$0xff]  }
 0x13a   : > { %3890 = vmatprep.subr.bf16.mxu0 %v6005_v37  ;;  %3930 = vmatpush2.bf16.msra.mxu1 %v6000_v38  ;;  %v6084_v37 = vld [vmem:[%s7022_s7 + $0x6f4] ss:$8 sps:$4 sm:$0xff]   ;;  %v6079_v38 = vld [vmem:[%s7022_s7 + $0x700] ss:$8 sps:$4 sm:$0xff]  }
 0x13b   : > { %3931 = vmatprep.subr.bf16.mxu1 %v6008_v39  ;;  %v6087_v39 = vld [vmem:[%s7022_s7 + $0x7f4] ss:$8 sps:$4 sm:$0xff]  }
 0x13d   : > { %3891 = vmatpush2.bf16.msra.mxu0 %v6003_v40  ;;  %v6082_v40 = vld [vmem:[%s7022_s7 + $0x6f0] ss:$8 sps:$4 sm:$0xff]  }
 0x13e   : > { %3892 = vmatprep.subr.bf16.mxu0 %v6011_v41  ;;  %3932 = vmatpush2.bf16.msra.mxu1 %v6006_v42  ;;  %v6090_v41 = vld [vmem:[%s7022_s7 + $0x6e4] ss:$8 sps:$4 sm:$0xff]   ;;  %v6085_v42 = vld [vmem:[%s7022_s7 + $0x7f0] ss:$8 sps:$4 sm:$0xff]  }
 0x13f   : > { %3933 = vmatprep.subr.bf16.mxu1 %v6014_v43  ;;  %v6093_v43 = vld [vmem:[%s7022_s7 + $0x7e4] ss:$8 sps:$4 sm:$0xff]  }
 0x141   : > { %3893 = vmatpush2.bf16.msra.mxu0 %v6009_v44  ;;  %v6088_v44 = vld [vmem:[%s7022_s7 + $0x6e0] ss:$8 sps:$4 sm:$0xff]  }
 0x142   : > { %3894 = vmatprep.subr.bf16.mxu0 %v6017_v45  ;;  %3934 = vmatpush2.bf16.msra.mxu1 %v6012_v46  ;;  %v6096_v45 = vld [vmem:[%s7022_s7 + $0x6d4] ss:$8 sps:$4 sm:$0xff]   ;;  %v6091_v46 = vld [vmem:[%s7022_s7 + $0x7e0] ss:$8 sps:$4 sm:$0xff]  }
 0x143   : > { %3935 = vmatprep.subr.bf16.mxu1 %v6020_v47  ;;  %v6099_v47 = vld [vmem:[%s7022_s7 + $0x7d4] ss:$8 sps:$4 sm:$0xff]  }
 0x145   : > { %3895 = vmatpush2.bf16.msra.mxu0 %v6015_v49  ;;  %v6102_v49 = vld [vmem:[%s7022_s7 + $0x6c4] ss:$8 sps:$4 sm:$0xff]  }
 0x146   : > { %3896 = vmatprep.subr.bf16.mxu0 %v6023_v50  ;;  %3936 = vmatpush2.bf16.msra.mxu1 %v6018_v51  ;;  %v6097_v50 = vld [vmem:[%s7022_s7 + $0x7d0] ss:$8 sps:$4 sm:$0xff]   ;;  %v6105_v51 = vld [vmem:[%s7022_s7 + $0x7c4] ss:$8 sps:$4 sm:$0xff]  }
 0x147   : > { %3937 = vmatprep.subr.bf16.mxu1 %v6026_v53  ;;  %v6108_v53 = vld [vmem:[%s7022_s7 + $0x6b4] ss:$8 sps:$4 sm:$0xff]  }
 0x149   : > { %3897 = vmatpush2.bf16.msra.mxu0 %v6021_v55  ;;  %v6103_v55 = vld [vmem:[%s7022_s7 + $0x7c0] ss:$8 sps:$4 sm:$0xff]  }
 0x14a   : > { %3898 = vmatprep.subr.bf16.mxu0 %v6029_v57  ;;  %3938 = vmatpush2.bf16.msra.mxu1 %v6024_v58  ;;  %v6111_v57 = vld [vmem:[%s7022_s7 + $0x7b4] ss:$8 sps:$4 sm:$0xff]   ;;  %v6106_v58 = vld [vmem:[%s7022_s7 + $0x6b0] ss:$8 sps:$4 sm:$0xff]  }
 0x14b   : > { %3939 = vmatprep.subr.bf16.mxu1 %v6032_v61  ;;  %v6114_v61 = vld [vmem:[%s7022_s7 + $0x6a4] ss:$8 sps:$4 sm:$0xff]  }
 0x14d   : > { %3899 = vmatpush2.bf16.msra.mxu0 %v6027_v62  ;;  %v6109_v62 = vld [vmem:[%s7022_s7 + $0x7b0] ss:$8 sps:$4 sm:$0xff]  }
 0x14e   : > { %3950 = vmatprep.subr.bf16.mxu0 %v6035_v1  ;;  %3940 = vmatpush2.bf16.msra.mxu1 %v6030_v2  ;;  %v369_v1 = vld [vmem:[%s7815_s0 + $0x20] sm:$0xff] }
 0x14f   : > { %3991 = vmatprep.subr.bf16.mxu1 %v6039_v6  ;;  %v6112_v2 = vld [vmem:[%s7022_s7 + $0x6a0] ss:$8 sps:$4 sm:$0xff]   ;;  %v451_v6 = vcombine.high %v369_v1, %v369_v1 }
 0x150   : > { %3901 = vmatmul.mubr.bf16.vlgmr.msra.gmra.mxu0 %v567_v5  ;;  %v6115_v5 = vld [vmem:[%s7022_s7 + $0x7a0] ss:$8 sps:$4 sm:$0xff]  }
 0x151   : > { %3951 = vmatpush1.bf16.msra.mxu0 %v6033_v7  ;;  %3982 = vmatprep.mubr.bf16.mxu0 %v572_v8  ;;  %v6123_v7 = vld [vmem:[%s7022_s7 + $0x794] ss:$8 sps:$4 sm:$0xff]   ;;  %v6118_v8 = vld [vmem:[%s7022_s7 + $0x690] ss:$8 sps:$4 sm:$0xff]  }
 0x152   : > { %3942 = vmatmul.mubr.bf16.vlgmr.msra.gmra.mxu1 %v569_v9  ;;  %3952 = vmatprep.subr.bf16.mxu0 %v6042_v10  ;;  %v7355_v9 = vrot.slane %v369_v1, %v7089_v4  ;;  %v6126_v10 = vld [vmem:[%s7022_s7 + $0x684] ss:$8 sps:$4 sm:$0xff]   ;;  %v6172_v1 = vld [vmem:[%s7022_s7 + $0x914] ss:$8 sps:$4 sm:$0xff]  }
 0x153   : > { %3992 = vmatpush1.bf16.msra.mxu1 %v6037_v11  ;;  %4023 = vmatprep.mubr.bf16.mxu1 %v574_v12  ;;  %v6121_v11 = vld [vmem:[%s7022_s7 + $0x790] ss:$8 sps:$4 sm:$0xff]   ;;  %v7360_v12 = vrot.slane %v451_v6, %v7089_v4  ;;  %v6178_v6 = vld [vmem:[%s7022_s7 + $0x904] ss:$8 sps:$4 sm:$0xff]  }
 0x154   : > { %3993 = vmatprep.subr.bf16.mxu1 %v6045_v54  ;;  %v6129_v54 = vld [vmem:[%s7022_s7 + $0x784] ss:$8 sps:$4 sm:$0xff]  }
 0x155   : > { %3953 = vmatpush1.bf16.msra.mxu0 %v6040_v13  ;;  %v6124_v13 = vld [vmem:[%s7022_s7 + $0x680] ss:$8 sps:$4 sm:$0xff]  }
 0x156   : > { %3954 = vmatprep.subr.bf16.mxu0 %v6048_v14  ;;  %v1112_v14 = vsub.s32 0, %v7082_v63 }
 0x157   : > { %3994 = vmatpush1.bf16.msra.mxu1 %v6043_v59  ;;  %v466_v59 = vcombine.high %v7355_v9, %v7355_v9 }
 0x158   : > { %3995 = vmatprep.subr.bf16.mxu1 %v6051_v15  ;;  %v1108_v15 = vld [vmem:[%s7029_s11] sm:$0x3] }
 0x159   : > { %3955 = vmatpush1.bf16.msra.mxu0 %v6046_v16  ;;  %v6132_v16 = vld [vmem:[%s7022_s7 + $0x874] ss:$8 sps:$4 sm:$0xff]  }
 0x15a   : > { %3956 = vmatprep.subr.bf16.mxu0 %v6054_v17  ;;  %v6127_v17 = vld [vmem:[%s7022_s7 + $0x780] ss:$8 sps:$4 sm:$0xff]  }
 0x15b   : > { %3996 = vmatpush1.bf16.msra.mxu1 %v6049_v18  ;;  %v1116_v18 = vsub.s32 1, %v7082_v63  ;;  %v6134_v63 = vld [vmem:[%s7022_s7 + $0x970] ss:$8 sps:$4 sm:$0xff]  }
 0x15c   : > { %3997 = vmatprep.subr.bf16.mxu1 %v6057_v19  ;;  %v467_v19 = vcombine.high %v7360_v12, %v7360_v12 }
 0x15d   : > { %3957 = vmatpush1.bf16.msra.mxu0 %v6052_v20  ;;  %v571_v20 = vpack.c.bf16 %v7274_v56, %v7274_v56  ;;  %v6142_v56 = vld [vmem:[%s7022_s7 + $0x964] ss:$8 sps:$4 sm:$0xff]  }
 0x15e   : > { %3958 = vmatprep.subr.bf16.mxu0 %v6060_v21  ;;  %v6136_v21 = vld [vmem:[%s7022_s7 + $0x974] ss:$8 sps:$4 sm:$0xff]  }
 0x15f   : > { %3998 = vmatpush1.bf16.msra.mxu1 %v6055_v22  ;;  %v1113_v22 = vrot.slane %v1108_v15, %v1112_v14  ;;  %v6185_v14 = vld [vmem:[%s7022_s7 + $0x8e0] ss:$8 sps:$4 sm:$0xff]  }
 0x160   : > { %3999 = vmatprep.subr.bf16.mxu1 %v6063_v23  ;;  %v6130_v23 = vld [vmem:[%s7022_s7 + $0x870] ss:$8 sps:$4 sm:$0xff]  }
 0x161   : > { %3959 = vmatpush1.bf16.msra.mxu0 %v6058_v24  ;;  %v576_v24 = vpack.c.bf16 %v466_v59, %v466_v59  ;;  %v6190_v59 = vld [vmem:[%s7022_s7 + $0x9e4] ss:$8 sps:$4 sm:$0xff]  }
 0x162   : > { %3960 = vmatprep.subr.bf16.mxu0 %v6066_v25  ;;  %v573_v25 = vpack.c.bf16 %v7279_v60, %v7279_v60  ;;  %v6140_v60 = vld [vmem:[%s7022_s7 + $0x960] ss:$8 sps:$4 sm:$0xff]  }
 0x163   : > { %4000 = vmatpush1.bf16.msra.mxu1 %v6061_v26  ;;  %v6139_v26 = vld [vmem:[%s7022_s7 + $0x864] ss:$8 sps:$4 sm:$0xff]  }
 0x164   : > { %4001 = vmatprep.subr.bf16.mxu1 %v6069_v27  ;;  %v1117_v27 = vrot.slane %v1108_v15, %v1116_v18  ;;  %v6193_v15 = vld [vmem:[%s7022_s7 + $0x8d4] ss:$8 sps:$4 sm:$0xff]  }
 0x165   : > { %3961 = vmatpush1.bf16.msra.mxu0 %v6064_v28  ;;  %v578_v28 = vpack.c.bf16 %v467_v19, %v467_v19  ;;  %v6196_v18 = vld [vmem:[%s7022_s7 + $0x9d4] ss:$8 sps:$4 sm:$0xff]   ;;  %v6199_v19 = vld [vmem:[%s7022_s7 + $0x8c4] ss:$8 sps:$4 sm:$0xff]  }
 0x166   : > { %3962 = vmatprep.subr.bf16.mxu0 %v6072_v29 }
 0x167   : > { %4002 = vmatpush1.bf16.msra.mxu1 %v6067_v30 }
 0x168   : > { %4003 = vmatprep.subr.bf16.mxu1 %v6075_v31  ;;  %v6137_v31 = vld [vmem:[%s7022_s7 + $0x860] ss:$8 sps:$4 sm:$0xff]  }
 0x169   : > { %3963 = vmatpush1.bf16.msra.mxu0 %v6070_v32 }
 0x16a   : > { %3964 = vmatprep.subr.bf16.mxu0 %v6078_v33 }
 0x16b   : > { %4004 = vmatpush1.bf16.msra.mxu1 %v6073_v34  ;;  %v6145_v34 = vld [vmem:[%s7022_s7 + $0x854] ss:$8 sps:$4 sm:$0xff]  }
 0x16c   : > { %4005 = vmatprep.subr.bf16.mxu1 %v6081_v35 }
 0x16d   : > { %3965 = vmatpush1.bf16.msra.mxu0 %v6076_v36 }
 0x16e   : > { %3966 = vmatprep.subr.bf16.mxu0 %v6084_v37 }
 0x16f   : > { %4006 = vmatpush1.bf16.msra.mxu1 %v6079_v38 }
 0x170   : > { %4007 = vmatprep.subr.bf16.mxu1 %v6087_v39  ;;  %v6143_v39 = vld [vmem:[%s7022_s7 + $0x850] ss:$8 sps:$4 sm:$0xff]  }
 0x171   : > { %3967 = vmatpush2.bf16.msra.mxu0 %v6082_v40  ;;  %v6148_v40 = vld [vmem:[%s7022_s7 + $0x954] ss:$8 sps:$4 sm:$0xff]  }
 0x172   : > { %3968 = vmatprep.subr.bf16.mxu0 %v6090_v41 }
 0x173   : > { %4008 = vmatpush2.bf16.msra.mxu1 %v6085_v42  ;;  %v6146_v42 = vld [vmem:[%s7022_s7 + $0x950] ss:$8 sps:$4 sm:$0xff]  }
 0x174   : > { %4009 = vmatprep.subr.bf16.mxu1 %v6093_v43  ;;  %v6151_v43 = vld [vmem:[%s7022_s7 + $0x844] ss:$8 sps:$4 sm:$0xff]  }
 0x175   : > { %3969 = vmatpush2.bf16.msra.mxu0 %v6088_v44 }
 0x176   : > { %3970 = vmatprep.subr.bf16.mxu0 %v6096_v45 }
 0x177   : > { %4010 = vmatpush2.bf16.msra.mxu1 %v6091_v46 }
 0x178   : > { %4011 = vmatprep.subr.bf16.mxu1 %v6099_v47  ;;  %v6149_v47 = vld [vmem:[%s7022_s7 + $0x840] ss:$8 sps:$4 sm:$0xff]  }
 0x179   : > { %3971 = vmatpush2.bf16.msra.mxu0 %v6094_v48  ;;  %v6154_v48 = vld [vmem:[%s7022_s7 + $0x944] ss:$8 sps:$4 sm:$0xff]  }
 0x17a   : > { %3972 = vmatprep.subr.bf16.mxu0 %v6102_v49  ;;  %v6157_v49 = vld [vmem:[%s7022_s7 + $0x834] ss:$8 sps:$4 sm:$0xff]  }
 0x17b   : > { %4012 = vmatpush2.bf16.msra.mxu1 %v6097_v50  ;;  %v6152_v50 = vld [vmem:[%s7022_s7 + $0x940] ss:$8 sps:$4 sm:$0xff]  }
 0x17c   : > { %4013 = vmatprep.subr.bf16.mxu1 %v6105_v51  ;;  %v6155_v51 = vld [vmem:[%s7022_s7 + $0x830] ss:$8 sps:$4 sm:$0xff]  }
 0x17d   : > { %3973 = vmatpush2.bf16.msra.mxu0 %v6100_v52  ;;  %v6160_v52 = vld [vmem:[%s7022_s7 + $0x934] ss:$8 sps:$4 sm:$0xff]  }
 0x17e   : > { %3974 = vmatprep.subr.bf16.mxu0 %v6108_v53  ;;  %v6163_v53 = vld [vmem:[%s7022_s7 + $0x824] ss:$8 sps:$4 sm:$0xff]  }
 0x17f   : > { %4014 = vmatpush2.bf16.msra.mxu1 %v6103_v55  ;;  %v6158_v55 = vld [vmem:[%s7022_s7 + $0x930] ss:$8 sps:$4 sm:$0xff]  }
 0x180   : > { %4015 = vmatprep.subr.bf16.mxu1 %v6111_v57  ;;  %v6161_v57 = vld [vmem:[%s7022_s7 + $0x820] ss:$8 sps:$4 sm:$0xff]  }
 0x181   : > { %3975 = vmatpush2.bf16.msra.mxu0 %v6106_v58  ;;  %v6166_v58 = vld [vmem:[%s7022_s7 + $0x924] ss:$8 sps:$4 sm:$0xff]  }
 0x182   : > { %3976 = vmatprep.subr.bf16.mxu0 %v6114_v61  ;;  %v6169_v61 = vld [vmem:[%s7022_s7 + $0x814] ss:$8 sps:$4 sm:$0xff]  }
 0x183   : > { %4016 = vmatpush2.bf16.msra.mxu1 %v6109_v62  ;;  %v6164_v62 = vld [vmem:[%s7022_s7 + $0x920] ss:$8 sps:$4 sm:$0xff]  }
 0x184   : > { %4017 = vmatprep.subr.bf16.mxu1 %v6117_v0  ;;  %v6167_v0 = vld [vmem:[%s7022_s7 + $0x810] ss:$8 sps:$4 sm:$0xff]  }
 0x185   : > { %3977 = vmatpush2.bf16.msra.mxu0 %v6112_v2  ;;  %v6175_v2 = vld [vmem:[%s7022_s7 + $0x804] ss:$8 sps:$4 sm:$0xff]  }
 0x186   : > { %3978 = vmatprep.subr.bf16.mxu0 %v6120_v3  ;;  %v6170_v3 = vld [vmem:[%s7022_s7 + $0x910] ss:$8 sps:$4 sm:$0xff]  }
 0x187   : > { %4018 = vmatpush2.bf16.msra.mxu1 %v6115_v5  ;;  %v6173_v5 = vld [vmem:[%s7022_s7 + $0x800] ss:$8 sps:$4 sm:$0xff]  }
 0x188   : > { %4019 = vmatprep.subr.bf16.mxu1 %v6123_v7  ;;  %v6181_v7 = vld [vmem:[%s7022_s7 + $0x8f4] ss:$8 sps:$4 sm:$0xff]  }
 0x189   : > { %3979 = vmatpush2.bf16.msra.mxu0 %v6118_v8  ;;  %v6176_v8 = vld [vmem:[%s7022_s7 + $0x900] ss:$8 sps:$4 sm:$0xff]  }
 0x18a   : > { %3980 = vmatprep.subr.bf16.mxu0 %v6126_v10  ;;  %v6179_v10 = vld [vmem:[%s7022_s7 + $0x8f0] ss:$8 sps:$4 sm:$0xff]  }
 0x18b   : > { %4020 = vmatpush2.bf16.msra.mxu1 %v6121_v11  ;;  %v6184_v11 = vld [vmem:[%s7022_s7 + $0x9f4] ss:$8 sps:$4 sm:$0xff]  }
 0x18c   : > { %4021 = vmatprep.subr.bf16.mxu1 %v6129_v54  ;;  %v6187_v54 = vld [vmem:[%s7022_s7 + $0x8e4] ss:$8 sps:$4 sm:$0xff]  }
 0x18d   : > { %3981 = vmatpush2.bf16.msra.mxu0 %v6124_v13  ;;  %v6182_v13 = vld [vmem:[%s7022_s7 + $0x9f0] ss:$8 sps:$4 sm:$0xff]  }
 0x18e   : > { %4032 = vmatprep.subr.bf16.mxu0 %v6132_v16  ;;  %v6188_v16 = vld [vmem:[%s7022_s7 + $0x9e0] ss:$8 sps:$4 sm:$0xff]  }
 0x18f   : > { %4022 = vmatpush2.bf16.msra.mxu1 %v6127_v17  ;;  %v6191_v17 = vld [vmem:[%s7022_s7 + $0x8d0] ss:$8 sps:$4 sm:$0xff]  }
 0x190   : > { %v3738_v29 = vpop.f32.mrf.mxu0  ;;  %3983 = vmatmul.mubr.bf16.vlgmr.msra.gmra.mxu0 %v571_v20  ;;  %4073 = vmatprep.subr.bf16.mxu1 %v6136_v21  ;;  %v6194_v20 = vld [vmem:[%s7022_s7 + $0x9d0] ss:$8 sps:$4 sm:$0xff]   ;;  %v6197_v21 = vld [vmem:[%s7022_s7 + $0x8c0] ss:$8 sps:$4 sm:$0xff]  }
 0x191   : > { %v3739_v30 = vadd.f32 %v3738_v29, %v1113_v22  ;;  %4033 = vmatpush1.bf16.msra.mxu0 %v6130_v23  ;;  %4064 = vmatprep.mubr.bf16.mxu0 %v576_v24  ;;  %v3779_v33 = vpop.f32.mrf.mxu1  ;;  %v6202_v22 = vld [vmem:[%s7022_s7 + $0x9c4] ss:$8 sps:$4 sm:$0xff]   ;;  %v6205_v23 = vld [vmem:[%s7022_s7 + $0x8b4] ss:$8 sps:$4 sm:$0xff]   ;;  %v6200_v24 = vld [vmem:[%s7022_s7 + $0x9c0] ss:$8 sps:$4 sm:$0xff]  }
 0x192   : > { %v3740_v32 = vpop.f32.mrf.mxu0  ;;  %4024 = vmatmul.mubr.bf16.vlgmr.msra.gmra.mxu1 %v573_v25  ;;  %4034 = vmatprep.subr.bf16.mxu0 %v6139_v26  ;;  %v6203_v25 = vld [vmem:[%s7022_s7 + $0x8b0] ss:$8 sps:$4 sm:$0xff]   ;;  %v6208_v26 = vld [vmem:[%s7022_s7 + $0x9b4] ss:$8 sps:$4 sm:$0xff]   ;;  %v6214_v29 = vld [vmem:[%s7022_s7 + $0x9a4] ss:$8 sps:$4 sm:$0xff]  }
 0x193   : > { %v3741_v35 = vadd.f32 %v3740_v32, %v1117_v27  ;;  %v7385_v36 = vadd.f32 %v3779_v33, %v3739_v30  ;;  %4074 = vmatpush1.bf16.msra.mxu1 %v6134_v63  ;;  %4105 = vmatprep.mubr.bf16.mxu1 %v578_v28  ;;  %v3781_v38 = vpop.f32.mrf.mxu1  ;;  %v6206_v63 = vld [vmem:[%s7022_s7 + $0x9b0] ss:$8 sps:$4 sm:$0xff]   ;;  %v6211_v27 = vld [vmem:[%s7022_s7 + $0x8a4] ss:$8 sps:$4 sm:$0xff]   ;;  %v6209_v28 = vld [vmem:[%s7022_s7 + $0x8a0] ss:$8 sps:$4 sm:$0xff]  }
 0x194   : > { %v3742_v37 = vpop.f32.mrf.mxu0  ;;  %4075 = vmatprep.subr.bf16.mxu1 %v6142_v56  ;;  %v370_v56 = vld [vmem:[%s7815_s0 + $0x28] sm:$0xff]  ;;  %v6217_v30 = vld [vmem:[%s7022_s7 + $0x894] ss:$8 sps:$4 sm:$0xff]   ;;  %v6215_v32 = vld [vmem:[%s7022_s7 + $0x890] ss:$8 sps:$4 sm:$0xff]  }
 0x195   : > { %v7389_v41 = vadd.f32 %v3781_v38, %v3741_v35  ;;  %4035 = vmatpush1.bf16.msra.mxu0 %v6137_v31  ;;  %v3783_v45 = vpop.f32.mrf.mxu1  ;;  %v6212_v31 = vld [vmem:[%s7022_s7 + $0x9a0] ss:$8 sps:$4 sm:$0xff]   ;;  %v468_v33 = vcombine.high %v370_v56, %v370_v56  ;;  %v7444_v35 = vrot.slane %v370_v56, %v7089_v4  ;;  %v6218_v37 = vld [vmem:[%s7022_s7 + $0x990] ss:$8 sps:$4 sm:$0xff]  }
 0x196   : > { %v3743_v44 = vpop.f32.mrf.mxu0  ;;  %4036 = vmatprep.subr.bf16.mxu0 %v6145_v34  ;;  %v6223_v34 = vld [vmem:[%s7022_s7 + $0x884] ss:$8 sps:$4 sm:$0xff]   ;;  %v6227_v45 = vld [vmem:[%s7022_s7 + $0xa70] ss:$8 sps:$4 sm:$0xff]   ;;  %v6273_v56 = vld [vmem:[%s7022_s7 + $0xb00] ss:$8 sps:$4 sm:$0xff]  }
 0x197   : > { %4076 = vmatpush1.bf16.msra.mxu1 %v6140_v60  ;;  %v3784_v46 = vpop.f32.mrf.mxu1  ;;  %v6220_v60 = vld [vmem:[%s7022_s7 + $0x994] ss:$8 sps:$4 sm:$0xff]   ;;  %v7448_v38 = vrot.slane %v468_v33, %v7089_v4  ;;  %v6224_v44 = vld [vmem:[%s7022_s7 + $0x980] ss:$8 sps:$4 sm:$0xff]   ;;  %v6279_v33 = vld [vmem:[%s7022_s7 + $0xbf0] ss:$8 sps:$4 sm:$0xff]  }
 0x198   : > { %4077 = vmatprep.subr.bf16.mxu1 %v6148_v40  ;;  %v6221_v40 = vld [vmem:[%s7022_s7 + $0x880] ss:$8 sps:$4 sm:$0xff]  }
 0x199   : > { %4037 = vmatpush1.bf16.msra.mxu0 %v6143_v39  ;;  %v6226_v39 = vld [vmem:[%s7022_s7 + $0x984] ss:$8 sps:$4 sm:$0xff]   ;;  %v484_v46 = vcombine.high %v7448_v38, %v7448_v38 }
 0x19a   : > { %4038 = vmatprep.subr.bf16.mxu0 %v6151_v43  ;;  %v483_v43 = vcombine.high %v7444_v35, %v7444_v35 }
 0x19b   : > { %4078 = vmatpush1.bf16.msra.mxu1 %v6146_v42  ;;  %v6229_v42 = vld [vmem:[%s7022_s7 + $0xa74] ss:$8 sps:$4 sm:$0xff]  }
 0x19c   : > { %4079 = vmatprep.subr.bf16.mxu1 %v6154_v48  ;;  %v6233_v48 = vld [vmem:[%s7022_s7 + $0xb74] ss:$8 sps:$4 sm:$0xff]  }
 0x19d   : > { %4039 = vmatpush1.bf16.msra.mxu0 %v6149_v47  ;;  %v575_v47 = vpack.c.bf16 %v7355_v9, %v7355_v9 }
 0x19e   : > { %4040 = vmatprep.subr.bf16.mxu0 %v6157_v49  ;;  %v6231_v49 = vld [vmem:[%s7022_s7 + $0xb70] ss:$8 sps:$4 sm:$0xff]  }
 0x19f   : > { %4080 = vmatpush1.bf16.msra.mxu1 %v6152_v50  ;;  %v6236_v50 = vld [vmem:[%s7022_s7 + $0xa64] ss:$8 sps:$4 sm:$0xff]  }
 0x1a0   : > { %4081 = vmatprep.subr.bf16.mxu1 %v6160_v52  ;;  %v577_v52 = vpack.c.bf16 %v7360_v12, %v7360_v12 }
 0x1a1   : > { %4041 = vmatpush1.bf16.msra.mxu0 %v6155_v51  ;;  %v580_v51 = vpack.c.bf16 %v483_v43, %v483_v43  ;;  %v6296_v43 = vld [vmem:[%s7022_s7 + $0xac4] ss:$8 sps:$4 sm:$0xff]  }
 0x1a2   : > { %4042 = vmatprep.subr.bf16.mxu0 %v6163_v53  ;;  %v582_v53 = vpack.c.bf16 %v484_v46, %v484_v46  ;;  %v6294_v46 = vld [vmem:[%s7022_s7 + $0xac0] ss:$8 sps:$4 sm:$0xff]  }
 0x1a3   : > { %4082 = vmatpush1.bf16.msra.mxu1 %v6158_v55 }
 0x1a4   : > { %4083 = vmatprep.subr.bf16.mxu1 %v6166_v58  ;;  %v6239_v58 = vld [vmem:[%s7022_s7 + $0xb64] ss:$8 sps:$4 sm:$0xff]  }
 0x1a5   : > { %4043 = vmatpush1.bf16.msra.mxu0 %v6161_v57  ;;  %v6234_v57 = vld [vmem:[%s7022_s7 + $0xa60] ss:$8 sps:$4 sm:$0xff]  }
 0x1a6   : > { %4044 = vmatprep.subr.bf16.mxu0 %v6169_v61  ;;  %v6237_v61 = vld [vmem:[%s7022_s7 + $0xb60] ss:$8 sps:$4 sm:$0xff]  }
 0x1a7   : > { %4084 = vmatpush1.bf16.msra.mxu1 %v6164_v62  ;;  %v6242_v62 = vld [vmem:[%s7022_s7 + $0xa54] ss:$8 sps:$4 sm:$0xff]  }
 0x1a8   : > { %4085 = vmatprep.subr.bf16.mxu1 %v6172_v1 }
 0x1a9   : > { %4045 = vmatpush1.bf16.msra.mxu0 %v6167_v0 }
 0x1aa   : > { %4046 = vmatprep.subr.bf16.mxu0 %v6175_v2 }
 0x1ab   : > { %4086 = vmatpush1.bf16.msra.mxu1 %v6170_v3 }
 0x1ac   : > { %4087 = vmatprep.subr.bf16.mxu1 %v6178_v6  ;;  %v6245_v6 = vld [vmem:[%s7022_s7 + $0xb54] ss:$8 sps:$4 sm:$0xff]  }
 0x1ad   : > { %4047 = vmatpush1.bf16.msra.mxu0 %v6173_v5  ;;  %v6240_v5 = vld [vmem:[%s7022_s7 + $0xa50] ss:$8 sps:$4 sm:$0xff]  }
 0x1ae   : > { %4048 = vmatprep.subr.bf16.mxu0 %v6181_v7 }
 0x1af   : > { %4088 = vmatpush1.bf16.msra.mxu1 %v6176_v8  ;;  %v6243_v8 = vld [vmem:[%s7022_s7 + $0xb50] ss:$8 sps:$4 sm:$0xff]  }
 0x1b0   : > { %4089 = vmatprep.subr.bf16.mxu1 %v6184_v11 }
 0x1b1   : > { %4049 = vmatpush2.bf16.msra.mxu0 %v6179_v10  ;;  %v6248_v10 = vld [vmem:[%s7022_s7 + $0xa44] ss:$8 sps:$4 sm:$0xff]  }
 0x1b2   : > { %4050 = vmatprep.subr.bf16.mxu0 %v6187_v54 }
 0x1b3   : > { %4090 = vmatpush2.bf16.msra.mxu1 %v6182_v13  ;;  %v6246_v13 = vld [vmem:[%s7022_s7 + $0xa40] ss:$8 sps:$4 sm:$0xff]  }
 0x1b4   : > { %4091 = vmatprep.subr.bf16.mxu1 %v6190_v59  ;;  %v6254_v59 = vld [vmem:[%s7022_s7 + $0xa34] ss:$8 sps:$4 sm:$0xff]  }
 0x1b5   : > { %4051 = vmatpush2.bf16.msra.mxu0 %v6185_v14  ;;  %v6251_v14 = vld [vmem:[%s7022_s7 + $0xb44] ss:$8 sps:$4 sm:$0xff]  }
 0x1b6   : > { %4052 = vmatprep.subr.bf16.mxu0 %v6193_v15  ;;  %v6249_v15 = vld [vmem:[%s7022_s7 + $0xb40] ss:$8 sps:$4 sm:$0xff]  }
 0x1b7   : > { %4092 = vmatpush2.bf16.msra.mxu1 %v6188_v16  ;;  %v6252_v16 = vld [vmem:[%s7022_s7 + $0xa30] ss:$8 sps:$4 sm:$0xff]  }
 0x1b8   : > { %4093 = vmatprep.subr.bf16.mxu1 %v6196_v18  ;;  %v6260_v18 = vld [vmem:[%s7022_s7 + $0xa24] ss:$8 sps:$4 sm:$0xff]  }
 0x1b9   : > { %4053 = vmatpush2.bf16.msra.mxu0 %v6191_v17  ;;  %v6257_v17 = vld [vmem:[%s7022_s7 + $0xb34] ss:$8 sps:$4 sm:$0xff]  }
 0x1ba   : > { %4054 = vmatprep.subr.bf16.mxu0 %v6199_v19  ;;  %v6255_v19 = vld [vmem:[%s7022_s7 + $0xb30] ss:$8 sps:$4 sm:$0xff]  }
 0x1bb   : > { %4094 = vmatpush2.bf16.msra.mxu1 %v6194_v20  ;;  %v6258_v20 = vld [vmem:[%s7022_s7 + $0xa20] ss:$8 sps:$4 sm:$0xff]  }
 0x1bc   : > { %4095 = vmatprep.subr.bf16.mxu1 %v6202_v22  ;;  %v6266_v22 = vld [vmem:[%s7022_s7 + $0xa14] ss:$8 sps:$4 sm:$0xff]  }
 0x1bd   : > { %4055 = vmatpush2.bf16.msra.mxu0 %v6197_v21  ;;  %v6263_v21 = vld [vmem:[%s7022_s7 + $0xb24] ss:$8 sps:$4 sm:$0xff]  }
 0x1be   : > { %4056 = vmatprep.subr.bf16.mxu0 %v6205_v23  ;;  %v6261_v23 = vld [vmem:[%s7022_s7 + $0xb20] ss:$8 sps:$4 sm:$0xff]  }
 0x1bf   : > { %4096 = vmatpush2.bf16.msra.mxu1 %v6200_v24  ;;  %v6264_v24 = vld [vmem:[%s7022_s7 + $0xa10] ss:$8 sps:$4 sm:$0xff]  }
 0x1c0   : > { %4097 = vmatprep.subr.bf16.mxu1 %v6208_v26  ;;  %v6272_v26 = vld [vmem:[%s7022_s7 + $0xa04] ss:$8 sps:$4 sm:$0xff]  }
 0x1c1   : > { %4057 = vmatpush2.bf16.msra.mxu0 %v6203_v25  ;;  %v6269_v25 = vld [vmem:[%s7022_s7 + $0xb14] ss:$8 sps:$4 sm:$0xff]  }
 0x1c2   : > { %4058 = vmatprep.subr.bf16.mxu0 %v6211_v27  ;;  %v6270_v27 = vld [vmem:[%s7022_s7 + $0xa00] ss:$8 sps:$4 sm:$0xff]  }
 0x1c3   : > { %4098 = vmatpush2.bf16.msra.mxu1 %v6206_v63  ;;  %v6267_v63 = vld [vmem:[%s7022_s7 + $0xb10] ss:$8 sps:$4 sm:$0xff]  }
 0x1c4   : > { %4099 = vmatprep.subr.bf16.mxu1 %v6214_v29  ;;  %v6278_v29 = vld [vmem:[%s7022_s7 + $0xaf4] ss:$8 sps:$4 sm:$0xff]  }
 0x1c5   : > { %4059 = vmatpush2.bf16.msra.mxu0 %v6209_v28  ;;  %v6275_v28 = vld [vmem:[%s7022_s7 + $0xb04] ss:$8 sps:$4 sm:$0xff]  }
 0x1c6   : > { %4060 = vmatprep.subr.bf16.mxu0 %v6217_v30  ;;  %v6276_v30 = vld [vmem:[%s7022_s7 + $0xaf0] ss:$8 sps:$4 sm:$0xff]  }
 0x1c7   : > { %4100 = vmatpush2.bf16.msra.mxu1 %v6212_v31  ;;  %v6281_v31 = vld [vmem:[%s7022_s7 + $0xbf4] ss:$8 sps:$4 sm:$0xff]  }
 0x1c8   : > { %4101 = vmatprep.subr.bf16.mxu1 %v6220_v60  ;;  %v6282_v60 = vld [vmem:[%s7022_s7 + $0xae0] ss:$8 sps:$4 sm:$0xff]  }
 0x1c9   : > { %4061 = vmatpush2.bf16.msra.mxu0 %v6215_v32  ;;  %v6284_v32 = vld [vmem:[%s7022_s7 + $0xae4] ss:$8 sps:$4 sm:$0xff]  }
 0x1ca   : > { %4062 = vmatprep.subr.bf16.mxu0 %v6223_v34  ;;  %v6287_v34 = vld [vmem:[%s7022_s7 + $0xbe4] ss:$8 sps:$4 sm:$0xff]  }
 0x1cb   : > { %4102 = vmatpush2.bf16.msra.mxu1 %v6218_v37  ;;  %v6290_v37 = vld [vmem:[%s7022_s7 + $0xad4] ss:$8 sps:$4 sm:$0xff]  }
 0x1cc   : > { %4103 = vmatprep.subr.bf16.mxu1 %v6226_v39  ;;  %v6285_v39 = vld [vmem:[%s7022_s7 + $0xbe0] ss:$8 sps:$4 sm:$0xff]  }
 0x1cd   : > { %4063 = vmatpush2.bf16.msra.mxu0 %v6221_v40  ;;  %v6293_v40 = vld [vmem:[%s7022_s7 + $0xbd4] ss:$8 sps:$4 sm:$0xff]  }
 0x1ce   : > { %4114 = vmatprep.subr.bf16.mxu0 %v6229_v42  ;;  %v6288_v42 = vld [vmem:[%s7022_s7 + $0xad0] ss:$8 sps:$4 sm:$0xff]  }
 0x1cf   : > { %4104 = vmatpush2.bf16.msra.mxu1 %v6224_v44  ;;  %v6291_v44 = vld [vmem:[%s7022_s7 + $0xbd0] ss:$8 sps:$4 sm:$0xff]  }
 0x1d0   : > { %v3820_v55 = vpop.f32.mrf.mxu0  ;;  %4065 = vmatmul.mubr.bf16.vlgmr.msra.gmra.mxu0 %v575_v47  ;;  %4155 = vmatprep.subr.bf16.mxu1 %v6233_v48  ;;  %v6302_v47 = vld [vmem:[%s7022_s7 + $0xab4] ss:$8 sps:$4 sm:$0xff]   ;;  %v6297_v48 = vld [vmem:[%s7022_s7 + $0xbc0] ss:$8 sps:$4 sm:$0xff]  }
 0x1d1   : > { %v3821_v9 = vadd.f32 %v3820_v55, %v7385_v36  ;;  %4115 = vmatpush1.bf16.msra.mxu0 %v6227_v45  ;;  %4146 = vmatprep.mubr.bf16.mxu0 %v580_v51  ;;  %v3861_v1 = vpop.f32.mrf.mxu1  ;;  %v6299_v45 = vld [vmem:[%s7022_s7 + $0xbc4] ss:$8 sps:$4 sm:$0xff]   ;;  %v371_v55 = vld [vmem:[%s7815_s0 + $0x30] sm:$0xff] }
 0x1d2   : > { %v3822_v0 = vpop.f32.mrf.mxu0  ;;  %4106 = vmatmul.mubr.bf16.vlgmr.msra.gmra.mxu1 %v577_v52  ;;  %4116 = vmatprep.subr.bf16.mxu0 %v6236_v50  ;;  %v6300_v50 = vld [vmem:[%s7022_s7 + $0xab0] ss:$8 sps:$4 sm:$0xff]   ;;  %v6308_v51 = vld [vmem:[%s7022_s7 + $0xaa4] ss:$8 sps:$4 sm:$0xff]  }
 0x1d3   : > { %v3823_v12 = vadd.f32 %v3822_v0, %v7389_v41  ;;  %v7472_v2 = vadd.f32 %v3861_v1, %v3821_v9  ;;  %4156 = vmatpush1.bf16.msra.mxu1 %v6231_v49  ;;  %4187 = vmatprep.mubr.bf16.mxu1 %v582_v53  ;;  %v3863_v3 = vpop.f32.mrf.mxu1  ;;  %v6305_v49 = vld [vmem:[%s7022_s7 + $0xbb4] ss:$8 sps:$4 sm:$0xff]   ;;  %v6303_v52 = vld [vmem:[%s7022_s7 + $0xbb0] ss:$8 sps:$4 sm:$0xff]   ;;  %v6311_v53 = vld [vmem:[%s7022_s7 + $0xba4] ss:$8 sps:$4 sm:$0xff]   ;;  %v7530_v1 = vrot.slane %v371_v55, %v7089_v4 }
 0x1d4   : > { %v3824_v36 = vpop.f32.mrf.mxu0  ;;  %4157 = vmatprep.subr.bf16.mxu1 %v6239_v58  ;;  %v6314_v58 = vld [vmem:[%s7022_s7 + $0xa94] ss:$8 sps:$4 sm:$0xff]   ;;  %v6309_v9 = vld [vmem:[%s7022_s7 + $0xba0] ss:$8 sps:$4 sm:$0xff]   ;;  %v6312_v0 = vld [vmem:[%s7022_s7 + $0xa90] ss:$8 sps:$4 sm:$0xff]  }
 0x1d5   : > { %v7476_v7 = vadd.f32 %v3863_v3, %v3823_v12  ;;  %4117 = vmatpush1.bf16.msra.mxu0 %v6234_v57  ;;  %v3865_v11 = vpop.f32.mrf.mxu1  ;;  %v6306_v57 = vld [vmem:[%s7022_s7 + $0xaa0] ss:$8 sps:$4 sm:$0xff]   ;;  %v6320_v12 = vld [vmem:[%s7022_s7 + $0xa84] ss:$8 sps:$4 sm:$0xff]   ;;  %v6315_v36 = vld [vmem:[%s7022_s7 + $0xb90] ss:$8 sps:$4 sm:$0xff]  }
 0x1d6   : > { %v3825_v41 = vpop.f32.mrf.mxu0  ;;  %4118 = vmatprep.subr.bf16.mxu0 %v6242_v62  ;;  %v6317_v62 = vld [vmem:[%s7022_s7 + $0xb94] ss:$8 sps:$4 sm:$0xff]  }
 0x1d7   : > { %4158 = vmatpush1.bf16.msra.mxu1 %v6237_v61  ;;  %v3866_v54 = vpop.f32.mrf.mxu1  ;;  %v485_v61 = vcombine.high %v371_v55, %v371_v55  ;;  %v6321_v41 = vld [vmem:[%s7022_s7 + $0xb80] ss:$8 sps:$4 sm:$0xff]   ;;  %v6375_v55 = vld [vmem:[%s7022_s7 + $0xcf4] ss:$8 sps:$4 sm:$0xff]  }
 0x1d8   : > { %4159 = vmatprep.subr.bf16.mxu1 %v6245_v6  ;;  %v6318_v6 = vld [vmem:[%s7022_s7 + $0xa80] ss:$8 sps:$4 sm:$0xff]   ;;  %v579_v54 = vpack.c.bf16 %v7444_v35, %v7444_v35 }
 0x1d9   : > { %4119 = vmatpush1.bf16.msra.mxu0 %v6240_v5  ;;  %v7535_v3 = vrot.slane %v485_v61, %v7089_v4  ;;  %v6323_v5 = vld [vmem:[%s7022_s7 + $0xb84] ss:$8 sps:$4 sm:$0xff]  }
 0x1da   : > { %4120 = vmatprep.subr.bf16.mxu0 %v6248_v10  ;;  %v6326_v10 = vld [vmem:[%s7022_s7 + $0xc74] ss:$8 sps:$4 sm:$0xff]   ;;  %v6381_v61 = vld [vmem:[%s7022_s7 + $0xce4] ss:$8 sps:$4 sm:$0xff]  }
 0x1db   : > { %4160 = vmatpush1.bf16.msra.mxu1 %v6243_v8  ;;  %v500_v8 = vcombine.high %v7530_v1, %v7530_v1  ;;  %v501_v11 = vcombine.high %v7535_v3, %v7535_v3 }
 0x1dc   : > { %4161 = vmatprep.subr.bf16.mxu1 %v6251_v14  ;;  %v6324_v14 = vld [vmem:[%s7022_s7 + $0xc70] ss:$8 sps:$4 sm:$0xff]  }
 0x1dd   : > { %4121 = vmatpush1.bf16.msra.mxu0 %v6246_v13  ;;  %v6330_v13 = vld [vmem:[%s7022_s7 + $0xd74] ss:$8 sps:$4 sm:$0xff]  }
 0x1de   : > { %4122 = vmatprep.subr.bf16.mxu0 %v6254_v59  ;;  %v584_v59 = vpack.c.bf16 %v500_v8, %v500_v8  ;;  %v6385_v8 = vld [vmem:[%s7022_s7 + $0xcd0] ss:$8 sps:$4 sm:$0xff]  }
 0x1df   : > { %4162 = vmatpush1.bf16.msra.mxu1 %v6249_v15  ;;  %v581_v15 = vpack.c.bf16 %v7448_v38, %v7448_v38  ;;  %v6339_v38 = vld [vmem:[%s7022_s7 + $0xc54] ss:$8 sps:$4 sm:$0xff]  }
 0x1e0   : > { %4163 = vmatprep.subr.bf16.mxu1 %v6257_v17  ;;  %v6328_v17 = vld [vmem:[%s7022_s7 + $0xd70] ss:$8 sps:$4 sm:$0xff]  }
 0x1e1   : > { %4123 = vmatpush1.bf16.msra.mxu0 %v6252_v16  ;;  %v6333_v16 = vld [vmem:[%s7022_s7 + $0xc64] ss:$8 sps:$4 sm:$0xff]  }
 0x1e2   : > { %4124 = vmatprep.subr.bf16.mxu0 %v6260_v18  ;;  %v586_v18 = vpack.c.bf16 %v501_v11, %v501_v11  ;;  %v6396_v11 = vld [vmem:[%s7022_s7 + $0xdc4] ss:$8 sps:$4 sm:$0xff]  }
 0x1e3   : > { %4164 = vmatpush1.bf16.msra.mxu1 %v6255_v19 }
 0x1e4   : > { %4165 = vmatprep.subr.bf16.mxu1 %v6263_v21  ;;  %v6331_v21 = vld [vmem:[%s7022_s7 + $0xc60] ss:$8 sps:$4 sm:$0xff]  }
 0x1e5   : > { %4125 = vmatpush1.bf16.msra.mxu0 %v6258_v20  ;;  %v6336_v20 = vld [vmem:[%s7022_s7 + $0xd64] ss:$8 sps:$4 sm:$0xff]  }
 0x1e6   : > { %4126 = vmatprep.subr.bf16.mxu0 %v6266_v22 }
 0x1e7   : > { %4166 = vmatpush1.bf16.msra.mxu1 %v6261_v23 }
 0x1e8   : > { %4167 = vmatprep.subr.bf16.mxu1 %v6269_v25 }
 0x1e9   : > { %4127 = vmatpush1.bf16.msra.mxu0 %v6264_v24 }
 0x1ea   : > { %4128 = vmatprep.subr.bf16.mxu0 %v6272_v26  ;;  %v6334_v26 = vld [vmem:[%s7022_s7 + $0xd60] ss:$8 sps:$4 sm:$0xff]  }
 0x1eb   : > { %4168 = vmatpush1.bf16.msra.mxu1 %v6267_v63 }
 0x1ec   : > { %4169 = vmatprep.subr.bf16.mxu1 %v6275_v28 }
 0x1ed   : > { %4129 = vmatpush1.bf16.msra.mxu0 %v6270_v27  ;;  %v6342_v27 = vld [vmem:[%s7022_s7 + $0xd54] ss:$8 sps:$4 sm:$0xff]  }
 0x1ee   : > { %4130 = vmatprep.subr.bf16.mxu0 %v6278_v29  ;;  %v6337_v29 = vld [vmem:[%s7022_s7 + $0xc50] ss:$8 sps:$4 sm:$0xff]  }
 0x1ef   : > { %4170 = vmatpush1.bf16.msra.mxu1 %v6273_v56 }
 0x1f0   : > { %4171 = vmatprep.subr.bf16.mxu1 %v6281_v31  ;;  %v6340_v31 = vld [vmem:[%s7022_s7 + $0xd50] ss:$8 sps:$4 sm:$0xff]  }
 0x1f1   : > { %4131 = vmatpush2.bf16.msra.mxu0 %v6276_v30  ;;  %v6345_v30 = vld [vmem:[%s7022_s7 + $0xc44] ss:$8 sps:$4 sm:$0xff]  }
 0x1f2   : > { %4132 = vmatprep.subr.bf16.mxu0 %v6284_v32 }
 0x1f3   : > { %4172 = vmatpush2.bf16.msra.mxu1 %v6279_v33  ;;  %v6348_v33 = vld [vmem:[%s7022_s7 + $0xd44] ss:$8 sps:$4 sm:$0xff]  }
 0x1f4   : > { %4173 = vmatprep.subr.bf16.mxu1 %v6287_v34  ;;  %v6351_v34 = vld [vmem:[%s7022_s7 + $0xc34] ss:$8 sps:$4 sm:$0xff]  }
 0x1f5   : > { %4133 = vmatpush2.bf16.msra.mxu0 %v6282_v60  ;;  %v6343_v60 = vld [vmem:[%s7022_s7 + $0xc40] ss:$8 sps:$4 sm:$0xff]  }
 0x1f6   : > { %4134 = vmatprep.subr.bf16.mxu0 %v6290_v37  ;;  %v6346_v37 = vld [vmem:[%s7022_s7 + $0xd40] ss:$8 sps:$4 sm:$0xff]  }
 0x1f7   : > { %4174 = vmatpush2.bf16.msra.mxu1 %v6285_v39  ;;  %v6354_v39 = vld [vmem:[%s7022_s7 + $0xd34] ss:$8 sps:$4 sm:$0xff]  }
 0x1f8   : > { %4175 = vmatprep.subr.bf16.mxu1 %v6293_v40  ;;  %v6349_v40 = vld [vmem:[%s7022_s7 + $0xc30] ss:$8 sps:$4 sm:$0xff]  }
 0x1f9   : > { %4135 = vmatpush2.bf16.msra.mxu0 %v6288_v42  ;;  %v6357_v42 = vld [vmem:[%s7022_s7 + $0xc24] ss:$8 sps:$4 sm:$0xff]  }
 0x1fa   : > { %4136 = vmatprep.subr.bf16.mxu0 %v6296_v43  ;;  %v6352_v43 = vld [vmem:[%s7022_s7 + $0xd30] ss:$8 sps:$4 sm:$0xff]  }
 0x1fb   : > { %4176 = vmatpush2.bf16.msra.mxu1 %v6291_v44  ;;  %v6360_v44 = vld [vmem:[%s7022_s7 + $0xd24] ss:$8 sps:$4 sm:$0xff]  }
 0x1fc   : > { %4177 = vmatprep.subr.bf16.mxu1 %v6299_v45  ;;  %v6355_v45 = vld [vmem:[%s7022_s7 + $0xc20] ss:$8 sps:$4 sm:$0xff]  }
 0x1fd   : > { %4137 = vmatpush2.bf16.msra.mxu0 %v6294_v46  ;;  %v6363_v46 = vld [vmem:[%s7022_s7 + $0xc14] ss:$8 sps:$4 sm:$0xff]  }
 0x1fe   : > { %4138 = vmatprep.subr.bf16.mxu0 %v6302_v47  ;;  %v6358_v47 = vld [vmem:[%s7022_s7 + $0xd20] ss:$8 sps:$4 sm:$0xff]  }
 0x1ff   : > { %4178 = vmatpush2.bf16.msra.mxu1 %v6297_v48  ;;  %v6366_v48 = vld [vmem:[%s7022_s7 + $0xd14] ss:$8 sps:$4 sm:$0xff]  }
 0x200   : > { %4179 = vmatprep.subr.bf16.mxu1 %v6305_v49  ;;  %v6361_v49 = vld [vmem:[%s7022_s7 + $0xc10] ss:$8 sps:$4 sm:$0xff]  }
 0x201   : > { %4139 = vmatpush2.bf16.msra.mxu0 %v6300_v50  ;;  %v6369_v50 = vld [vmem:[%s7022_s7 + $0xc04] ss:$8 sps:$4 sm:$0xff]  }
 0x202   : > { %4140 = vmatprep.subr.bf16.mxu0 %v6308_v51  ;;  %v6364_v51 = vld [vmem:[%s7022_s7 + $0xd10] ss:$8 sps:$4 sm:$0xff]  }
 0x203   : > { %4180 = vmatpush2.bf16.msra.mxu1 %v6303_v52  ;;  %v6372_v52 = vld [vmem:[%s7022_s7 + $0xd04] ss:$8 sps:$4 sm:$0xff]  }
 0x204   : > { %4181 = vmatprep.subr.bf16.mxu1 %v6311_v53  ;;  %v6367_v53 = vld [vmem:[%s7022_s7 + $0xc00] ss:$8 sps:$4 sm:$0xff]  }
 0x205   : > { %4141 = vmatpush2.bf16.msra.mxu0 %v6306_v57  ;;  %v6370_v57 = vld [vmem:[%s7022_s7 + $0xd00] ss:$8 sps:$4 sm:$0xff]  }
 0x206   : > { %4142 = vmatprep.subr.bf16.mxu0 %v6314_v58  ;;  %v6378_v58 = vld [vmem:[%s7022_s7 + $0xdf4] ss:$8 sps:$4 sm:$0xff]  }
 0x207   : > { %4182 = vmatpush2.bf16.msra.mxu1 %v6309_v9  ;;  %v6373_v9 = vld [vmem:[%s7022_s7 + $0xcf0] ss:$8 sps:$4 sm:$0xff]  }
 0x208   : > { %4183 = vmatprep.subr.bf16.mxu1 %v6317_v62  ;;  %v6376_v62 = vld [vmem:[%s7022_s7 + $0xdf0] ss:$8 sps:$4 sm:$0xff]  }
 0x209   : > { %4143 = vmatpush2.bf16.msra.mxu0 %v6312_v0  ;;  %v6384_v0 = vld [vmem:[%s7022_s7 + $0xde4] ss:$8 sps:$4 sm:$0xff]  }
 0x20a   : > { %4144 = vmatprep.subr.bf16.mxu0 %v6320_v12  ;;  %v6379_v12 = vld [vmem:[%s7022_s7 + $0xce0] ss:$8 sps:$4 sm:$0xff]  }
 0x20b   : > { %4184 = vmatpush2.bf16.msra.mxu1 %v6315_v36  ;;  %v6387_v36 = vld [vmem:[%s7022_s7 + $0xcd4] ss:$8 sps:$4 sm:$0xff]  }
 0x20c   : > { %4185 = vmatprep.subr.bf16.mxu1 %v6323_v5  ;;  %v6382_v5 = vld [vmem:[%s7022_s7 + $0xde0] ss:$8 sps:$4 sm:$0xff]  }
 0x20d   : > { %4145 = vmatpush2.bf16.msra.mxu0 %v6318_v6  ;;  %v6390_v6 = vld [vmem:[%s7022_s7 + $0xdd4] ss:$8 sps:$4 sm:$0xff]  }
 0x20e   : > { %4196 = vmatprep.subr.bf16.mxu0 %v6326_v10  ;;  %v6393_v10 = vld [vmem:[%s7022_s7 + $0xcc4] ss:$8 sps:$4 sm:$0xff]  }
 0x20f   : > { %4186 = vmatpush2.bf16.msra.mxu1 %v6321_v41  ;;  %v6388_v41 = vld [vmem:[%s7022_s7 + $0xdd0] ss:$8 sps:$4 sm:$0xff]  }
 0x210   : > { %v3902_v19 = vpop.f32.mrf.mxu0  ;;  %4147 = vmatmul.mubr.bf16.vlgmr.msra.gmra.mxu0 %v579_v54  ;;  %4237 = vmatprep.subr.bf16.mxu1 %v6330_v13  ;;  %v6391_v54 = vld [vmem:[%s7022_s7 + $0xcc0] ss:$8 sps:$4 sm:$0xff]   ;;  %v6399_v13 = vld [vmem:[%s7022_s7 + $0xcb4] ss:$8 sps:$4 sm:$0xff]  }
 0x211   : > { %v3903_v35 = vadd.f32 %v3902_v19, %v7472_v2  ;;  %4197 = vmatpush1.bf16.msra.mxu0 %v6324_v14  ;;  %4228 = vmatprep.mubr.bf16.mxu0 %v584_v59  ;;  %v6394_v14 = vld [vmem:[%s7022_s7 + $0xdc0] ss:$8 sps:$4 sm:$0xff]   ;;  %v6402_v59 = vld [vmem:[%s7022_s7 + $0xdb4] ss:$8 sps:$4 sm:$0xff]  }
 0x212   : > { %v3904_v22 = vpop.f32.mrf.mxu0  ;;  %v3943_v23 = vpop.f32.mrf.mxu1  ;;  %4188 = vmatmul.mubr.bf16.vlgmr.msra.gmra.mxu1 %v581_v15  ;;  %4198 = vmatprep.subr.bf16.mxu0 %v6333_v16  ;;  %v6397_v15 = vld [vmem:[%s7022_s7 + $0xcb0] ss:$8 sps:$4 sm:$0xff]   ;;  %v6405_v16 = vld [vmem:[%s7022_s7 + $0xca4] ss:$8 sps:$4 sm:$0xff]  }
 0x213   : > { %v3905_v24 = vadd.f32 %v3904_v22, %v7476_v7  ;;  %v7558_v25 = vadd.f32 %v3943_v23, %v3903_v35  ;;  %4238 = vmatpush1.bf16.msra.mxu1 %v6328_v17  ;;  %4269 = vmatprep.mubr.bf16.mxu1 %v586_v18  ;;  %v6400_v17 = vld [vmem:[%s7022_s7 + $0xdb0] ss:$8 sps:$4 sm:$0xff]   ;;  %v6408_v18 = vld [vmem:[%s7022_s7 + $0xda4] ss:$8 sps:$4 sm:$0xff]   ;;  %v6411_v35 = vld [vmem:[%s7022_s7 + $0xc94] ss:$8 sps:$4 sm:$0xff]  }
 0x214   : > { %v3906_v2 = vpop.f32.mrf.mxu0  ;;  %v3945_v63 = vpop.f32.mrf.mxu1  ;;  %4239 = vmatprep.subr.bf16.mxu1 %v6336_v20  ;;  %v372_v19 = vld [vmem:[%s7815_s0 + $0x38] sm:$0xff]  ;;  %v6403_v20 = vld [vmem:[%s7022_s7 + $0xca0] ss:$8 sps:$4 sm:$0xff]  }
 0x215   : > { %v7562_v28 = vadd.f32 %v3945_v63, %v3905_v24  ;;  %4199 = vmatpush1.bf16.msra.mxu0 %v6331_v21  ;;  %v6406_v21 = vld [vmem:[%s7022_s7 + $0xda0] ss:$8 sps:$4 sm:$0xff]   ;;  %v502_v22 = vcombine.high %v372_v19, %v372_v19  ;;  %v6414_v23 = vld [vmem:[%s7022_s7 + $0xd94] ss:$8 sps:$4 sm:$0xff]   ;;  %v7617_v24 = vrot.slane %v372_v19, %v7089_v4  ;;  %v6412_v2 = vld [vmem:[%s7022_s7 + $0xd90] ss:$8 sps:$4 sm:$0xff]  }
 0x216   : > { %v3907_v56 = vpop.f32.mrf.mxu0  ;;  %v3947_v7 = vpop.f32.mrf.mxu1  ;;  %4200 = vmatprep.subr.bf16.mxu0 %v6339_v38  ;;  %v6409_v38 = vld [vmem:[%s7022_s7 + $0xc90] ss:$8 sps:$4 sm:$0xff]   ;;  %v6472_v19 = vld [vmem:[%s7022_s7 + $0xef4] ss:$8 sps:$4 sm:$0xff]  }
 0x217   : > { %4240 = vmatpush1.bf16.msra.mxu1 %v6334_v26  ;;  %v6417_v26 = vld [vmem:[%s7022_s7 + $0xc84] ss:$8 sps:$4 sm:$0xff]   ;;  %v7622_v63 = vrot.slane %v502_v22, %v7089_v4  ;;  %v517_v56 = vcombine.high %v7617_v24, %v7617_v24  ;;  %v6423_v7 = vld [vmem:[%s7022_s7 + $0xe74] ss:$8 sps:$4 sm:$0xff]  }
 0x218   : > { %v3948_v32 = vpop.f32.mrf.mxu1  ;;  %4241 = vmatprep.subr.bf16.mxu1 %v6342_v27  ;;  %v6420_v27 = vld [vmem:[%s7022_s7 + $0xd84] ss:$8 sps:$4 sm:$0xff]  }
 0x219   : > { %4201 = vmatpush1.bf16.msra.mxu0 %v6337_v29  ;;  %v6415_v29 = vld [vmem:[%s7022_s7 + $0xc80] ss:$8 sps:$4 sm:$0xff]   ;;  %v583_v32 = vpack.c.bf16 %v7530_v1, %v7530_v1  ;;  %v6478_v22 = vld [vmem:[%s7022_s7 + $0xee4] ss:$8 sps:$4 sm:$0xff]  }
 0x21a   : > { %4202 = vmatprep.subr.bf16.mxu0 %v6345_v30  ;;  %v6418_v30 = vld [vmem:[%s7022_s7 + $0xd80] ss:$8 sps:$4 sm:$0xff]  }
 0x21b   : > { %4242 = vmatpush1.bf16.msra.mxu1 %v6340_v31  ;;  %v518_v31 = vcombine.high %v7622_v63, %v7622_v63 }
 0x21c   : > { %4243 = vmatprep.subr.bf16.mxu1 %v6348_v33  ;;  %v6427_v33 = vld [vmem:[%s7022_s7 + $0xf74] ss:$8 sps:$4 sm:$0xff]  }
 0x21d   : > { %4203 = vmatpush1.bf16.msra.mxu0 %v6343_v60  ;;  %v6421_v60 = vld [vmem:[%s7022_s7 + $0xe70] ss:$8 sps:$4 sm:$0xff]  }
 0x21e   : > { %4204 = vmatprep.subr.bf16.mxu0 %v6351_v34  ;;  %v588_v34 = vpack.c.bf16 %v517_v56, %v517_v56  ;;  %v6482_v56 = vld [vmem:[%s7022_s7 + $0xed0] ss:$8 sps:$4 sm:$0xff]  }
 0x21f   : > { %4244 = vmatpush1.bf16.msra.mxu1 %v6346_v37  ;;  %v585_v37 = vpack.c.bf16 %v7535_v3, %v7535_v3  ;;  %v6436_v3 = vld [vmem:[%s7022_s7 + $0xe54] ss:$8 sps:$4 sm:$0xff]  }
 0x220   : > { %4245 = vmatprep.subr.bf16.mxu1 %v6354_v39  ;;  %v6430_v39 = vld [vmem:[%s7022_s7 + $0xe64] ss:$8 sps:$4 sm:$0xff]  }
 0x221   : > { %4205 = vmatpush1.bf16.msra.mxu0 %v6349_v40  ;;  %v6425_v40 = vld [vmem:[%s7022_s7 + $0xf70] ss:$8 sps:$4 sm:$0xff]  }
 0x222   : > { %4206 = vmatprep.subr.bf16.mxu0 %v6357_v42  ;;  %v590_v42 = vpack.c.bf16 %v518_v31, %v518_v31  ;;  %v6493_v31 = vld [vmem:[%s7022_s7 + $0xfc4] ss:$8 sps:$4 sm:$0xff]  }
 0x223   : > { %4246 = vmatpush1.bf16.msra.mxu1 %v6352_v43 }
 0x224   : > { %4247 = vmatprep.subr.bf16.mxu1 %v6360_v44  ;;  %v6433_v44 = vld [vmem:[%s7022_s7 + $0xf64] ss:$8 sps:$4 sm:$0xff]  }
 0x225   : > { %4207 = vmatpush1.bf16.msra.mxu0 %v6355_v45  ;;  %v6428_v45 = vld [vmem:[%s7022_s7 + $0xe60] ss:$8 sps:$4 sm:$0xff]  }
 0x226   : > { %4208 = vmatprep.subr.bf16.mxu0 %v6363_v46 }
 0x227   : > { %4248 = vmatpush1.bf16.msra.mxu1 %v6358_v47 }
 0x228   : > { %4249 = vmatprep.subr.bf16.mxu1 %v6366_v48 }
 0x229   : > { %4209 = vmatpush1.bf16.msra.mxu0 %v6361_v49 }
 0x22a   : > { %4210 = vmatprep.subr.bf16.mxu0 %v6369_v50  ;;  %v6431_v50 = vld [vmem:[%s7022_s7 + $0xf60] ss:$8 sps:$4 sm:$0xff]  }
 0x22b   : > { %4250 = vmatpush1.bf16.msra.mxu1 %v6364_v51 }
 0x22c   : > { %4251 = vmatprep.subr.bf16.mxu1 %v6372_v52  ;;  %v6439_v52 = vld [vmem:[%s7022_s7 + $0xf54] ss:$8 sps:$4 sm:$0xff]  }
 0x22d   : > { %4211 = vmatpush1.bf16.msra.mxu0 %v6367_v53 }
 0x22e   : > { %4212 = vmatprep.subr.bf16.mxu0 %v6375_v55  ;;  %v6434_v55 = vld [vmem:[%s7022_s7 + $0xe50] ss:$8 sps:$4 sm:$0xff]  }
 0x22f   : > { %4252 = vmatpush1.bf16.msra.mxu1 %v6370_v57 }
 0x230   : > { %4253 = vmatprep.subr.bf16.mxu1 %v6378_v58  ;;  %v6442_v58 = vld [vmem:[%s7022_s7 + $0xe44] ss:$8 sps:$4 sm:$0xff]  }
 0x231   : > { %4213 = vmatpush2.bf16.msra.mxu0 %v6373_v9  ;;  %v6437_v9 = vld [vmem:[%s7022_s7 + $0xf50] ss:$8 sps:$4 sm:$0xff]  }
 0x232   : > { %4214 = vmatprep.subr.bf16.mxu0 %v6381_v61 }
 0x233   : > { %4254 = vmatpush2.bf16.msra.mxu1 %v6376_v62  ;;  %v6445_v62 = vld [vmem:[%s7022_s7 + $0xf44] ss:$8 sps:$4 sm:$0xff]  }
 0x234   : > { %4255 = vmatprep.subr.bf16.mxu1 %v6384_v0  ;;  %v6440_v0 = vld [vmem:[%s7022_s7 + $0xe40] ss:$8 sps:$4 sm:$0xff]  }
 0x235   : > { %4215 = vmatpush2.bf16.msra.mxu0 %v6379_v12  ;;  %v6448_v12 = vld [vmem:[%s7022_s7 + $0xe34] ss:$8 sps:$4 sm:$0xff]  }
 0x236   : > { %4216 = vmatprep.subr.bf16.mxu0 %v6387_v36  ;;  %v6443_v36 = vld [vmem:[%s7022_s7 + $0xf40] ss:$8 sps:$4 sm:$0xff]  }
 0x237   : > { %4256 = vmatpush2.bf16.msra.mxu1 %v6382_v5  ;;  %v6451_v5 = vld [vmem:[%s7022_s7 + $0xf34] ss:$8 sps:$4 sm:$0xff]  }
 0x238   : > { %4257 = vmatprep.subr.bf16.mxu1 %v6390_v6  ;;  %v6446_v6 = vld [vmem:[%s7022_s7 + $0xe30] ss:$8 sps:$4 sm:$0xff]  }
 0x239   : > { %4217 = vmatpush2.bf16.msra.mxu0 %v6385_v8  ;;  %v6454_v8 = vld [vmem:[%s7022_s7 + $0xe24] ss:$8 sps:$4 sm:$0xff]  }
 0x23a   : > { %4218 = vmatprep.subr.bf16.mxu0 %v6393_v10  ;;  %v6449_v10 = vld [vmem:[%s7022_s7 + $0xf30] ss:$8 sps:$4 sm:$0xff]  }
 0x23b   : > { %4258 = vmatpush2.bf16.msra.mxu1 %v6388_v41  ;;  %v6457_v41 = vld [vmem:[%s7022_s7 + $0xf24] ss:$8 sps:$4 sm:$0xff]  }
 0x23c   : > { %4259 = vmatprep.subr.bf16.mxu1 %v6396_v11  ;;  %v6452_v11 = vld [vmem:[%s7022_s7 + $0xe20] ss:$8 sps:$4 sm:$0xff]  }
 0x23d   : > { %4219 = vmatpush2.bf16.msra.mxu0 %v6391_v54  ;;  %v6460_v54 = vld [vmem:[%s7022_s7 + $0xe14] ss:$8 sps:$4 sm:$0xff]  }
 0x23e   : > { %4220 = vmatprep.subr.bf16.mxu0 %v6399_v13  ;;  %v6455_v13 = vld [vmem:[%s7022_s7 + $0xf20] ss:$8 sps:$4 sm:$0xff]  }
 0x23f   : > { %4260 = vmatpush2.bf16.msra.mxu1 %v6394_v14  ;;  %v6463_v14 = vld [vmem:[%s7022_s7 + $0xf14] ss:$8 sps:$4 sm:$0xff]  }
 0x240   : > { %4261 = vmatprep.subr.bf16.mxu1 %v6402_v59  ;;  %v6458_v59 = vld [vmem:[%s7022_s7 + $0xe10] ss:$8 sps:$4 sm:$0xff]  }
 0x241   : > { %4221 = vmatpush2.bf16.msra.mxu0 %v6397_v15  ;;  %v6466_v15 = vld [vmem:[%s7022_s7 + $0xe04] ss:$8 sps:$4 sm:$0xff]  }
 0x242   : > { %4222 = vmatprep.subr.bf16.mxu0 %v6405_v16  ;;  %v6461_v16 = vld [vmem:[%s7022_s7 + $0xf10] ss:$8 sps:$4 sm:$0xff]  }
 0x243   : > { %4262 = vmatpush2.bf16.msra.mxu1 %v6400_v17  ;;  %v6469_v17 = vld [vmem:[%s7022_s7 + $0xf04] ss:$8 sps:$4 sm:$0xff]  }
 0x244   : > { %4263 = vmatprep.subr.bf16.mxu1 %v6408_v18  ;;  %v6464_v18 = vld [vmem:[%s7022_s7 + $0xe00] ss:$8 sps:$4 sm:$0xff]  }
 0x245   : > { %4223 = vmatpush2.bf16.msra.mxu0 %v6403_v20  ;;  %v6467_v20 = vld [vmem:[%s7022_s7 + $0xf00] ss:$8 sps:$4 sm:$0xff]  }
 0x246   : > { %4224 = vmatprep.subr.bf16.mxu0 %v6411_v35  ;;  %v6475_v35 = vld [vmem:[%s7022_s7 + $0xff4] ss:$8 sps:$4 sm:$0xff]  }
 0x247   : > { %4264 = vmatpush2.bf16.msra.mxu1 %v6406_v21  ;;  %v6470_v21 = vld [vmem:[%s7022_s7 + $0xef0] ss:$8 sps:$4 sm:$0xff]  }
 0x248   : > { %4265 = vmatprep.subr.bf16.mxu1 %v6414_v23  ;;  %v6473_v23 = vld [vmem:[%s7022_s7 + $0xff0] ss:$8 sps:$4 sm:$0xff]  }
 0x249   : > { %4225 = vmatpush2.bf16.msra.mxu0 %v6409_v38  ;;  %v6481_v38 = vld [vmem:[%s7022_s7 + $0xfe4] ss:$8 sps:$4 sm:$0xff]  }
 0x24a   : > { %4226 = vmatprep.subr.bf16.mxu0 %v6417_v26  ;;  %v6476_v26 = vld [vmem:[%s7022_s7 + $0xee0] ss:$8 sps:$4 sm:$0xff]  }
 0x24b   : > { %4266 = vmatpush2.bf16.msra.mxu1 %v6412_v2  ;;  %v6484_v2 = vld [vmem:[%s7022_s7 + $0xed4] ss:$8 sps:$4 sm:$0xff]  }
 0x24c   : > { %4267 = vmatprep.subr.bf16.mxu1 %v6420_v27  ;;  %v6479_v27 = vld [vmem:[%s7022_s7 + $0xfe0] ss:$8 sps:$4 sm:$0xff]  }
 0x24d   : > { %4227 = vmatpush2.bf16.msra.mxu0 %v6415_v29  ;;  %v6487_v29 = vld [vmem:[%s7022_s7 + $0xfd4] ss:$8 sps:$4 sm:$0xff]  }
 0x24e   : > { %4278 = vmatprep.subr.bf16.mxu0 %v6423_v7  ;;  %v6490_v7 = vld [vmem:[%s7022_s7 + $0xec4] ss:$8 sps:$4 sm:$0xff]  }
 0x24f   : > { %4268 = vmatpush2.bf16.msra.mxu1 %v6418_v30  ;;  %v6485_v30 = vld [vmem:[%s7022_s7 + $0xfd0] ss:$8 sps:$4 sm:$0xff]  }
 0x250   : > { %v3984_v43 = vpop.f32.mrf.mxu0  ;;  %4229 = vmatmul.mubr.bf16.vlgmr.msra.gmra.mxu0 %v583_v32  ;;  %4319 = vmatprep.subr.bf16.mxu1 %v6427_v33  ;;  %v6488_v32 = vld [vmem:[%s7022_s7 + $0xec0] ss:$8 sps:$4 sm:$0xff]   ;;  %v6496_v33 = vld [vmem:[%s7022_s7 + $0xeb4] ss:$8 sps:$4 sm:$0xff]  }
 0x251   : > { %v3985_v1 = vadd.f32 %v3984_v43, %v7558_v25  ;;  %4279 = vmatpush1.bf16.msra.mxu0 %v6421_v60  ;;  %4310 = vmatprep.mubr.bf16.mxu0 %v588_v34  ;;  %v6491_v60 = vld [vmem:[%s7022_s7 + $0xfc0] ss:$8 sps:$4 sm:$0xff]   ;;  %v6499_v34 = vld [vmem:[%s7022_s7 + $0xfb4] ss:$8 sps:$4 sm:$0xff]  }
 0x252   : > { %v3986_v46 = vpop.f32.mrf.mxu0  ;;  %v4025_v47 = vpop.f32.mrf.mxu1  ;;  %4270 = vmatmul.mubr.bf16.vlgmr.msra.gmra.mxu1 %v585_v37  ;;  %4280 = vmatprep.subr.bf16.mxu0 %v6430_v39  ;;  %v6494_v37 = vld [vmem:[%s7022_s7 + $0xeb0] ss:$8 sps:$4 sm:$0xff]   ;;  %v6502_v39 = vld [vmem:[%s7022_s7 + $0xea4] ss:$8 sps:$4 sm:$0xff]   ;;  %v6500_v43 = vld [vmem:[%s7022_s7 + $0xea0] ss:$8 sps:$4 sm:$0xff]  }
 0x253   : > { %v3987_v48 = vadd.f32 %v3986_v46, %v7562_v28  ;;  %v7645_v49 = vadd.f32 %v4025_v47, %v3985_v1  ;;  %4320 = vmatpush1.bf16.msra.mxu1 %v6425_v40  ;;  %4351 = vmatprep.mubr.bf16.mxu1 %v590_v42  ;;  %v6497_v40 = vld [vmem:[%s7022_s7 + $0xfb0] ss:$8 sps:$4 sm:$0xff]   ;;  %v6505_v42 = vld [vmem:[%s7022_s7 + $0xfa4] ss:$8 sps:$4 sm:$0xff]   ;;  %v6503_v1 = vld [vmem:[%s7022_s7 + $0xfa0] ss:$8 sps:$4 sm:$0xff]  }
 0x254   : > { %v3988_v25 = vpop.f32.mrf.mxu0  ;;  %v4027_v51 = vpop.f32.mrf.mxu1  ;;  %4321 = vmatprep.subr.bf16.mxu1 %v6433_v44  ;;  %v6508_v44 = vld [vmem:[%s7022_s7 + $0xe94] ss:$8 sps:$4 sm:$0xff]   ;;  %v6506_v46 = vld [vmem:[%s7022_s7 + $0xe90] ss:$8 sps:$4 sm:$0xff]   ;;  %v6514_v47 = vld [vmem:[%s7022_s7 + $0xe84] ss:$8 sps:$4 sm:$0xff]  }
 0x255   : > { %v7649_v53 = vadd.f32 %v4027_v51, %v3987_v48  ;;  %4281 = vmatpush1.bf16.msra.mxu0 %v6428_v45  ;;  %v6511_v45 = vld [vmem:[%s7022_s7 + $0xf94] ss:$8 sps:$4 sm:$0xff]   ;;  %v6517_v48 = vld [vmem:[%s7022_s7 + $0xf84] ss:$8 sps:$4 sm:$0xff]   ;;  %v6515_v51 = vld [vmem:[%s7022_s7 + $0xf80] ss:$8 sps:$4 sm:$0xff]  }
 0x256   : > { %v3989_v57 = vpop.f32.mrf.mxu0  ;;  %v4029_v28 = vpop.f32.mrf.mxu1  ;;  %4282 = vmatprep.subr.bf16.mxu0 %v6436_v3  ;;  %v6509_v3 = vld [vmem:[%s7022_s7 + $0xf90] ss:$8 sps:$4 sm:$0xff]   ;;  %v6521_v25 = vld [vmem:[%s7022_s7 + $0x1014] ss:$8 sps:$4 sm:$0xff]  }
 0x257   : > { %4322 = vmatpush1.bf16.msra.mxu1 %v6431_v50  ;;  %v6512_v50 = vld [vmem:[%s7022_s7 + $0xe80] ss:$8 sps:$4 sm:$0xff]   ;;  %v589_v57 = vpack.c.bf16 %v7622_v63, %v7622_v63  ;;  %v6524_v28 = vld [vmem:[%s7022_s7 + $0x1004] ss:$8 sps:$4 sm:$0xff]  }
 0x258   : > { %v4030_v61 = vpop.f32.mrf.mxu1  ;;  %4323 = vmatprep.subr.bf16.mxu1 %v6439_v52  ;;  %v587_v52 = vpack.c.bf16 %v7617_v24, %v7617_v24  ;;  %v5076_v24 = vld.sshfl [vmem:[%s7815_s0 + $0x40] sm:$0x3 pattern:$0x76325410] }
 0x259   : > { %4283 = vmatpush1.bf16.msra.mxu0 %v6434_v55  ;;  %v6519_v55 = vld [vmem:[%s7022_s7 + $0x1010] ss:$8 sps:$4 sm:$0xff]   ;;  %v6522_v61 = vld [vmem:[%s7022_s7 + $0x1000] ss:$8 sps:$4 sm:$0xff]   ;;  %s6823_s7 = smov [#allocation10]  }
 0x25a   : > { %4284 = vmatprep.subr.bf16.mxu0 %v6442_v58  ;;  %s4955_s16 = sshll.u32 %s6823_s7, 4  ;;  %s4956_s16 = int_to_ptr.vmem [resolvable:$true] %s4955_s16 }
 0x25b   : > { %4324 = vmatpush1.bf16.msra.mxu1 %v6437_v9  ;;  %p6746_p12 = scmp.lt.s32.totalorder %s4956_s16, %s4956_s16 }
 0x25c   : > { %4325 = vmatprep.subr.bf16.mxu1 %v6445_v62  ;;  %v6822_v62 = vmov 0  }
 0x25d   : > { %4285 = vmatpush1.bf16.msra.mxu0 %v6440_v0 }
 0x25e   : > { %4286 = vmatprep.subr.bf16.mxu0 %v6448_v12 }
 0x25f   : > { %4326 = vmatpush1.bf16.msra.mxu1 %v6443_v36 }
 0x260   : > { %4327 = vmatprep.subr.bf16.mxu1 %v6451_v5 }
 0x261   : > { %4287 = vmatpush1.bf16.msra.mxu0 %v6446_v6 }
 0x262   : > { %4288 = vmatprep.subr.bf16.mxu0 %v6454_v8 }
 0x263   : > { %4328 = vmatpush1.bf16.msra.mxu1 %v6449_v10 }
 0x264   : > { %4329 = vmatprep.subr.bf16.mxu1 %v6457_v41 }
 0x265   : > { %4289 = vmatpush1.bf16.msra.mxu0 %v6452_v11 }
 0x266   : > { %4290 = vmatprep.subr.bf16.mxu0 %v6460_v54 }
 0x267   : > { %4330 = vmatpush1.bf16.msra.mxu1 %v6455_v13 }
 0x268   : > { %4331 = vmatprep.subr.bf16.mxu1 %v6463_v14 }
 0x269   : > { %4291 = vmatpush1.bf16.msra.mxu0 %v6458_v59 }
 0x26a   : > { %4292 = vmatprep.subr.bf16.mxu0 %v6466_v15 }
 0x26b   : > { %4332 = vmatpush1.bf16.msra.mxu1 %v6461_v16  ;;  %v6527_v16 = vld [vmem:[%s7035_s17 + $0xe4] ss:$16 sps:$4 sm:$0xff]  }
 0x26c   : > { %4333 = vmatprep.subr.bf16.mxu1 %v6469_v17  ;;  %v6530_v17 = vld [vmem:[%s7035_s17 + $0xec] ss:$16 sps:$4 sm:$0xff]  }
 0x26d   : > { %4293 = vmatpush1.bf16.msra.mxu0 %v6464_v18 }
 0x26e   : > { %4294 = vmatprep.subr.bf16.mxu0 %v6472_v19 }
 0x26f   : > { %4334 = vmatpush1.bf16.msra.mxu1 %v6467_v20  ;;  %v6525_v20 = vld [vmem:[%s7035_s17 + $0xe0] ss:$16 sps:$4 sm:$0xff]  }
 0x270   : > { %4335 = vmatprep.subr.bf16.mxu1 %v6475_v35  ;;  %v6528_v35 = vld [vmem:[%s7035_s17 + $0xe8] ss:$16 sps:$4 sm:$0xff]  }
 0x271   : > { %4295 = vmatpush2.bf16.msra.mxu0 %v6470_v21 }
 0x272   : > { %4296 = vmatprep.subr.bf16.mxu0 %v6478_v22 }
 0x273   : > { %4336 = vmatpush2.bf16.msra.mxu1 %v6473_v23 }
 0x274   : > { %4337 = vmatprep.subr.bf16.mxu1 %v6481_v38  ;;  %v6533_v38 = vld [vmem:[%s7035_s17 + $0xc4] ss:$16 sps:$4 sm:$0xff]  }
 0x275   : > { %4297 = vmatpush2.bf16.msra.mxu0 %v6476_v26  ;;  %v6536_v26 = vld [vmem:[%s7035_s17 + $0xcc] ss:$16 sps:$4 sm:$0xff]  }
 0x276   : > { %4298 = vmatprep.subr.bf16.mxu0 %v6484_v2 }
 0x277   : > { %4338 = vmatpush2.bf16.msra.mxu1 %v6479_v27  ;;  %v6531_v27 = vld [vmem:[%s7035_s17 + $0xc0] ss:$16 sps:$4 sm:$0xff]  }
 0x278   : > { %4339 = vmatprep.subr.bf16.mxu1 %v6487_v29  ;;  %v6534_v29 = vld [vmem:[%s7035_s17 + $0xc8] ss:$16 sps:$4 sm:$0xff]  }
 0x279   : > { %4299 = vmatpush2.bf16.msra.mxu0 %v6482_v56  ;;  %v6539_v56 = vld [vmem:[%s7035_s17 + $0xa4] ss:$16 sps:$4 sm:$0xff]  }
 0x27a   : > { %4300 = vmatprep.subr.bf16.mxu0 %v6490_v7  ;;  %v6542_v7 = vld [vmem:[%s7035_s17 + $0xac] ss:$16 sps:$4 sm:$0xff]  }
 0x27b   : > { %4340 = vmatpush2.bf16.msra.mxu1 %v6485_v30  ;;  %v6537_v30 = vld [vmem:[%s7035_s17 + $0xa0] ss:$16 sps:$4 sm:$0xff]  }
 0x27c   : > { %4341 = vmatprep.subr.bf16.mxu1 %v6493_v31  ;;  %v6540_v31 = vld [vmem:[%s7035_s17 + $0xa8] ss:$16 sps:$4 sm:$0xff]  }
 0x27d   : > { %4301 = vmatpush2.bf16.msra.mxu0 %v6488_v32  ;;  %v6545_v32 = vld [vmem:[%s7035_s17 + $0x84] ss:$16 sps:$4 sm:$0xff]  }
 0x27e   : > { %4302 = vmatprep.subr.bf16.mxu0 %v6496_v33  ;;  %v6548_v33 = vld [vmem:[%s7035_s17 + $0x8c] ss:$16 sps:$4 sm:$0xff]  }
 0x27f   : > { %4342 = vmatpush2.bf16.msra.mxu1 %v6491_v60  ;;  %v6543_v60 = vld [vmem:[%s7035_s17 + $0x80] ss:$16 sps:$4 sm:$0xff]  }
 0x280   : > { %4343 = vmatprep.subr.bf16.mxu1 %v6499_v34  ;;  %v6546_v34 = vld [vmem:[%s7035_s17 + $0x88] ss:$16 sps:$4 sm:$0xff]  }
 0x281   : > { %4303 = vmatpush2.bf16.msra.mxu0 %v6494_v37  ;;  %v6551_v37 = vld [vmem:[%s7035_s17 + $0x64] ss:$16 sps:$4 sm:$0xff]  }
 0x282   : > { %4304 = vmatprep.subr.bf16.mxu0 %v6502_v39  ;;  %v6554_v39 = vld [vmem:[%s7035_s17 + $0x6c] ss:$16 sps:$4 sm:$0xff]  }
 0x283   : > { %4344 = vmatpush2.bf16.msra.mxu1 %v6497_v40  ;;  %v6549_v40 = vld [vmem:[%s7035_s17 + $0x60] ss:$16 sps:$4 sm:$0xff]  }
 0x284   : > { %4345 = vmatprep.subr.bf16.mxu1 %v6505_v42  ;;  %v6552_v42 = vld [vmem:[%s7035_s17 + $0x68] ss:$16 sps:$4 sm:$0xff]  }
 0x285   : > { %4305 = vmatpush2.bf16.msra.mxu0 %v6500_v43  ;;  %v6557_v43 = vld [vmem:[%s7035_s17 + $0x44] ss:$16 sps:$4 sm:$0xff]  }
 0x286   : > { %4306 = vmatprep.subr.bf16.mxu0 %v6508_v44  ;;  %v6560_v44 = vld [vmem:[%s7035_s17 + $0x4c] ss:$16 sps:$4 sm:$0xff]  }
 0x287   : > { %4346 = vmatpush2.bf16.msra.mxu1 %v6503_v1  ;;  %v6555_v1 = vld [vmem:[%s7035_s17 + $0x40] ss:$16 sps:$4 sm:$0xff]  }
 0x288   : > { %4347 = vmatprep.subr.bf16.mxu1 %v6511_v45  ;;  %v6558_v45 = vld [vmem:[%s7035_s17 + $0x48] ss:$16 sps:$4 sm:$0xff]  }
 0x289   : > { %4307 = vmatpush2.bf16.msra.mxu0 %v6506_v46  ;;  %v6563_v46 = vld [vmem:[%s7035_s17 + $0x24] ss:$16 sps:$4 sm:$0xff]  }
 0x28a   : > { %4308 = vmatprep.subr.bf16.mxu0 %v6514_v47  ;;  %v6566_v47 = vld [vmem:[%s7035_s17 + $0x2c] ss:$16 sps:$4 sm:$0xff]  }
 0x28b   : > { %4348 = vmatpush2.bf16.msra.mxu1 %v6509_v3  ;;  %v6561_v3 = vld [vmem:[%s7035_s17 + $0x20] ss:$16 sps:$4 sm:$0xff]  }
 0x28c   : > { %4349 = vmatprep.subr.bf16.mxu1 %v6517_v48  ;;  %v6564_v48 = vld [vmem:[%s7035_s17 + $0x28] ss:$16 sps:$4 sm:$0xff]  }
 0x28d   : > { %4309 = vmatpush2.bf16.msra.mxu0 %v6512_v50  ;;  %v6569_v50 = vld [vmem:[%s7035_s17 + $0x4] ss:$16 sps:$4 sm:$0xff]  }
 0x28e   : > { %4372 = vmatprep.subr.bf16.mxu0 %v6521_v25  ;;  %v6572_v25 = vld [vmem:[%s7035_s17 + $0xc] ss:$16 sps:$4 sm:$0xff]  }
 0x28f   : > { %4350 = vmatpush2.bf16.msra.mxu1 %v6515_v51  ;;  %v6567_v51 = vld [vmem:[%s7035_s17] ss:$16 sps:$4 sm:$0xff]  }
 0x290   : > { %v4066_v58 = vpop.f32.mrf.mxu0  ;;  %4311 = vmatmul.mubr.bf16.vlgmr.msra.gmra.mxu0 %v587_v52  ;;  %4842 = vmatprep.subr.bf16.mxu1 %v6527_v16  ;;  %v6570_v52 = vld [vmem:[%s7035_s17 + $0x8] ss:$16 sps:$4 sm:$0xff]   ;;  %v6611_v16 = vld [vmem:[%s7035_s17 + $0x124] ss:$16 sps:$4 sm:$0xff]  }
 0x291   : > { %v4067_v9 = vadd.f32 %v4066_v58, %v7645_v49  ;;  %4373 = vmatpush1.bf16.msra.mxu0 %v6519_v55  ;;  %4392 = vmatprep.mubr.bf16.mxu0 %v6822_v62  ;;  %v591_v49 = vpack.c.bf16 %v5076_v24, %v5076_v24  ;;  %v6575_v55 = vld [vmem:[%s7035_s17 + $0x1e4] ss:$16 sps:$4 sm:$0xff]   ;;  %v6576_v58 = vld [vmem:[%s7035_s17 + $0x1e8] ss:$16 sps:$4 sm:$0xff]   ;;  %v6579_v62 = vld [vmem:[%s7035_s17 + $0x1c0] ss:$16 sps:$4 sm:$0xff]  }
 0x292   : > { %4352 = vmatmul.mubr.bf16.vlgmr.msra.gmra.mxu1 %v589_v57  ;;  %v4068_v0 = vpop.f32.mrf.mxu0  ;;  %v4107_v12 = vpop.f32.mrf.mxu1  ;;  %4374 = vmatprep.subr.bf16.mxu0 %v6524_v28  ;;  %v6578_v57 = vld [vmem:[%s7035_s17 + $0x1ec] ss:$16 sps:$4 sm:$0xff]   ;;  %v6573_v28 = vld [vmem:[%s7035_s17 + $0x1e0] ss:$16 sps:$4 sm:$0xff]   ;;  %v6582_v24 = vld [vmem:[%s7035_s17 + $0x1c8] ss:$16 sps:$4 sm:$0xff]  }
 0x293   : > { %v4069_v63 = vadd.f32 %v4068_v0, %v7649_v53  ;;  %v4108_v36 = vadd.f32 %v4107_v12, %v4067_v9  ;;  %4843 = vmatpush1.bf16.msra.mxu1 %v6525_v20  ;;  %v6581_v9 = vld [vmem:[%s7035_s17 + $0x1c4] ss:$16 sps:$4 sm:$0xff]   ;;  %v6590_v12 = vld [vmem:[%s7035_s17 + $0x1ac] ss:$16 sps:$4 sm:$0xff]   ;;  %v6615_v20 = vld [vmem:[%s7035_s17 + $0x100] ss:$16 sps:$4 sm:$0xff]  }
 0x294   : > { %v4070_v5 = vpop.f32.mrf.mxu0  ;;  %v4109_v6 = vpop.f32.mrf.mxu1  ;;  %4844 = vmatprep.subr.bf16.mxu1 %v6533_v38  ;;  %v6587_v0 = vld [vmem:[%s7035_s17 + $0x1a4] ss:$16 sps:$4 sm:$0xff]  }
 0x295   : > { %v4110_v8 = vadd.f32 %v4109_v6, %v4069_v63  ;;  %4375 = vmatpush1.bf16.msra.mxu0 %v6522_v61  ;;  %v6584_v61 = vld [vmem:[%s7035_s17 + $0x1cc] ss:$16 sps:$4 sm:$0xff]   ;;  %v6585_v63 = vld [vmem:[%s7035_s17 + $0x1a0] ss:$16 sps:$4 sm:$0xff]   ;;  %v6593_v5 = vld [vmem:[%s7035_s17 + $0x184] ss:$16 sps:$4 sm:$0xff]  }
 0x296   : > { %v4071_v10 = vpop.f32.mrf.mxu0  ;;  %v4111_v41 = vpop.f32.mrf.mxu1  ;;  %4883 = vmatprep.subr.bf16.mxu0 %v6530_v17  ;;  %v6596_v6 = vld [vmem:[%s7035_s17 + $0x18c] ss:$16 sps:$4 sm:$0xff]  }
 0x297   : > { %4845 = vmatpush1.bf16.msra.mxu1 %v6531_v27  ;;  %v6599_v10 = vld [vmem:[%s7035_s17 + $0x164] ss:$16 sps:$4 sm:$0xff]   ;;  %v6602_v41 = vld [vmem:[%s7035_s17 + $0x16c] ss:$16 sps:$4 sm:$0xff]  }
 0x298   : > { %v4112_v11 = vpop.f32.mrf.mxu1  ;;  %5593 = vmatmul.mubr.msk.bf16.vlgmr.msra.gmra.mxu0 %vm3700_vm0, %v591_v49  ;;  %4846 = vmatprep.subr.bf16.mxu1 %v6539_v56  ;;  %v6591_v49 = vld [vmem:[%s7035_s17 + $0x180] ss:$16 sps:$4 sm:$0xff]   ;;  %v6614_v17 = vld [vmem:[%s7035_s17 + $0x12c] ss:$16 sps:$4 sm:$0xff]  }
 0x299   : > { %4884 = vmatpush1.bf16.msra.mxu0 %v6528_v35  ;;  %v6597_v11 = vld [vmem:[%s7035_s17 + $0x160] ss:$16 sps:$4 sm:$0xff]   ;;  %v6617_v35 = vld [vmem:[%s7035_s17 + $0x104] ss:$16 sps:$4 sm:$0xff]  }
 0x29a   : > { %4885 = vmatprep.subr.bf16.mxu0 %v6536_v26 }
 0x29b   : > { %4847 = vmatpush1.bf16.msra.mxu1 %v6537_v30 }
 0x29c   : > { %4848 = vmatprep.subr.bf16.mxu1 %v6545_v32 }
 0x29d   : > { %4886 = vmatpush1.bf16.msra.mxu0 %v6534_v29 }
 0x29e   : > { %4887 = vmatprep.subr.bf16.mxu0 %v6542_v7 }
 0x29f   : > { %4849 = vmatpush1.bf16.msra.mxu1 %v6543_v60 }
 0x2a0   : > { %4850 = vmatprep.subr.bf16.mxu1 %v6551_v37 }
 0x2a1   : > { %4888 = vmatpush1.bf16.msra.mxu0 %v6540_v31 }
 0x2a2   : > { %4889 = vmatprep.subr.bf16.mxu0 %v6548_v33 }
 0x2a3   : > { %4851 = vmatpush1.bf16.msra.mxu1 %v6549_v40 }
 0x2a4   : > { %4852 = vmatprep.subr.bf16.mxu1 %v6557_v43 }
 0x2a5   : > { %4890 = vmatpush1.bf16.msra.mxu0 %v6546_v34 }
 0x2a6   : > { %4891 = vmatprep.subr.bf16.mxu0 %v6554_v39 }
 0x2a7   : > { %4853 = vmatpush1.bf16.msra.mxu1 %v6555_v1 }
 0x2a8   : > { %4854 = vmatprep.subr.bf16.mxu1 %v6563_v46 }
 0x2a9   : > { %4892 = vmatpush1.bf16.msra.mxu0 %v6552_v42 }
 0x2aa   : > { %4893 = vmatprep.subr.bf16.mxu0 %v6560_v44 }
 0x2ab   : > { %4855 = vmatpush1.bf16.msra.mxu1 %v6561_v3 }
 0x2ac   : > { %4856 = vmatprep.subr.bf16.mxu1 %v6569_v50 }
 0x2ad   : > { %4894 = vmatpush1.bf16.msra.mxu0 %v6558_v45 }
 0x2ae   : > { %4895 = vmatprep.subr.bf16.mxu0 %v6566_v47 }
 0x2af   : > { %4857 = vmatpush1.bf16.msra.mxu1 %v6567_v51 }
 0x2b0   : > { %4858 = vmatprep.subr.bf16.mxu1 %v6575_v55 }
 0x2b1   : > { %4896 = vmatpush1.bf16.msra.mxu0 %v6564_v48 }
 0x2b2   : > { %4897 = vmatprep.subr.bf16.mxu0 %v6572_v25 }
 0x2b3   : > { %4859 = vmatpush2.bf16.msra.mxu1 %v6573_v28 }
 0x2b4   : > { %4860 = vmatprep.subr.bf16.mxu1 %v6581_v9 }
 0x2b5   : > { %4898 = vmatpush1.bf16.msra.mxu0 %v6570_v52 }
 0x2b6   : > { %4899 = vmatprep.subr.bf16.mxu0 %v6578_v57 }
 0x2b7   : > { %4861 = vmatpush2.bf16.msra.mxu1 %v6579_v62 }
 0x2b8   : > { %4862 = vmatprep.subr.bf16.mxu1 %v6587_v0 }
 0x2b9   : > { %4900 = vmatpush2.bf16.msra.mxu0 %v6576_v58 }
 0x2ba   : > { %4901 = vmatprep.subr.bf16.mxu0 %v6584_v61 }
 0x2bb   : > { %4863 = vmatpush2.bf16.msra.mxu1 %v6585_v63 }
 0x2bc   : > { %4864 = vmatprep.subr.bf16.mxu1 %v6593_v5 }
 0x2bd   : > { %4902 = vmatpush2.bf16.msra.mxu0 %v6582_v24 }
 0x2be   : > { %4903 = vmatprep.subr.bf16.mxu0 %v6590_v12 }
 0x2bf   : > { %4865 = vmatpush2.bf16.msra.mxu1 %v6591_v49 }
 0x2c0   : > { %4866 = vmatprep.subr.bf16.mxu1 %v6599_v10 }
 0x2c3   : > { %4867 = vmatpush2.bf16.msra.mxu1 %v6597_v11 }
 0x2d0   : > { %v4148_v54 = vpop.f32.mrf.mxu0 }
 0x2d1   : > { %v4149_v13 = vadd.f32 %v4148_v54, %v4108_v36  ;;  %v6588_v36 = vld [vmem:[%s7035_s17 + $0x1a8] ss:$16 sps:$4 sm:$0xff]  }
 0x2d2   : > { %v4150_v14 = vpop.f32.mrf.mxu0  ;;  %v4189_v59 = vpop.f32.mrf.mxu1  ;;  %4904 = vmatpush2.bf16.msra.mxu0 %v6588_v36  ;;  %v6600_v54 = vld [vmem:[%s7035_s17 + $0x168] ss:$16 sps:$4 sm:$0xff]  }
 0x2d3   : > { %v4151_v53 = vadd.f32 %v4150_v14, %v4110_v8  ;;  %v7718_v15 = vadd.f32 %v4189_v59, %v4149_v13  ;;  %v6594_v8 = vld [vmem:[%s7035_s17 + $0x188] ss:$16 sps:$4 sm:$0xff]   ;;  %4905 = vmatprep.subr.bf16.mxu0 %v6596_v6  ;;  %v6605_v13 = vld [vmem:[%s7035_s17 + $0x144] ss:$16 sps:$4 sm:$0xff]   ;;  %v6608_v14 = vld [vmem:[%s7035_s17 + $0x14c] ss:$16 sps:$4 sm:$0xff]  }
 0x2d4   : > { %v4152_v18 = vpop.f32.mrf.mxu0  ;;  %v4191_v19 = vpop.f32.mrf.mxu1  ;;  %v6603_v59 = vld [vmem:[%s7035_s17 + $0x140] ss:$16 sps:$4 sm:$0xff]   ;;  %4868 = vmatprep.subr.bf16.mxu1 %v6605_v13 }
 0x2d5   : > { %v7724_v21 = vadd.f32 %v4191_v19, %v4151_v53  ;;  %v6606_v53 = vld [vmem:[%s7035_s17 + $0x148] ss:$16 sps:$4 sm:$0xff]   ;;  %4869 = vmatpush2.bf16.msra.mxu1 %v6603_v59  ;;  %v6609_v18 = vld [vmem:[%s7035_s17 + $0x120] ss:$16 sps:$4 sm:$0xff]  }
 0x2d6   : > { %v4153_v22 = vpop.f32.mrf.mxu0  ;;  %v4193_v23 = vpop.f32.mrf.mxu1  ;;  %4906 = vmatpush2.bf16.msra.mxu0 %v6594_v8  ;;  %v6612_v19 = vld [vmem:[%s7035_s17 + $0x128] ss:$16 sps:$4 sm:$0xff]   ;;  %4870 = vmatprep.subr.bf16.mxu1 %v6611_v16 }
 0x2d7   : > { %4907 = vmatprep.subr.bf16.mxu0 %v6602_v41  ;;  %v6618_v22 = vld [vmem:[%s7035_s17 + $0x108] ss:$16 sps:$4 sm:$0xff]   ;;  %v6620_v23 = vld [vmem:[%s7035_s17 + $0x10c] ss:$16 sps:$4 sm:$0xff]   ;;  %s6739_s17 = scalar_lea.vmem %s4956_s16, 128 }
 0x2d8   : > { %v4194_v2 = vpop.f32.mrf.mxu1  ;;  %p6740_p10 = scmp.ne.s32.totalorder %s4956_s16, %s6739_s17  ;;  %p6747_p2 = scmp.lt.s32.totalorder %s6739_s17, %s6739_s17 }
 0x2d9   : > { %4871 = vmatpush2.bf16.msra.mxu1 %v6609_v18 }
 0x2da   : > { %4908 = vmatpush2.bf16.msra.mxu0 %v6600_v54  ;;  %4872 = vmatprep.subr.bf16.mxu1 %v6617_v35  ;;  %p6741_p3 = pnand %p6740_p10, %p5699_p8  ;;  %p6748_p4 = por %p6747_p2, %p6746_p12 }
 0x2db   : > { %4909 = vmatprep.subr.bf16.mxu0 %v6608_v14 }
 0x2dc   : > { %p6742_p11 = pneg %p6741_p3 }
 0x2dd   : > { %4873 = vmatpush2.bf16.msra.mxu1 %v6615_v20 }
 0x2de   : > { %4910 = vmatpush2.bf16.msra.mxu0 %v6606_v53  ;;  %p6749_p9 = pnand %p6748_p4, %p6742_p11 }
 0x2df   : > { %4911 = vmatprep.subr.bf16.mxu0 %v6614_v17 }
 0x2e2   : > { %4912 = vmatpush2.bf16.msra.mxu0 %v6612_v19 }
 0x2e3   : > { %4913 = vmatprep.subr.bf16.mxu0 %v6620_v23 }
 0x2e6   : > { %4914 = vmatpush2.bf16.msra.mxu0 %v6618_v22 }
 0x310   : > { %v4230_v38 = vpop.f32.mrf.mxu0 }
 0x311   : > { %v4231_v26 = vadd.f32 %v4230_v38, %v7718_v15 }
 0x312   : > { %v4232_v2 = vpop.f32.mrf.mxu0  ;;  %v4271_v27 = vpop.f32.mrf.mxu1 }
 0x313   : > { %v4233_v29 = vadd.f32 %v4232_v2, %v7724_v21  ;;  %v4272_v56 = vadd.f32 %v4271_v27, %v4231_v26 }
 0x314   : > { %v4234_v7 = vpop.f32.mrf.mxu0  ;;  %v4273_v30 = vpop.f32.mrf.mxu1 }
 0x315   : > { %v4274_v31 = vadd.f32 %v4273_v30, %v4233_v29 }
 0x316   : > { %v4235_v32 = vpop.f32.mrf.mxu0  ;;  %v4275_v33 = vpop.f32.mrf.mxu1 }
 0x318   : > { %v4276_v60 = vpop.f32.mrf.mxu1 }
 0x350   : > { %v4312_v34 = vpop.f32.mrf.mxu0 }
 0x351   : > { %v4313_v40 = vadd.f32 %v4312_v34, %v4272_v56 }
 0x352   : > { %v4353_v37 = vpop.f32.mrf.mxu1  ;;  %v4314_v39 = vpop.f32.mrf.mxu0 }
 0x353   : > { %v4315_v43 = vadd.f32 %v4314_v39, %v4274_v31  ;;  %v4354_v45 = vadd.f32 %v4353_v37, %v4313_v40 }
 0x354   : > { %v4355_v42 = vpop.f32.mrf.mxu1  ;;  %v4316_v15 = vpop.f32.mrf.mxu0 }
 0x355   : > { %v4356_v21 = vadd.f32 %v4355_v42, %v4315_v43 }
 0x356   : > { %v4357_v44 = vpop.f32.mrf.mxu1  ;;  %v4317_v1 = vpop.f32.mrf.mxu0 }
 0x358   : > { %v4358_v46 = vpop.f32.mrf.mxu1  ;;  %v4394_v47 = vpop.f32.mrf.mxu0 }
 0x359   : > { %v4395_v3 = vadd.f32 %v4394_v47, %v4354_v45 }
 0x35a   : > { %v4396_v48 = vpop.f32.mrf.mxu0 }
 0x35b   : > { %v4403_v50 = vmul.f32 0.70710677, %v4395_v3  ;;  %v4397_v25 = vadd.f32 %v4396_v48, %v4356_v21  ;;  %v4401_v60 = vmul.f32 0.5, %v4395_v3 }
 0x35c   : > { %v4398_v51 = vpop.f32.mrf.mxu0 }
 0x35d   : > { %v4405_v52 = vand.u32 2147483647, %v4403_v50  ;;  %v4404_v55 = vmul.f32 0.70710677, %v4397_v25  ;;  %vm4445_vm1 = vcmp.lt.f32.partialorder %v4403_v50, 0.0  ;;  %v4402_v37 = vmul.f32 0.5, %v4397_v25 }
 0x35e   : > { %v4399_v57 = vpop.f32.mrf.mxu0 }
 0x35f   : > { %v4407_v28 = vmul.f32 0.3275911, %v4405_v52  ;;  %v4406_v58 = vand.u32 2147483647, %v4404_v55  ;;  %v4433_v24 = vsub.f32 0.0, %v4405_v52  ;;  %vm4446_vm2 = vcmp.lt.f32.partialorder %v4404_v55, 0.0 }
 0x360   : > { %v4455_v55 = vld [vmem:[#allocation10] sm:$0xff] }
 0x361   : > { %v4409_v9 = vadd.f32 1.0, %v4407_v28  ;;  %v4408_v61 = vmul.f32 0.3275911, %v4406_v58  ;;  %v4434_v0 = vsub.f32 0.0, %v4406_v58  ;;  %v4435_v12 = vmul.f32 %v4433_v24, %v4405_v52 }
 0x363   : > { %6621 = vrcp.f32 %v4409_v9  ;;  %v4410_v62 = vadd.f32 1.0, %v4408_v61  ;;  %v4436_v36 = vmul.f32 %v4434_v0, %v4406_v58  ;;  %v4437_v6 = vmul.f32 1.442695, %v4435_v12 }
 0x365   : > { %6623 = vrcp.f32 %v4410_v62  ;;  %v4439_v10 = vmul.f32 1.442695, %v4436_v36 }
 0x366   : > { %6625 = vpow2.f32 %v4437_v6 }
 0x367   : > { %6627 = vpow2.f32 %v4439_v10 }
 0x370   : > { %v6622_v63 = vpop.eup %6621 }
 0x371   : > { %v4415_v5 = vmul.f32 1.0614054, %v6622_v63 }
 0x372   : > { %v6624_v49 = vpop.eup %6623 }
 0x373   : > { %v4417_v8 = vadd.f32 -1.4531521, %v4415_v5  ;;  %v4416_v41 = vmul.f32 1.0614054, %v6624_v49  ;;  %v6626_v23 = vpop.eup %6625 }
 0x374   : > { %v6628_v27 = vpop.eup %6627 }
 0x375   : > { %v4419_v11 = vmul.f32 %v6622_v63, %v4417_v8  ;;  %v4418_v54 = vadd.f32 -1.4531521, %v4416_v41 }
 0x377   : > { %v4421_v13 = vadd.f32 1.4214138, %v4419_v11  ;;  %v4420_v14 = vmul.f32 %v6624_v49, %v4418_v54 }
 0x379   : > { %v4423_v59 = vmul.f32 %v6622_v63, %v4421_v13  ;;  %v4422_v53 = vadd.f32 1.4214138, %v4420_v14 }
 0x37b   : > { %v4425_v16 = vadd.f32 -0.28449672, %v4423_v59  ;;  %v4424_v17 = vmul.f32 %v6624_v49, %v4422_v53 }
 0x37d   : > { %v4427_v18 = vmul.f32 %v6622_v63, %v4425_v16  ;;  %v4426_v19 = vadd.f32 -0.28449672, %v4424_v17 }
 0x37f   : > { %v4429_v20 = vadd.f32 0.2548296, %v4427_v18  ;;  %v4428_v35 = vmul.f32 %v6624_v49, %v4426_v19 }
 0x381   : > { %v4431_v22 = vmul.f32 %v6622_v63, %v4429_v20  ;;  %v4430_v38 = vadd.f32 0.2548296, %v4428_v35 }
 0x383   : > { %v4441_v26 = vmul.f32 %v6626_v23, %v4431_v22  ;;  %v4432_v2 = vmul.f32 %v6624_v49, %v4430_v38 }
 0x385   : > { %v4443_v29 = vsub.f32 1.0, %v4441_v26  ;;  %v4442_v56 = vmul.f32 %v6628_v27, %v4432_v2 }
 0x387   : > { %v4447_v7 = vsub.f32 0.0, %v4443_v29  ;;  %v4444_v30 = vsub.f32 1.0, %v4442_v56 }
 0x389   : > { %v4449_v31 = vsel %vm4445_vm1, %v4447_v7, %v4443_v29  ;;  %v4448_v33 = vsub.f32 0.0, %v4444_v30 }
 0x38a   : > { %v4451_v32 = vadd.f32 1.0, %v4449_v31 }
 0x38b   : > { %v4450_v34 = vsel %vm4446_vm2, %v4448_v33, %v4444_v30 }
 0x38c   : > { %v4452_v39 = vadd.f32 1.0, %v4450_v34  ;;  %v4453_v40 = vmul.f32 %v4451_v32, %v4401_v60 }
 0x38e   : > { %v4454_v42 = vmul.f32 %v4452_v39, %v4402_v37  ;;  %v4456_v43 = vpack.c.bf16 %v4453_v40, %v4453_v40 }
 0x390   : > { %v4457_v15 = vpack.c.bf16 %v4454_v42, %v4454_v42 }
 0x392   : > { %4874 = vmatprep.mubr.bf16.mxu1 %v4457_v15  ;;  %4915 = vmatprep.mubr.bf16.mxu0 %v4457_v15 }
 0x393   : > { %4875 = vmatmul.mubr.bf16.vlgmr.msra.gmra.mxu1 %v4456_v43  ;;  %4916 = vmatmul.mubr.bf16.vlgmr.msra.gmra.mxu0 %v4456_v43 }
 0x453   : > { %v4876_v44 = vpop.f32.mrf.mxu1  ;;  %v4917_v1 = vpop.f32.mrf.mxu0 }
 0x455   : > { %v4878_v45 = vpop.f32.mrf.mxu1  ;;  %v4919_v46 = vpop.f32.mrf.mxu0 }
 0x456   : > { %v4928_v47 = vcombine.low %v4876_v44, %v4878_v45  ;;  %v4929_v21 = vcombine.low %v4917_v1, %v4919_v46 }
 0x457   : > { %v4880_v48 = vpop.f32.mrf.mxu1  ;;  %v4921_v3 = vpop.f32.mrf.mxu0 }
 0x458   : > { %v4936_v50 = vrot.slane %v4928_v47, %v7089_v4  ;;  %v4943_v25 = vrot.slane %v4929_v21, %v7089_v4 }
 0x459   : > { %v4881_v51 = vpop.f32.mrf.mxu1  ;;  %v4922_v52 = vpop.f32.mrf.mxu0 }
 0x45a   : > { %v4944_v57 = vcombine.low %v4936_v50, %v4943_v25 }
 0x45c   : > { %v4946_v28 = vadd.f32 %v4944_v57, %v4455_v55 }
 0x45e   : > { %4947 = vst [vmem:[#allocation10] sm:$0xff] %v4946_v28 }
 0x45f   : > { %6752 = shalt.err (!%p6749_p9)
}
 0x460   : > { %5679 = dma.vmem_to_hbm [thread:$0]  (%p5699_p8), %s4956_s16, 128, %s7820_s5, [#allocation4]  }
 0x461   : > { %6792 = dma.done.wait (%p5699_p8), [#allocation4], 128  }
 0x462   : > { %6794 = vsyncadd (%p5699_p8), [#allocation4], 4294967168 }
 0x463 PF: > { %p20_p1 = scmp.ge.s32.totalorder %s6875_s22, 6   ;;  %s7835_s18 = smov %s6801_s19 }
 0x464   : > { %s7836_s19 = smov %s6805_s20  ;;  %s7837_s20 = smov %s6885_s25 }
 0x465   : > { %s7838_s21 = smov %s6875_s22  ;;  %22 = sbr.rel (!%p20_p1) target bundleno = 9 (0x9), region = 109 }
 0x46a   :  { %4968 = vsyncpa [#allocation3], 1 }
 0x46b   :  { %4970 = vsyncpa [#allocation3 + $0x1], 1 }
 0x46c   :  { %4971 = vsyncpa [#allocation6], 1 }
 0x46d   :  { %4973 = vsyncpa [#allocation6 + $0x1], 1 }
 0x46e   :  { %4974 = vsyncpa [#allocation9], 1 }
 0x46f   :  { %4975 = vsyncpa [#allocation4], 1 }
 0x470   :  { %4977 = vsyncpa [#allocation4 + $0x1], 1 }

</bundles_post_ra>
